<compile_context>
chip_gen: v7x
topology: tpu7x:2x2x1
jax: 0.10.0
libtpu: 0.0.40
codegen_flags: <defaults>
</compile_context>

<pallas_src>
from functools import partial

import numpy as np
import jax
import jax.numpy as jnp
from jax.experimental import pallas as pl
from jax.experimental.pallas import tpu as pltpu


# Fixed LeNet/MNIST geometry (28x28 input is required by fc1 = 4*4*50).
_HALF = 256            # lanes of one W-parity block (>= 12*20 and >= 4*50)
_C1_COLS = 2 * _HALF   # conv1 output lanes: [even-wo | odd-wo]
_C2_COLS = 2 * _HALF   # conv2 output lanes
_FC1_PAD = 512         # fc1 output lanes (500 real + 12 zero)
_FC2_PAD = 128         # fc2 output lanes (n_out real, rest zero)


def _pick_batch_block(batch):
    if batch % 16 == 0:
        return 16
    if batch % 8 == 0:
        return 8
    return batch


# ----------------------------------------------------------------------------
# Fused kernel
# ----------------------------------------------------------------------------
def _lenet_kernel(x_ref, w1b_ref, b1p_ref, w2b_ref, b2p_ref, sel_ref,
                  wfc1_ref, bfc1_ref, wfc2_ref, bfc2_ref,
                  out_ref, pool1_ref):
    f32 = jnp.float32
    bb = x_ref.shape[0]

    # ---- conv1 (5x5, 1->20) + bias + ReLU: 5 banded MXU matmuls -----------
    acc1 = None
    for ki in range(5):
        rows = x_ref[:, ki:ki + 24, :].reshape(bb * 24, 28)        # (bb*24, 28)
        part = jnp.dot(rows, w1b_ref[ki], preferred_element_type=f32)
        acc1 = part if acc1 is None else acc1 + part               # (bb*24, 512)
    h1 = jnp.maximum(acc1 + b1p_ref[...], 0.0)

    # ---- 2x2 max-pool #1 ---------------------------------------------------
    # W direction: max of the two aligned parity blocks (pure lane slices).
    h1w = jnp.maximum(h1[:, :_HALF], h1[:, _HALF:])                # (bb*24, 256)
    # H direction: pairwise row max into VMEM scratch (cols = wp*20 + c).
    h1w3 = h1w.reshape(bb, 24, _HALF)
    for hp in range(12):
        pool1_ref[:, hp:hp + 1, :] = jnp.maximum(
            h1w3[:, 2 * hp:2 * hp + 1, :], h1w3[:, 2 * hp + 1:2 * hp + 2, :])

    # ---- conv2 (5x5, 20->50) + bias + ReLU: 5 banded MXU matmuls (K=256) ---
    acc2 = None
    for ki in range(5):
        rows = pool1_ref[:, ki:ki + 8, :].reshape(bb * 8, _HALF)   # (bb*8, 256)
        part = jnp.dot(rows, w2b_ref[ki], preferred_element_type=f32)
        acc2 = part if acc2 is None else acc2 + part               # (bb*8, 512)
    h2 = jnp.maximum(acc2 + b2p_ref[...], 0.0)

    # ---- 2x2 max-pool #2 fused with flatten + fc1 --------------------------
    h2w = jnp.maximum(h2[:, :_HALF], h2[:, _HALF:])                # (bb*8, 256)
    z1 = None
    for hp in range(4):
        # Constant 0/1 selection matmuls pick rows (b, 2*hp) / (b, 2*hp+1).
        even = jnp.dot(sel_ref[2 * hp], h2w, preferred_element_type=f32)
        odd = jnp.dot(sel_ref[2 * hp + 1], h2w, preferred_element_type=f32)
        pooled = jnp.maximum(even, odd)                            # (bb, 256)
        part = jnp.dot(pooled.astype(jnp.bfloat16), wfc1_ref[hp],
                       preferred_element_type=f32)                 # (bb, 512)
        z1 = part if z1 is None else z1 + part
    a1 = jnp.maximum(z1 + bfc1_ref[...], 0.0)                      # (bb, 512)

    # ---- fc2 (output padded to 128 lanes) ----------------------------------
    z2 = jnp.dot(a1.astype(jnp.bfloat16), wfc2_ref[...],
                 preferred_element_type=f32) + bfc2_ref[...]
    out_ref[...] = z2.astype(out_ref.dtype)


# ----------------------------------------------------------------------------
# Wrapper
# ----------------------------------------------------------------------------
@partial(jax.jit, static_argnames=("n_out",))
def lenet_forward(x_nchw, params, n_out=10):
    batch = x_nchw.shape[0]
    x = x_nchw.reshape(batch, 28, 28).astype(jnp.float32)          # Cin == 1
    bb = _pick_batch_block(batch)
    grid = (batch // bb,)

    # Constant 0/1 row-selection matrices for the pool2 row pairs.
    sel_np = np.zeros((8, bb, 8 * bb), np.float32)
    for r in range(8):
        for b in range(bb):
            sel_np[r, b, 8 * b + r] = 1.0
    sel = jnp.asarray(sel_np)

    out = pl.pallas_call(
        _lenet_kernel,
        out_shape=jax.ShapeDtypeStruct((batch, _FC2_PAD), jnp.float32),
        grid=grid,
        in_specs=[
            pl.BlockSpec((bb, 28, 28), lambda i: (i, 0, 0)),          # x
            pl.BlockSpec((5, 28, _C1_COLS), lambda i: (0, 0, 0)),     # w1 banded
            pl.BlockSpec((1, _C1_COLS), lambda i: (0, 0)),            # b1
            pl.BlockSpec((5, _HALF, _C2_COLS), lambda i: (0, 0, 0)),  # w2 banded
            pl.BlockSpec((1, _C2_COLS), lambda i: (0, 0)),            # b2
            pl.BlockSpec((8, bb, 8 * bb), lambda i: (0, 0, 0)),       # pool2 sel
            pl.BlockSpec((4, _HALF, _FC1_PAD), lambda i: (0, 0, 0)),  # fc1 (bf16)
            pl.BlockSpec((1, _FC1_PAD), lambda i: (0, 0)),            # bfc1
            pl.BlockSpec((_FC1_PAD, _FC2_PAD), lambda i: (0, 0)),     # fc2 (bf16)
            pl.BlockSpec((1, _FC2_PAD), lambda i: (0, 0)),            # bfc2
        ],
        out_specs=pl.BlockSpec((bb, _FC2_PAD), lambda i: (i, 0)),
        scratch_shapes=[pltpu.VMEM((bb, 12, _HALF), jnp.float32)],
        compiler_params=pltpu.CompilerParams(
            dimension_semantics=("parallel",)),
    )(x, params["w1b"], params["b1p"], params["w2b"], params["b2p"], sel,
      params["wfc1"], params["bfc1"], params["wfc2"], params["bfc2"])
    return out[:, :n_out]


# ----------------------------------------------------------------------------
# Init-time weight packing (zero runtime cost)
# ----------------------------------------------------------------------------
def _banded_conv_weights(w_oihw, in_width, in_ch, k_pad, half):
    """Per-kernel-row banded matrix mapping one input row (in_width*in_ch lanes,
    zero-padded to k_pad) to one conv-output row laid out as
    [even-wo block | odd-wo block], each block padded to `half` lanes."""
    w = np.asarray(w_oihw, np.float32)                   # (Cout, Cin, KH, KW)
    c_out, c_in, kh, kw = w.shape
    w_out = in_width - kw + 1
    banded = np.zeros((kh, k_pad, 2 * half), np.float32)
    for ki in range(kh):
        for parity in range(2):
            for wp in range(w_out // 2):
                wo = 2 * wp + parity
                col0 = parity * half + wp * c_out
                for kj in range(kw):
                    row0 = (wo + kj) * c_in
                    banded[ki, row0:row0 + c_in, col0:col0 + c_out] = \
                        w[:, :, ki, kj].T
    return banded


def _permuted_conv_bias(b, w_out, half):
    b = np.asarray(b, np.float32)
    c_out = b.shape[0]
    out = np.zeros((1, 2 * half), np.float32)
    for parity in range(2):
        for wp in range(w_out // 2):
            col0 = parity * half + wp * c_out
            out[0, col0:col0 + c_out] = b
    return out


def _fc1_weights(w_fc1):
    """(500, 800) torch-layout fc1 weight -> (4, 256, 512): per-pooled-row slabs
    whose K layout matches the kernel's pooled columns (wp*50 + c)."""
    w = np.asarray(w_fc1, np.float32)
    out = np.zeros((4, _HALF, _FC1_PAD), np.float32)
    for hp in range(4):
        for wp in range(4):
            for c in range(50):
                f = c * 16 + hp * 4 + wp        # torch x.view(-1, 800) order
                out[hp, wp * 50 + c, :500] = w[:, f]
    return out


def _fc2_weights(w_fc2, n_out):
    w = np.asarray(w_fc2, np.float32)           # (n_out, 500)
    out = np.zeros((_FC1_PAD, _FC2_PAD), np.float32)
    out[:500, :n_out] = w.T
    return out


def init_params(key, gain=1.0, n_out=10):
    ks = jax.random.split(key, 8)

    def xavier(k, shape, fan_in, fan_out):
        std = gain * (2.0 / (fan_in + fan_out)) ** 0.5
        return std * jax.random.normal(k, shape, dtype=jnp.float32)

    def unif(k, shape, fan_in):
        bound = 1.0 / (fan_in ** 0.5)
        return jax.random.uniform(k, shape, jnp.float32, -bound, bound)

    # PyTorch-convention parameter tensors (same init scheme as the module).
    raw = {
        "w1": xavier(ks[0], (20, 1, 5, 5), 1 * 25, 20 * 25),
        "b1": unif(ks[1], (20,), 1 * 25),
        "w2": xavier(ks[2], (50, 20, 5, 5), 20 * 25, 50 * 25),
        "b2": unif(ks[3], (50,), 20 * 25),
        "wfc1": xavier(ks[4], (500, 800), 800, 500),
        "bfc1": unif(ks[5], (500,), 800),
        "wfc2": xavier(ks[6], (n_out, 500), 500, n_out),
        "bfc2": unif(ks[7], (n_out,), 500),
    }

    bfc1p = np.zeros((1, _FC1_PAD), np.float32)
    bfc1p[0, :500] = np.asarray(raw["bfc1"])
    bfc2p = np.zeros((1, _FC2_PAD), np.float32)
    bfc2p[0, :n_out] = np.asarray(raw["bfc2"])

    params = {
        "w1b": jnp.asarray(_banded_conv_weights(raw["w1"], 28, 1, 28, _HALF)),
        "b1p": jnp.asarray(_permuted_conv_bias(raw["b1"], 24, _HALF)),
        "w2b": jnp.asarray(_banded_conv_weights(raw["w2"], 12, 20, _HALF, _HALF)),
        "b2p": jnp.asarray(_permuted_conv_bias(raw["b2"], 8, _HALF)),
        "wfc1": jnp.asarray(_fc1_weights(raw["wfc1"]), jnp.bfloat16),
        "bfc1": jnp.asarray(bfc1p),
        "wfc2": jnp.asarray(_fc2_weights(raw["wfc2"], n_out), jnp.bfloat16),
        "bfc2": jnp.asarray(bfc2p),
    }
    return params, raw


# Plain-XLA reference (torch-equivalent) for a numerical sanity check.
def reference_forward(x_nchw, raw):
    dn = ("NCHW", "OIHW", "NCHW")
    h = jax.lax.conv_general_dilated(x_nchw, raw["w1"], (1, 1), "VALID",
                                     dimension_numbers=dn)
    h = jnp.maximum(h + raw["b1"][None, :, None, None], 0.0)
    h = jax.lax.reduce_window(h, -jnp.inf, jax.lax.max, (1, 1, 2, 2),
                              (1, 1, 2, 2), "VALID")
    h = jax.lax.conv_general_dilated(h, raw["w2"], (1, 1), "VALID",
                                     dimension_numbers=dn)
    h = jnp.maximum(h + raw["b2"][None, :, None, None], 0.0)
    h = jax.lax.reduce_window(h, -jnp.inf, jax.lax.max, (1, 1, 2, 2),
                              (1, 1, 2, 2), "VALID")
    h = h.reshape(h.shape[0], -1)                     # (C, H, W) flatten order
    h = jnp.maximum(h @ raw["wfc1"].T + raw["bfc1"], 0.0)
    return h @ raw["wfc2"].T + raw["bfc2"]


if __name__ == "__main__":
    key = jax.random.PRNGKey(0)
    pkey, xkey = jax.random.split(key)
    params, raw = init_params(pkey, gain=1.0, n_out=10)

    # MNIST-shaped NCHW input (28x28 is required by fc1 = 4*4*50), small batch.
    x = jax.random.normal(xkey, (2, 1, 28, 28), dtype=jnp.float32)

    out = lenet_forward(x, params, n_out=10)
    jax.block_until_ready(out)
    assert out.shape == (2, 10) and out.dtype == jnp.float32

    # Numerical sanity check (loose tol: fc operands are bf16 on the MXU).
    ref = reference_forward(x, raw)
    err = float(jnp.max(jnp.abs(out - ref)))
    assert err < 5e-2, f"mismatch vs reference: {err}"
    print("KERNEL_OK")
</pallas_src>

<mosaic_0001>
module attributes {stable_mosaic.version = 11 : i64} {
  func.func @_lenet_kernel(%arg0: i32, %arg1: memref<2x28x28xf32, #tpu.memory_space<vmem>>, %arg2: memref<5x28x512xf32, #tpu.memory_space<vmem>>, %arg3: memref<1x512xf32, #tpu.memory_space<vmem>>, %arg4: memref<5x256x512xf32, #tpu.memory_space<vmem>>, %arg5: memref<1x512xf32, #tpu.memory_space<vmem>>, %arg6: memref<8x2x16xf32, #tpu.memory_space<vmem>>, %arg7: memref<4x256x512xbf16, #tpu.memory_space<vmem>>, %arg8: memref<1x512xf32, #tpu.memory_space<vmem>>, %arg9: memref<512x128xbf16, #tpu.memory_space<vmem>>, %arg10: memref<1x128xf32, #tpu.memory_space<vmem>>, %arg11: memref<2x128xf32, #tpu.memory_space<vmem>>, %arg12: memref<2x12x256xf32, #tpu.memory_space<vmem>>) attributes {dimension_semantics = [#tpu.dimension_semantics<parallel>], iteration_bounds = array<i64: 1>, scalar_prefetch = 0 : i64, scratch_operands = 1 : i64, tpu.core_type = #tpu.core_type<tc>, window_params = [{transform_indices = @transform_0, window_bounds = array<i64: 2, 28, 28>}, {pipeline_mode = #tpu.pipeline_mode<synchronous>, transform_indices = @transform_1, window_bounds = array<i64: 5, 28, 512>}, {pipeline_mode = #tpu.pipeline_mode<synchronous>, transform_indices = @transform_2, window_bounds = array<i64: 1, 512>}, {pipeline_mode = #tpu.pipeline_mode<synchronous>, transform_indices = @transform_3, window_bounds = array<i64: 5, 256, 512>}, {pipeline_mode = #tpu.pipeline_mode<synchronous>, transform_indices = @transform_4, window_bounds = array<i64: 1, 512>}, {pipeline_mode = #tpu.pipeline_mode<synchronous>, transform_indices = @transform_5, window_bounds = array<i64: 8, 2, 16>}, {pipeline_mode = #tpu.pipeline_mode<synchronous>, transform_indices = @transform_6, window_bounds = array<i64: 4, 256, 512>}, {pipeline_mode = #tpu.pipeline_mode<synchronous>, transform_indices = @transform_7, window_bounds = array<i64: 1, 512>}, {pipeline_mode = #tpu.pipeline_mode<synchronous>, transform_indices = @transform_8, window_bounds = array<i64: 512, 128>}, {pipeline_mode = #tpu.pipeline_mode<synchronous>, transform_indices = @transform_9, window_bounds = array<i64: 1, 128>}, {transform_indices = @transform_10, window_bounds = array<i64: 2, 128>}]} {
    %c0 = arith.constant 0 : index
    %c0_0 = arith.constant 0 : index
    %c0_1 = arith.constant 0 : index
    %0 = vector.load %arg1[%c0, %c0_0, %c0_1] : memref<2x28x28xf32, #tpu.memory_space<vmem>>, vector<2x24x28xf32>
    %1 = vector.shape_cast %0 : vector<2x24x28xf32> to vector<48x28xf32>
    %c0_2 = arith.constant 0 : index
    %c0_3 = arith.constant 0 : index
    %c0_4 = arith.constant 0 : index
    %2 = vector.load %arg2[%c0_2, %c0_3, %c0_4] : memref<5x28x512xf32, #tpu.memory_space<vmem>>, vector<1x28x512xf32>
    %3 = vector.shape_cast %2 : vector<1x28x512xf32> to vector<28x512xf32>
    %cst = arith.constant dense<0.000000e+00> : vector<48x512xf32>
    %4 = tpu.matmul %1, %3, %cst {dimension_numbers = #tpu.dot_dimension_numbers<[1], [0], [0], [1], [0, 0, 1, 1], [], []>} : vector<48x28xf32>, vector<28x512xf32>, vector<48x512xf32> -> vector<48x512xf32>
    %c0_5 = arith.constant 0 : index
    %c1 = arith.constant 1 : index
    %c0_6 = arith.constant 0 : index
    %5 = vector.load %arg1[%c0_5, %c1, %c0_6] : memref<2x28x28xf32, #tpu.memory_space<vmem>>, vector<2x24x28xf32>
    %6 = vector.shape_cast %5 : vector<2x24x28xf32> to vector<48x28xf32>
    %c1_7 = arith.constant 1 : index
    %c0_8 = arith.constant 0 : index
    %c0_9 = arith.constant 0 : index
    %7 = vector.load %arg2[%c1_7, %c0_8, %c0_9] : memref<5x28x512xf32, #tpu.memory_space<vmem>>, vector<1x28x512xf32>
    %8 = vector.shape_cast %7 : vector<1x28x512xf32> to vector<28x512xf32>
    %cst_10 = arith.constant dense<0.000000e+00> : vector<48x512xf32>
    %9 = tpu.matmul %6, %8, %cst_10 {dimension_numbers = #tpu.dot_dimension_numbers<[1], [0], [0], [1], [0, 0, 1, 1], [], []>} : vector<48x28xf32>, vector<28x512xf32>, vector<48x512xf32> -> vector<48x512xf32>
    %10 = arith.addf %4, %9 : vector<48x512xf32>
    %c0_11 = arith.constant 0 : index
    %c2 = arith.constant 2 : index
    %c0_12 = arith.constant 0 : index
    %11 = vector.load %arg1[%c0_11, %c2, %c0_12] : memref<2x28x28xf32, #tpu.memory_space<vmem>>, vector<2x24x28xf32>
    %12 = vector.shape_cast %11 : vector<2x24x28xf32> to vector<48x28xf32>
    %c2_13 = arith.constant 2 : index
    %c0_14 = arith.constant 0 : index
    %c0_15 = arith.constant 0 : index
    %13 = vector.load %arg2[%c2_13, %c0_14, %c0_15] : memref<5x28x512xf32, #tpu.memory_space<vmem>>, vector<1x28x512xf32>
    %14 = vector.shape_cast %13 : vector<1x28x512xf32> to vector<28x512xf32>
    %cst_16 = arith.constant dense<0.000000e+00> : vector<48x512xf32>
    %15 = tpu.matmul %12, %14, %cst_16 {dimension_numbers = #tpu.dot_dimension_numbers<[1], [0], [0], [1], [0, 0, 1, 1], [], []>} : vector<48x28xf32>, vector<28x512xf32>, vector<48x512xf32> -> vector<48x512xf32>
    %16 = arith.addf %10, %15 : vector<48x512xf32>
    %c0_17 = arith.constant 0 : index
    %c3 = arith.constant 3 : index
    %c0_18 = arith.constant 0 : index
    %17 = vector.load %arg1[%c0_17, %c3, %c0_18] : memref<2x28x28xf32, #tpu.memory_space<vmem>>, vector<2x24x28xf32>
    %18 = vector.shape_cast %17 : vector<2x24x28xf32> to vector<48x28xf32>
    %c3_19 = arith.constant 3 : index
    %c0_20 = arith.constant 0 : index
    %c0_21 = arith.constant 0 : index
    %19 = vector.load %arg2[%c3_19, %c0_20, %c0_21] : memref<5x28x512xf32, #tpu.memory_space<vmem>>, vector<1x28x512xf32>
    %20 = vector.shape_cast %19 : vector<1x28x512xf32> to vector<28x512xf32>
    %cst_22 = arith.constant dense<0.000000e+00> : vector<48x512xf32>
    %21 = tpu.matmul %18, %20, %cst_22 {dimension_numbers = #tpu.dot_dimension_numbers<[1], [0], [0], [1], [0, 0, 1, 1], [], []>} : vector<48x28xf32>, vector<28x512xf32>, vector<48x512xf32> -> vector<48x512xf32>
    %22 = arith.addf %16, %21 : vector<48x512xf32>
    %c0_23 = arith.constant 0 : index
    %c4 = arith.constant 4 : index
    %c0_24 = arith.constant 0 : index
    %23 = vector.load %arg1[%c0_23, %c4, %c0_24] : memref<2x28x28xf32, #tpu.memory_space<vmem>>, vector<2x24x28xf32>
    %24 = vector.shape_cast %23 : vector<2x24x28xf32> to vector<48x28xf32>
    %c4_25 = arith.constant 4 : index
    %c0_26 = arith.constant 0 : index
    %c0_27 = arith.constant 0 : index
    %25 = vector.load %arg2[%c4_25, %c0_26, %c0_27] : memref<5x28x512xf32, #tpu.memory_space<vmem>>, vector<1x28x512xf32>
    %26 = vector.shape_cast %25 : vector<1x28x512xf32> to vector<28x512xf32>
    %cst_28 = arith.constant dense<0.000000e+00> : vector<48x512xf32>
    %27 = tpu.matmul %24, %26, %cst_28 {dimension_numbers = #tpu.dot_dimension_numbers<[1], [0], [0], [1], [0, 0, 1, 1], [], []>} : vector<48x28xf32>, vector<28x512xf32>, vector<48x512xf32> -> vector<48x512xf32>
    %28 = arith.addf %22, %27 : vector<48x512xf32>
    %c0_29 = arith.constant 0 : index
    %c0_30 = arith.constant 0 : index
    %29 = vector.load %arg3[%c0_29, %c0_30] : memref<1x512xf32, #tpu.memory_space<vmem>>, vector<1x512xf32>
    %30 = vector.broadcast %29 : vector<1x512xf32> to vector<48x512xf32>
    %31 = arith.addf %28, %30 : vector<48x512xf32>
    %cst_31 = arith.constant 0.000000e+00 : f32
    %32 = vector.broadcast %cst_31 : f32 to vector<48x512xf32>
    %33 = arith.maximumf %31, %32 : vector<48x512xf32>
    %34 = vector.extract_strided_slice %33 {offsets = [0, 0], sizes = [48, 256], strides = [1, 1]} : vector<48x512xf32> to vector<48x256xf32>
    %35 = vector.extract_strided_slice %33 {offsets = [0, 256], sizes = [48, 256], strides = [1, 1]} : vector<48x512xf32> to vector<48x256xf32>
    %36 = arith.maximumf %34, %35 : vector<48x256xf32>
    %37 = vector.shape_cast %36 : vector<48x256xf32> to vector<2x24x256xf32>
    %38 = vector.extract_strided_slice %37 {offsets = [0, 0, 0], sizes = [2, 1, 256], strides = [1, 1, 1]} : vector<2x24x256xf32> to vector<2x1x256xf32>
    %39 = vector.extract_strided_slice %37 {offsets = [0, 1, 0], sizes = [2, 1, 256], strides = [1, 1, 1]} : vector<2x24x256xf32> to vector<2x1x256xf32>
    %40 = arith.maximumf %38, %39 : vector<2x1x256xf32>
    %c0_32 = arith.constant 0 : index
    %c0_33 = arith.constant 0 : index
    %c0_34 = arith.constant 0 : index
    %41 = vector.load %arg12[%c0_32, %c0_33, %c0_34] : memref<2x12x256xf32, #tpu.memory_space<vmem>>, vector<2x1x256xf32>
    tpu.vector_store %arg12[%c0_32, %c0_33, %c0_34], %40 {strides = array<i32>} : memref<2x12x256xf32, #tpu.memory_space<vmem>>, vector<2x1x256xf32>,
    %42 = vector.extract_strided_slice %37 {offsets = [0, 2, 0], sizes = [2, 1, 256], strides = [1, 1, 1]} : vector<2x24x256xf32> to vector<2x1x256xf32>
    %43 = vector.extract_strided_slice %37 {offsets = [0, 3, 0], sizes = [2, 1, 256], strides = [1, 1, 1]} : vector<2x24x256xf32> to vector<2x1x256xf32>
    %44 = arith.maximumf %42, %43 : vector<2x1x256xf32>
    %c0_35 = arith.constant 0 : index
    %c1_36 = arith.constant 1 : index
    %c0_37 = arith.constant 0 : index
    %45 = vector.load %arg12[%c0_35, %c1_36, %c0_37] : memref<2x12x256xf32, #tpu.memory_space<vmem>>, vector<2x1x256xf32>
    tpu.vector_store %arg12[%c0_35, %c1_36, %c0_37], %44 {strides = array<i32>} : memref<2x12x256xf32, #tpu.memory_space<vmem>>, vector<2x1x256xf32>,
    %46 = vector.extract_strided_slice %37 {offsets = [0, 4, 0], sizes = [2, 1, 256], strides = [1, 1, 1]} : vector<2x24x256xf32> to vector<2x1x256xf32>
    %47 = vector.extract_strided_slice %37 {offsets = [0, 5, 0], sizes = [2, 1, 256], strides = [1, 1, 1]} : vector<2x24x256xf32> to vector<2x1x256xf32>
    %48 = arith.maximumf %46, %47 : vector<2x1x256xf32>
    %c0_38 = arith.constant 0 : index
    %c2_39 = arith.constant 2 : index
    %c0_40 = arith.constant 0 : index
    %49 = vector.load %arg12[%c0_38, %c2_39, %c0_40] : memref<2x12x256xf32, #tpu.memory_space<vmem>>, vector<2x1x256xf32>
    tpu.vector_store %arg12[%c0_38, %c2_39, %c0_40], %48 {strides = array<i32>} : memref<2x12x256xf32, #tpu.memory_space<vmem>>, vector<2x1x256xf32>,
    %50 = vector.extract_strided_slice %37 {offsets = [0, 6, 0], sizes = [2, 1, 256], strides = [1, 1, 1]} : vector<2x24x256xf32> to vector<2x1x256xf32>
    %51 = vector.extract_strided_slice %37 {offsets = [0, 7, 0], sizes = [2, 1, 256], strides = [1, 1, 1]} : vector<2x24x256xf32> to vector<2x1x256xf32>
    %52 = arith.maximumf %50, %51 : vector<2x1x256xf32>
    %c0_41 = arith.constant 0 : index
    %c3_42 = arith.constant 3 : index
    %c0_43 = arith.constant 0 : index
    %53 = vector.load %arg12[%c0_41, %c3_42, %c0_43] : memref<2x12x256xf32, #tpu.memory_space<vmem>>, vector<2x1x256xf32>
    tpu.vector_store %arg12[%c0_41, %c3_42, %c0_43], %52 {strides = array<i32>} : memref<2x12x256xf32, #tpu.memory_space<vmem>>, vector<2x1x256xf32>,
    %54 = vector.extract_strided_slice %37 {offsets = [0, 8, 0], sizes = [2, 1, 256], strides = [1, 1, 1]} : vector<2x24x256xf32> to vector<2x1x256xf32>
    %55 = vector.extract_strided_slice %37 {offsets = [0, 9, 0], sizes = [2, 1, 256], strides = [1, 1, 1]} : vector<2x24x256xf32> to vector<2x1x256xf32>
    %56 = arith.maximumf %54, %55 : vector<2x1x256xf32>
    %c0_44 = arith.constant 0 : index
    %c4_45 = arith.constant 4 : index
    %c0_46 = arith.constant 0 : index
    %57 = vector.load %arg12[%c0_44, %c4_45, %c0_46] : memref<2x12x256xf32, #tpu.memory_space<vmem>>, vector<2x1x256xf32>
    tpu.vector_store %arg12[%c0_44, %c4_45, %c0_46], %56 {strides = array<i32>} : memref<2x12x256xf32, #tpu.memory_space<vmem>>, vector<2x1x256xf32>,
    %58 = vector.extract_strided_slice %37 {offsets = [0, 10, 0], sizes = [2, 1, 256], strides = [1, 1, 1]} : vector<2x24x256xf32> to vector<2x1x256xf32>
    %59 = vector.extract_strided_slice %37 {offsets = [0, 11, 0], sizes = [2, 1, 256], strides = [1, 1, 1]} : vector<2x24x256xf32> to vector<2x1x256xf32>
    %60 = arith.maximumf %58, %59 : vector<2x1x256xf32>
    %c0_47 = arith.constant 0 : index
    %c5 = arith.constant 5 : index
    %c0_48 = arith.constant 0 : index
    %61 = vector.load %arg12[%c0_47, %c5, %c0_48] : memref<2x12x256xf32, #tpu.memory_space<vmem>>, vector<2x1x256xf32>
    tpu.vector_store %arg12[%c0_47, %c5, %c0_48], %60 {strides = array<i32>} : memref<2x12x256xf32, #tpu.memory_space<vmem>>, vector<2x1x256xf32>,
    %62 = vector.extract_strided_slice %37 {offsets = [0, 12, 0], sizes = [2, 1, 256], strides = [1, 1, 1]} : vector<2x24x256xf32> to vector<2x1x256xf32>
    %63 = vector.extract_strided_slice %37 {offsets = [0, 13, 0], sizes = [2, 1, 256], strides = [1, 1, 1]} : vector<2x24x256xf32> to vector<2x1x256xf32>
    %64 = arith.maximumf %62, %63 : vector<2x1x256xf32>
    %c0_49 = arith.constant 0 : index
    %c6 = arith.constant 6 : index
    %c0_50 = arith.constant 0 : index
    %65 = vector.load %arg12[%c0_49, %c6, %c0_50] : memref<2x12x256xf32, #tpu.memory_space<vmem>>, vector<2x1x256xf32>
    tpu.vector_store %arg12[%c0_49, %c6, %c0_50], %64 {strides = array<i32>} : memref<2x12x256xf32, #tpu.memory_space<vmem>>, vector<2x1x256xf32>,
    %66 = vector.extract_strided_slice %37 {offsets = [0, 14, 0], sizes = [2, 1, 256], strides = [1, 1, 1]} : vector<2x24x256xf32> to vector<2x1x256xf32>
    %67 = vector.extract_strided_slice %37 {offsets = [0, 15, 0], sizes = [2, 1, 256], strides = [1, 1, 1]} : vector<2x24x256xf32> to vector<2x1x256xf32>
    %68 = arith.maximumf %66, %67 : vector<2x1x256xf32>
    %c0_51 = arith.constant 0 : index
    %c7 = arith.constant 7 : index
    %c0_52 = arith.constant 0 : index
    %69 = vector.load %arg12[%c0_51, %c7, %c0_52] : memref<2x12x256xf32, #tpu.memory_space<vmem>>, vector<2x1x256xf32>
    tpu.vector_store %arg12[%c0_51, %c7, %c0_52], %68 {strides = array<i32>} : memref<2x12x256xf32, #tpu.memory_space<vmem>>, vector<2x1x256xf32>,
    %70 = vector.extract_strided_slice %37 {offsets = [0, 16, 0], sizes = [2, 1, 256], strides = [1, 1, 1]} : vector<2x24x256xf32> to vector<2x1x256xf32>
    %71 = vector.extract_strided_slice %37 {offsets = [0, 17, 0], sizes = [2, 1, 256], strides = [1, 1, 1]} : vector<2x24x256xf32> to vector<2x1x256xf32>
    %72 = arith.maximumf %70, %71 : vector<2x1x256xf32>
    %c0_53 = arith.constant 0 : index
    %c8 = arith.constant 8 : index
    %c0_54 = arith.constant 0 : index
    %73 = vector.load %arg12[%c0_53, %c8, %c0_54] : memref<2x12x256xf32, #tpu.memory_space<vmem>>, vector<2x1x256xf32>
    tpu.vector_store %arg12[%c0_53, %c8, %c0_54], %72 {strides = array<i32>} : memref<2x12x256xf32, #tpu.memory_space<vmem>>, vector<2x1x256xf32>,
    %74 = vector.extract_strided_slice %37 {offsets = [0, 18, 0], sizes = [2, 1, 256], strides = [1, 1, 1]} : vector<2x24x256xf32> to vector<2x1x256xf32>
    %75 = vector.extract_strided_slice %37 {offsets = [0, 19, 0], sizes = [2, 1, 256], strides = [1, 1, 1]} : vector<2x24x256xf32> to vector<2x1x256xf32>
    %76 = arith.maximumf %74, %75 : vector<2x1x256xf32>
    %c0_55 = arith.constant 0 : index
    %c9 = arith.constant 9 : index
    %c0_56 = arith.constant 0 : index
    %77 = vector.load %arg12[%c0_55, %c9, %c0_56] : memref<2x12x256xf32, #tpu.memory_space<vmem>>, vector<2x1x256xf32>
    tpu.vector_store %arg12[%c0_55, %c9, %c0_56], %76 {strides = array<i32>} : memref<2x12x256xf32, #tpu.memory_space<vmem>>, vector<2x1x256xf32>,
    %78 = vector.extract_strided_slice %37 {offsets = [0, 20, 0], sizes = [2, 1, 256], strides = [1, 1, 1]} : vector<2x24x256xf32> to vector<2x1x256xf32>
    %79 = vector.extract_strided_slice %37 {offsets = [0, 21, 0], sizes = [2, 1, 256], strides = [1, 1, 1]} : vector<2x24x256xf32> to vector<2x1x256xf32>
    %80 = arith.maximumf %78, %79 : vector<2x1x256xf32>
    %c0_57 = arith.constant 0 : index
    %c10 = arith.constant 10 : index
    %c0_58 = arith.constant 0 : index
    %81 = vector.load %arg12[%c0_57, %c10, %c0_58] : memref<2x12x256xf32, #tpu.memory_space<vmem>>, vector<2x1x256xf32>
    tpu.vector_store %arg12[%c0_57, %c10, %c0_58], %80 {strides = array<i32>} : memref<2x12x256xf32, #tpu.memory_space<vmem>>, vector<2x1x256xf32>,
    %82 = vector.extract_strided_slice %37 {offsets = [0, 22, 0], sizes = [2, 1, 256], strides = [1, 1, 1]} : vector<2x24x256xf32> to vector<2x1x256xf32>
    %83 = vector.extract_strided_slice %37 {offsets = [0, 23, 0], sizes = [2, 1, 256], strides = [1, 1, 1]} : vector<2x24x256xf32> to vector<2x1x256xf32>
    %84 = arith.maximumf %82, %83 : vector<2x1x256xf32>
    %c0_59 = arith.constant 0 : index
    %c11 = arith.constant 11 : index
    %c0_60 = arith.constant 0 : index
    %85 = vector.load %arg12[%c0_59, %c11, %c0_60] : memref<2x12x256xf32, #tpu.memory_space<vmem>>, vector<2x1x256xf32>
    tpu.vector_store %arg12[%c0_59, %c11, %c0_60], %84 {strides = array<i32>} : memref<2x12x256xf32, #tpu.memory_space<vmem>>, vector<2x1x256xf32>,
    %c0_61 = arith.constant 0 : index
    %c0_62 = arith.constant 0 : index
    %c0_63 = arith.constant 0 : index
    %86 = vector.load %arg12[%c0_61, %c0_62, %c0_63] : memref<2x12x256xf32, #tpu.memory_space<vmem>>, vector<2x8x256xf32>
    %87 = vector.shape_cast %86 : vector<2x8x256xf32> to vector<16x256xf32>
    %c0_64 = arith.constant 0 : index
    %c0_65 = arith.constant 0 : index
    %c0_66 = arith.constant 0 : index
    %88 = vector.load %arg4[%c0_64, %c0_65, %c0_66] : memref<5x256x512xf32, #tpu.memory_space<vmem>>, vector<1x256x512xf32>
    %89 = vector.shape_cast %88 : vector<1x256x512xf32> to vector<256x512xf32>
    %cst_67 = arith.constant dense<0.000000e+00> : vector<16x512xf32>
    %90 = tpu.matmul %87, %89, %cst_67 {dimension_numbers = #tpu.dot_dimension_numbers<[1], [0], [0], [1], [0, 0, 1, 1], [], []>} : vector<16x256xf32>, vector<256x512xf32>, vector<16x512xf32> -> vector<16x512xf32>
    %c0_68 = arith.constant 0 : index
    %c1_69 = arith.constant 1 : index
    %c0_70 = arith.constant 0 : index
    %91 = vector.load %arg12[%c0_68, %c1_69, %c0_70] : memref<2x12x256xf32, #tpu.memory_space<vmem>>, vector<2x8x256xf32>
    %92 = vector.shape_cast %91 : vector<2x8x256xf32> to vector<16x256xf32>
    %c1_71 = arith.constant 1 : index
    %c0_72 = arith.constant 0 : index
    %c0_73 = arith.constant 0 : index
    %93 = vector.load %arg4[%c1_71, %c0_72, %c0_73] : memref<5x256x512xf32, #tpu.memory_space<vmem>>, vector<1x256x512xf32>
    %94 = vector.shape_cast %93 : vector<1x256x512xf32> to vector<256x512xf32>
    %cst_74 = arith.constant dense<0.000000e+00> : vector<16x512xf32>
    %95 = tpu.matmul %92, %94, %cst_74 {dimension_numbers = #tpu.dot_dimension_numbers<[1], [0], [0], [1], [0, 0, 1, 1], [], []>} : vector<16x256xf32>, vector<256x512xf32>, vector<16x512xf32> -> vector<16x512xf32>
    %96 = arith.addf %90, %95 : vector<16x512xf32>
    %c0_75 = arith.constant 0 : index
    %c2_76 = arith.constant 2 : index
    %c0_77 = arith.constant 0 : index
    %97 = vector.load %arg12[%c0_75, %c2_76, %c0_77] : memref<2x12x256xf32, #tpu.memory_space<vmem>>, vector<2x8x256xf32>
    %98 = vector.shape_cast %97 : vector<2x8x256xf32> to vector<16x256xf32>
    %c2_78 = arith.constant 2 : index
    %c0_79 = arith.constant 0 : index
    %c0_80 = arith.constant 0 : index
    %99 = vector.load %arg4[%c2_78, %c0_79, %c0_80] : memref<5x256x512xf32, #tpu.memory_space<vmem>>, vector<1x256x512xf32>
    %100 = vector.shape_cast %99 : vector<1x256x512xf32> to vector<256x512xf32>
    %cst_81 = arith.constant dense<0.000000e+00> : vector<16x512xf32>
    %101 = tpu.matmul %98, %100, %cst_81 {dimension_numbers = #tpu.dot_dimension_numbers<[1], [0], [0], [1], [0, 0, 1, 1], [], []>} : vector<16x256xf32>, vector<256x512xf32>, vector<16x512xf32> -> vector<16x512xf32>
    %102 = arith.addf %96, %101 : vector<16x512xf32>
    %c0_82 = arith.constant 0 : index
    %c3_83 = arith.constant 3 : index
    %c0_84 = arith.constant 0 : index
    %103 = vector.load %arg12[%c0_82, %c3_83, %c0_84] : memref<2x12x256xf32, #tpu.memory_space<vmem>>, vector<2x8x256xf32>
    %104 = vector.shape_cast %103 : vector<2x8x256xf32> to vector<16x256xf32>
    %c3_85 = arith.constant 3 : index
    %c0_86 = arith.constant 0 : index
    %c0_87 = arith.constant 0 : index
    %105 = vector.load %arg4[%c3_85, %c0_86, %c0_87] : memref<5x256x512xf32, #tpu.memory_space<vmem>>, vector<1x256x512xf32>
    %106 = vector.shape_cast %105 : vector<1x256x512xf32> to vector<256x512xf32>
    %cst_88 = arith.constant dense<0.000000e+00> : vector<16x512xf32>
    %107 = tpu.matmul %104, %106, %cst_88 {dimension_numbers = #tpu.dot_dimension_numbers<[1], [0], [0], [1], [0, 0, 1, 1], [], []>} : vector<16x256xf32>, vector<256x512xf32>, vector<16x512xf32> -> vector<16x512xf32>
    %108 = arith.addf %102, %107 : vector<16x512xf32>
    %c0_89 = arith.constant 0 : index
    %c4_90 = arith.constant 4 : index
    %c0_91 = arith.constant 0 : index
    %109 = vector.load %arg12[%c0_89, %c4_90, %c0_91] : memref<2x12x256xf32, #tpu.memory_space<vmem>>, vector<2x8x256xf32>
    %110 = vector.shape_cast %109 : vector<2x8x256xf32> to vector<16x256xf32>
    %c4_92 = arith.constant 4 : index
    %c0_93 = arith.constant 0 : index
    %c0_94 = arith.constant 0 : index
    %111 = vector.load %arg4[%c4_92, %c0_93, %c0_94] : memref<5x256x512xf32, #tpu.memory_space<vmem>>, vector<1x256x512xf32>
    %112 = vector.shape_cast %111 : vector<1x256x512xf32> to vector<256x512xf32>
    %cst_95 = arith.constant dense<0.000000e+00> : vector<16x512xf32>
    %113 = tpu.matmul %110, %112, %cst_95 {dimension_numbers = #tpu.dot_dimension_numbers<[1], [0], [0], [1], [0, 0, 1, 1], [], []>} : vector<16x256xf32>, vector<256x512xf32>, vector<16x512xf32> -> vector<16x512xf32>
    %114 = arith.addf %108, %113 : vector<16x512xf32>
    %c0_96 = arith.constant 0 : index
    %c0_97 = arith.constant 0 : index
    %115 = vector.load %arg5[%c0_96, %c0_97] : memref<1x512xf32, #tpu.memory_space<vmem>>, vector<1x512xf32>
    %116 = vector.broadcast %115 : vector<1x512xf32> to vector<16x512xf32>
    %117 = arith.addf %114, %116 : vector<16x512xf32>
    %cst_98 = arith.constant 0.000000e+00 : f32
    %118 = vector.broadcast %cst_98 : f32 to vector<16x512xf32>
    %119 = arith.maximumf %117, %118 : vector<16x512xf32>
    %120 = vector.extract_strided_slice %119 {offsets = [0, 0], sizes = [16, 256], strides = [1, 1]} : vector<16x512xf32> to vector<16x256xf32>
    %121 = vector.extract_strided_slice %119 {offsets = [0, 256], sizes = [16, 256], strides = [1, 1]} : vector<16x512xf32> to vector<16x256xf32>
    %122 = arith.maximumf %120, %121 : vector<16x256xf32>
    %c0_99 = arith.constant 0 : index
    %c0_100 = arith.constant 0 : index
    %c0_101 = arith.constant 0 : index
    %123 = vector.load %arg6[%c0_99, %c0_100, %c0_101] : memref<8x2x16xf32, #tpu.memory_space<vmem>>, vector<1x2x16xf32>
    %124 = vector.shape_cast %123 : vector<1x2x16xf32> to vector<2x16xf32>
    %cst_102 = arith.constant dense<0.000000e+00> : vector<2x256xf32>
    %125 = tpu.matmul %124, %122, %cst_102 {dimension_numbers = #tpu.dot_dimension_numbers<[1], [0], [0], [1], [0, 0, 1, 1], [], []>} : vector<2x16xf32>, vector<16x256xf32>, vector<2x256xf32> -> vector<2x256xf32>
    %c1_103 = arith.constant 1 : index
    %c0_104 = arith.constant 0 : index
    %c0_105 = arith.constant 0 : index
    %126 = vector.load %arg6[%c1_103, %c0_104, %c0_105] : memref<8x2x16xf32, #tpu.memory_space<vmem>>, vector<1x2x16xf32>
    %127 = vector.shape_cast %126 : vector<1x2x16xf32> to vector<2x16xf32>
    %cst_106 = arith.constant dense<0.000000e+00> : vector<2x256xf32>
    %128 = tpu.matmul %127, %122, %cst_106 {dimension_numbers = #tpu.dot_dimension_numbers<[1], [0], [0], [1], [0, 0, 1, 1], [], []>} : vector<2x16xf32>, vector<16x256xf32>, vector<2x256xf32> -> vector<2x256xf32>
    %129 = arith.maximumf %125, %128 : vector<2x256xf32>
    %130 = arith.truncf %129 : vector<2x256xf32> to vector<2x256xbf16>
    %c0_107 = arith.constant 0 : index
    %c0_108 = arith.constant 0 : index
    %c0_109 = arith.constant 0 : index
    %131 = vector.load %arg7[%c0_107, %c0_108, %c0_109] : memref<4x256x512xbf16, #tpu.memory_space<vmem>>, vector<1x256x512xbf16>
    %132 = vector.shape_cast %131 : vector<1x256x512xbf16> to vector<256x512xbf16>
    %cst_110 = arith.constant dense<0.000000e+00> : vector<2x512xf32>
    %133 = tpu.matmul %130, %132, %cst_110 {dimension_numbers = #tpu.dot_dimension_numbers<[1], [0], [0], [1], [0, 0, 1, 1], [], []>} : vector<2x256xbf16>, vector<256x512xbf16>, vector<2x512xf32> -> vector<2x512xf32>
    %c2_111 = arith.constant 2 : index
    %c0_112 = arith.constant 0 : index
    %c0_113 = arith.constant 0 : index
    %134 = vector.load %arg6[%c2_111, %c0_112, %c0_113] : memref<8x2x16xf32, #tpu.memory_space<vmem>>, vector<1x2x16xf32>
    %135 = vector.shape_cast %134 : vector<1x2x16xf32> to vector<2x16xf32>
    %cst_114 = arith.constant dense<0.000000e+00> : vector<2x256xf32>
    %136 = tpu.matmul %135, %122, %cst_114 {dimension_numbers = #tpu.dot_dimension_numbers<[1], [0], [0], [1], [0, 0, 1, 1], [], []>} : vector<2x16xf32>, vector<16x256xf32>, vector<2x256xf32> -> vector<2x256xf32>
    %c3_115 = arith.constant 3 : index
    %c0_116 = arith.constant 0 : index
    %c0_117 = arith.constant 0 : index
    %137 = vector.load %arg6[%c3_115, %c0_116, %c0_117] : memref<8x2x16xf32, #tpu.memory_space<vmem>>, vector<1x2x16xf32>
    %138 = vector.shape_cast %137 : vector<1x2x16xf32> to vector<2x16xf32>
    %cst_118 = arith.constant dense<0.000000e+00> : vector<2x256xf32>
    %139 = tpu.matmul %138, %122, %cst_118 {dimension_numbers = #tpu.dot_dimension_numbers<[1], [0], [0], [1], [0, 0, 1, 1], [], []>} : vector<2x16xf32>, vector<16x256xf32>, vector<2x256xf32> -> vector<2x256xf32>
    %140 = arith.maximumf %136, %139 : vector<2x256xf32>
    %141 = arith.truncf %140 : vector<2x256xf32> to vector<2x256xbf16>
    %c1_119 = arith.constant 1 : index
    %c0_120 = arith.constant 0 : index
    %c0_121 = arith.constant 0 : index
    %142 = vector.load %arg7[%c1_119, %c0_120, %c0_121] : memref<4x256x512xbf16, #tpu.memory_space<vmem>>, vector<1x256x512xbf16>
    %143 = vector.shape_cast %142 : vector<1x256x512xbf16> to vector<256x512xbf16>
    %cst_122 = arith.constant dense<0.000000e+00> : vector<2x512xf32>
    %144 = tpu.matmul %141, %143, %cst_122 {dimension_numbers = #tpu.dot_dimension_numbers<[1], [0], [0], [1], [0, 0, 1, 1], [], []>} : vector<2x256xbf16>, vector<256x512xbf16>, vector<2x512xf32> -> vector<2x512xf32>
    %145 = arith.addf %133, %144 : vector<2x512xf32>
    %c4_123 = arith.constant 4 : index
    %c0_124 = arith.constant 0 : index
    %c0_125 = arith.constant 0 : index
    %146 = vector.load %arg6[%c4_123, %c0_124, %c0_125] : memref<8x2x16xf32, #tpu.memory_space<vmem>>, vector<1x2x16xf32>
    %147 = vector.shape_cast %146 : vector<1x2x16xf32> to vector<2x16xf32>
    %cst_126 = arith.constant dense<0.000000e+00> : vector<2x256xf32>
    %148 = tpu.matmul %147, %122, %cst_126 {dimension_numbers = #tpu.dot_dimension_numbers<[1], [0], [0], [1], [0, 0, 1, 1], [], []>} : vector<2x16xf32>, vector<16x256xf32>, vector<2x256xf32> -> vector<2x256xf32>
    %c5_127 = arith.constant 5 : index
    %c0_128 = arith.constant 0 : index
    %c0_129 = arith.constant 0 : index
    %149 = vector.load %arg6[%c5_127, %c0_128, %c0_129] : memref<8x2x16xf32, #tpu.memory_space<vmem>>, vector<1x2x16xf32>
    %150 = vector.shape_cast %149 : vector<1x2x16xf32> to vector<2x16xf32>
    %cst_130 = arith.constant dense<0.000000e+00> : vector<2x256xf32>
    %151 = tpu.matmul %150, %122, %cst_130 {dimension_numbers = #tpu.dot_dimension_numbers<[1], [0], [0], [1], [0, 0, 1, 1], [], []>} : vector<2x16xf32>, vector<16x256xf32>, vector<2x256xf32> -> vector<2x256xf32>
    %152 = arith.maximumf %148, %151 : vector<2x256xf32>
    %153 = arith.truncf %152 : vector<2x256xf32> to vector<2x256xbf16>
    %c2_131 = arith.constant 2 : index
    %c0_132 = arith.constant 0 : index
    %c0_133 = arith.constant 0 : index
    %154 = vector.load %arg7[%c2_131, %c0_132, %c0_133] : memref<4x256x512xbf16, #tpu.memory_space<vmem>>, vector<1x256x512xbf16>
    %155 = vector.shape_cast %154 : vector<1x256x512xbf16> to vector<256x512xbf16>
    %cst_134 = arith.constant dense<0.000000e+00> : vector<2x512xf32>
    %156 = tpu.matmul %153, %155, %cst_134 {dimension_numbers = #tpu.dot_dimension_numbers<[1], [0], [0], [1], [0, 0, 1, 1], [], []>} : vector<2x256xbf16>, vector<256x512xbf16>, vector<2x512xf32> -> vector<2x512xf32>
    %157 = arith.addf %145, %156 : vector<2x512xf32>
    %c6_135 = arith.constant 6 : index
    %c0_136 = arith.constant 0 : index
    %c0_137 = arith.constant 0 : index
    %158 = vector.load %arg6[%c6_135, %c0_136, %c0_137] : memref<8x2x16xf32, #tpu.memory_space<vmem>>, vector<1x2x16xf32>
    %159 = vector.shape_cast %158 : vector<1x2x16xf32> to vector<2x16xf32>
    %cst_138 = arith.constant dense<0.000000e+00> : vector<2x256xf32>
    %160 = tpu.matmul %159, %122, %cst_138 {dimension_numbers = #tpu.dot_dimension_numbers<[1], [0], [0], [1], [0, 0, 1, 1], [], []>} : vector<2x16xf32>, vector<16x256xf32>, vector<2x256xf32> -> vector<2x256xf32>
    %c7_139 = arith.constant 7 : index
    %c0_140 = arith.constant 0 : index
    %c0_141 = arith.constant 0 : index
    %161 = vector.load %arg6[%c7_139, %c0_140, %c0_141] : memref<8x2x16xf32, #tpu.memory_space<vmem>>, vector<1x2x16xf32>
    %162 = vector.shape_cast %161 : vector<1x2x16xf32> to vector<2x16xf32>
    %cst_142 = arith.constant dense<0.000000e+00> : vector<2x256xf32>
    %163 = tpu.matmul %162, %122, %cst_142 {dimension_numbers = #tpu.dot_dimension_numbers<[1], [0], [0], [1], [0, 0, 1, 1], [], []>} : vector<2x16xf32>, vector<16x256xf32>, vector<2x256xf32> -> vector<2x256xf32>
    %164 = arith.maximumf %160, %163 : vector<2x256xf32>
    %165 = arith.truncf %164 : vector<2x256xf32> to vector<2x256xbf16>
    %c3_143 = arith.constant 3 : index
    %c0_144 = arith.constant 0 : index
    %c0_145 = arith.constant 0 : index
    %166 = vector.load %arg7[%c3_143, %c0_144, %c0_145] : memref<4x256x512xbf16, #tpu.memory_space<vmem>>, vector<1x256x512xbf16>
    %167 = vector.shape_cast %166 : vector<1x256x512xbf16> to vector<256x512xbf16>
    %cst_146 = arith.constant dense<0.000000e+00> : vector<2x512xf32>
    %168 = tpu.matmul %165, %167, %cst_146 {dimension_numbers = #tpu.dot_dimension_numbers<[1], [0], [0], [1], [0, 0, 1, 1], [], []>} : vector<2x256xbf16>, vector<256x512xbf16>, vector<2x512xf32> -> vector<2x512xf32>
    %169 = arith.addf %157, %168 : vector<2x512xf32>
    %c0_147 = arith.constant 0 : index
    %c0_148 = arith.constant 0 : index
    %170 = vector.load %arg8[%c0_147, %c0_148] : memref<1x512xf32, #tpu.memory_space<vmem>>, vector<1x512xf32>
    %171 = vector.broadcast %170 : vector<1x512xf32> to vector<2x512xf32>
    %172 = arith.addf %169, %171 : vector<2x512xf32>
    %cst_149 = arith.constant 0.000000e+00 : f32
    %173 = vector.broadcast %cst_149 : f32 to vector<2x512xf32>
    %174 = arith.maximumf %172, %173 : vector<2x512xf32>
    %175 = arith.truncf %174 : vector<2x512xf32> to vector<2x512xbf16>
    %c0_150 = arith.constant 0 : index
    %c0_151 = arith.constant 0 : index
    %176 = vector.load %arg9[%c0_150, %c0_151] : memref<512x128xbf16, #tpu.memory_space<vmem>>, vector<512x128xbf16>
    %cst_152 = arith.constant dense<0.000000e+00> : vector<2x128xf32>
    %177 = tpu.matmul %175, %176, %cst_152 {dimension_numbers = #tpu.dot_dimension_numbers<[1], [0], [0], [1], [0, 0, 1, 1], [], []>} : vector<2x512xbf16>, vector<512x128xbf16>, vector<2x128xf32> -> vector<2x128xf32>
    %c0_153 = arith.constant 0 : index
    %c0_154 = arith.constant 0 : index
    %178 = vector.load %arg10[%c0_153, %c0_154] : memref<1x128xf32, #tpu.memory_space<vmem>>, vector<1x128xf32>
    %179 = vector.broadcast %178 : vector<1x128xf32> to vector<2x128xf32>
    %180 = arith.addf %177, %179 : vector<2x128xf32>
    %c0_155 = arith.constant 0 : index
    %c0_156 = arith.constant 0 : index
    %181 = vector.load %arg11[%c0_155, %c0_156] : memref<2x128xf32, #tpu.memory_space<vmem>>, vector<2x128xf32>
    tpu.vector_store %arg11[%c0_155, %c0_156], %180 {strides = array<i32>} : memref<2x128xf32, #tpu.memory_space<vmem>>, vector<2x128xf32>,
    return
  }
  func.func @transform_0(%arg0: i32) -> (i32, i32, i32) {
    %c0_i32 = arith.constant 0 : i32
    %c0_i32_0 = arith.constant 0 : i32
    %c0_i32_1 = arith.constant 0 : i32
    return %arg0, %c0_i32, %c0_i32_0 : i32, i32, i32
  }
  func.func @transform_1(%arg0: i32) -> (i32, i32, i32) {
    %c0_i32 = arith.constant 0 : i32
    %c0_i32_0 = arith.constant 0 : i32
    %c0_i32_1 = arith.constant 0 : i32
    %c0_i32_2 = arith.constant 0 : i32
    return %c0_i32, %c0_i32_0, %c0_i32_1 : i32, i32, i32
  }
  func.func @transform_2(%arg0: i32) -> (i32, i32) {
    %c0_i32 = arith.constant 0 : i32
    %c0_i32_0 = arith.constant 0 : i32
    %c0_i32_1 = arith.constant 0 : i32
    return %c0_i32, %c0_i32_0 : i32, i32
  }
  func.func @transform_3(%arg0: i32) -> (i32, i32, i32) {
    %c0_i32 = arith.constant 0 : i32
    %c0_i32_0 = arith.constant 0 : i32
    %c0_i32_1 = arith.constant 0 : i32
    %c0_i32_2 = arith.constant 0 : i32
    return %c0_i32, %c0_i32_0, %c0_i32_1 : i32, i32, i32
  }
  func.func @transform_4(%arg0: i32) -> (i32, i32) {
    %c0_i32 = arith.constant 0 : i32
    %c0_i32_0 = arith.constant 0 : i32
    %c0_i32_1 = arith.constant 0 : i32
    return %c0_i32, %c0_i32_0 : i32, i32
  }
  func.func @transform_5(%arg0: i32) -> (i32, i32, i32) {
    %c0_i32 = arith.constant 0 : i32
    %c0_i32_0 = arith.constant 0 : i32
    %c0_i32_1 = arith.constant 0 : i32
    %c0_i32_2 = arith.constant 0 : i32
    return %c0_i32, %c0_i32_0, %c0_i32_1 : i32, i32, i32
  }
  func.func @transform_6(%arg0: i32) -> (i32, i32, i32) {
    %c0_i32 = arith.constant 0 : i32
    %c0_i32_0 = arith.constant 0 : i32
    %c0_i32_1 = arith.constant 0 : i32
    %c0_i32_2 = arith.constant 0 : i32
    return %c0_i32, %c0_i32_0, %c0_i32_1 : i32, i32, i32
  }
  func.func @transform_7(%arg0: i32) -> (i32, i32) {
    %c0_i32 = arith.constant 0 : i32
    %c0_i32_0 = arith.constant 0 : i32
    %c0_i32_1 = arith.constant 0 : i32
    return %c0_i32, %c0_i32_0 : i32, i32
  }
  func.func @transform_8(%arg0: i32) -> (i32, i32) {
    %c0_i32 = arith.constant 0 : i32
    %c0_i32_0 = arith.constant 0 : i32
    %c0_i32_1 = arith.constant 0 : i32
    return %c0_i32, %c0_i32_0 : i32, i32
  }
  func.func @transform_9(%arg0: i32) -> (i32, i32) {
    %c0_i32 = arith.constant 0 : i32
    %c0_i32_0 = arith.constant 0 : i32
    %c0_i32_1 = arith.constant 0 : i32
    return %c0_i32, %c0_i32_0 : i32, i32
  }
  func.func @transform_10(%arg0: i32) -> (i32, i32) {
    %c0_i32 = arith.constant 0 : i32
    %c0_i32_0 = arith.constant 0 : i32
    return %arg0, %c0_i32 : i32, i32
  }
}

</mosaic_0001>

<bundles_post_ra>
// kernel: lenet_forward.1
= control target key start
LH: loop header
LB: loop body
LE: loop exit
PB: predicated region body
PF: predicated region fallthrough
CT: control target
= control target key end

     0   :  { %15 = vsyncpa [#allocation4], 0  ;;  %s9105_s0 = inlined_call_operand.vmem [shape: f32[2,28,28], index: 0, kind: input, shape index: {}]   ;;  %s9106_s1 = inlined_call_operand.hbm [shape: f32[5,28,512], index: 1, kind: input, shape index: {}]   ;;  %s9107_s2 = inlined_call_operand.hbm [shape: f32[1,512], index: 2, kind: input, shape index: {}]   ;;  %s9108_s3 = inlined_call_operand.hbm [shape: f32[5,256,512], index: 3, kind: input, shape index: {}]   ;;  %s9109_s4 = inlined_call_operand.hbm [shape: f32[1,512], index: 4, kind: input, shape index: {}]   ;;  %s9110_s5 = inlined_call_operand.hbm [shape: f32[8,2,16], index: 5, kind: input, shape index: {}]   ;;  %s9111_s6 = inlined_call_operand.hbm [shape: bf16[4,256,512], index: 6, kind: input, shape index: {}]   ;;  %s9112_s7 = inlined_call_operand.hbm [shape: f32[1,512], index: 7, kind: input, shape index: {}]   ;;  %s9113_s8 = inlined_call_operand.hbm [shape: bf16[512,128], index: 8, kind: input, shape index: {}]   ;;  %s9114_s9 = inlined_call_operand.hbm [shape: f32[1,128], index: 9, kind: input, shape index: {}]   ;;  %s9115_s10 = inlined_call_operand.hbm [shape: f32[2,128], index: 10, kind: output, shape index: {}]  }
   0x1   :  { %16 = vsyncpa [#allocation7], 0 }
   0x2   :  { %17 = vsyncpa [#allocation10], 0 }
   0x3   :  { %18 = vsyncpa [#allocation13], 0 }
   0x4   :  { %19 = vsyncpa [#allocation16], 0 }
   0x5   :  { %20 = vsyncpa [#allocation5], 0  ;;  %s8432_s13 = smov [#allocation6]   ;;  %s8433_s15 = smov [#allocation9]  }
   0x6   :  { %s41_s14 = sshll.u32 %s8432_s13, 4  ;;  %s63_s16 = sshll.u32 %s8433_s15, 4  ;;  %s42_s14 = int_to_ptr.vmem [resolvable:$true] %s41_s14  ;;  %s64_s16 = int_to_ptr.vmem [resolvable:$true] %s63_s16 }
   0x7   :  { %s8200_s19 = scalar_lea.hbm %s9107_s2, 64 }
   0x8   :  { %p8201_p0 = scmp.ne.s32.totalorder %s9107_s2, %s8200_s19  ;;  %p8204_p1 = scmp.lt.u32.totalorder %s8200_s19, %s9107_s2 }
   0xa   :  { %p8206_p2 = pnand %p8204_p1, %p8201_p0 }
   0xc   :  { %8209 = shalt.err (!%p8206_p2)
}
   0xd   :  { %s8210_s24 = scalar_lea.vmem %s42_s14, 64  ;;  %p8215_p4 = scmp.lt.s32.totalorder %s42_s14, %s42_s14 }
   0xe   :  { %p8211_p3 = scmp.ne.s32.totalorder %s42_s14, %s8210_s24  ;;  %p8216_p5 = scmp.lt.s32.totalorder %s8210_s24, %s8210_s24 }
  0x10   :  { %p8217_p6 = por %p8216_p5, %p8215_p4 }
  0x12   :  { %p8218_p7 = pnand %p8217_p6, %p8211_p3 }
  0x14   :  { %8221 = shalt.err (!%p8218_p7)
}
  0x15   :  { %44 = dma.hbm_to_vmem [thread:$0]  %s9107_s2, 64, %s42_s14, [#allocation7]  }
  0x16   :  { %s8222_s29 = scalar_lea.hbm %s9109_s4, 64 }
  0x17   :  { %p8223_p8 = scmp.ne.s32.totalorder %s9109_s4, %s8222_s29  ;;  %p8226_p9 = scmp.lt.u32.totalorder %s8222_s29, %s9109_s4 }
  0x19   :  { %p8228_p10 = pnand %p8226_p9, %p8223_p8 }
  0x1b   :  { %8231 = shalt.err (!%p8228_p10)
}
  0x1c   :  { %s8232_s15 = scalar_lea.vmem %s64_s16, 64  ;;  %p8237_p12 = scmp.lt.s32.totalorder %s64_s16, %s64_s16 }
  0x1d   :  { %p8233_p11 = scmp.ne.s32.totalorder %s64_s16, %s8232_s15  ;;  %p8238_p13 = scmp.lt.s32.totalorder %s8232_s15, %s8232_s15 }
  0x1f   :  { %p8239_p0 = por %p8238_p13, %p8237_p12 }
  0x21   :  { %p8240_p1 = pnand %p8239_p0, %p8233_p11 }
  0x23   :  { %8243 = shalt.err (!%p8240_p1)
}
  0x24   :  { %66 = dma.hbm_to_vmem [thread:$0]  %s9109_s4, 64, %s64_s16, [#allocation10]  }
  0x25   :  { %s8434_s17 = smov [#allocation12]   ;;  %s8244_s21 = scalar_lea.hbm %s9111_s6, 32768 }
  0x26   :  { %s84_s18 = sshll.u32 %s8434_s17, 4  ;;  %p8245_p2 = scmp.ne.s32.totalorder %s9111_s6, %s8244_s21  ;;  %s85_s18 = int_to_ptr.vmem [resolvable:$true] %s84_s18 }
  0x27   :  { %p8248_p3 = scmp.lt.u32.totalorder %s8244_s21, %s9111_s6 }
  0x29   :  { %p8250_p4 = pnand %p8248_p3, %p8245_p2 }
  0x2b   :  { %8253 = shalt.err (!%p8250_p4)
}
  0x2c   :  { %s8254_s26 = scalar_lea.vmem %s85_s18, 32768  ;;  %p8259_p6 = scmp.lt.s32.totalorder %s85_s18, %s85_s18 }
  0x2d   :  { %p8255_p5 = scmp.ne.s32.totalorder %s85_s18, %s8254_s26  ;;  %p8260_p7 = scmp.lt.s32.totalorder %s8254_s26, %s8254_s26 }
  0x2f   :  { %p8261_p8 = por %p8260_p7, %p8259_p6 }
  0x31   :  { %p8262_p9 = pnand %p8261_p8, %p8255_p5 }
  0x33   :  { %8265 = shalt.err (!%p8262_p9)
}
  0x34   :  { %s8435_s4 = smov 256   ;;  %s8436_s16 = smov 16  }
  0x35   :  { %90 = dma.hbm_to_vmem [thread:$0]  %s9111_s6, 32768, %s85_s18, [#allocation13], %s8435_s4, %s8435_s4, %s8436_s16  }
  0x36   :  { %s8437_s29 = smov [#allocation15]   ;;  %s8266_s13 = scalar_lea.hbm %s9113_s8, 4096 }
  0x37   :  { %s106_s30 = sshll.u32 %s8437_s29, 4  ;;  %p8267_p10 = scmp.ne.s32.totalorder %s9113_s8, %s8266_s13  ;;  %s107_s30 = int_to_ptr.vmem [resolvable:$true] %s106_s30 }
  0x38   :  { %p8270_p11 = scmp.lt.u32.totalorder %s8266_s13, %s9113_s8 }
  0x3a   :  { %p8272_p12 = pnand %p8270_p11, %p8267_p10 }
  0x3c   :  { %8275 = shalt.err (!%p8272_p12)
}
  0x3d   :  { %s8276_s19 = scalar_lea.vmem %s107_s30, 4096  ;;  %p8281_p0 = scmp.lt.s32.totalorder %s107_s30, %s107_s30 }
  0x3e   :  { %p8277_p13 = scmp.ne.s32.totalorder %s107_s30, %s8276_s19  ;;  %p8282_p1 = scmp.lt.s32.totalorder %s8276_s19, %s8276_s19 }
  0x40   :  { %p8283_p2 = por %p8282_p1, %p8281_p0 }
  0x42   :  { %p8284_p3 = pnand %p8283_p2, %p8277_p13 }
  0x44   :  { %8287 = shalt.err (!%p8284_p3)
}
  0x45   :  { %s8438_s6 = smov 64   ;;  %s8439_s18 = smov 4  }
  0x46   :  { %112 = dma.hbm_to_vmem [thread:$0]  %s9113_s8, 4096, %s107_s30, [#allocation16], %s8438_s6, %s8438_s6, %s8439_s18  }
  0x47   :  { %s8440_s22 = smov [#allocation3]   ;;  %s8288_s26 = scalar_lea.hbm %s9106_s1, 10240 }
  0x48   :  { %s28_s23 = sshll.u32 %s8440_s22, 4  ;;  %p8289_p4 = scmp.ne.s32.totalorder %s9106_s1, %s8288_s26  ;;  %s29_s23 = int_to_ptr.vmem [resolvable:$true] %s28_s23 }
  0x49   :  { %p8292_p5 = scmp.lt.u32.totalorder %s8288_s26, %s9106_s1 }
  0x4b   :  { %p8294_p6 = pnand %p8292_p5, %p8289_p4 }
  0x4d   :  { %8297 = shalt.err (!%p8294_p6)
}
  0x4e   :  { %s8298_s29 = scalar_lea.vmem %s29_s23, 10240  ;;  %p8303_p8 = scmp.lt.s32.totalorder %s29_s23, %s29_s23 }
  0x4f   :  { %p8299_p7 = scmp.ne.s32.totalorder %s29_s23, %s8298_s29  ;;  %p8304_p9 = scmp.lt.s32.totalorder %s8298_s29, %s8298_s29 }
  0x51   :  { %p8305_p10 = por %p8304_p9, %p8303_p8 }
  0x53   :  { %p8306_p11 = pnand %p8305_p10, %p8299_p7 }
  0x55   :  { %8309 = shalt.err (!%p8306_p11)
}
  0x56   :  { %s8441_s8 = smov 512   ;;  %s8442_s30 = smov 32  }
  0x57   :  { %34 = dma.hbm_to_vmem [thread:$0]  %s9106_s1, 10240, %s29_s23, [#allocation4], %s8441_s8, %s8441_s8, %s8442_s30  }
  0x58   :  { %s8443_s13 = smov [#allocation8]   ;;  %s8444_s2 = smov [#allocation11]  }
  0x59   :  { %s50_s15 = sshll.u32 %s8443_s13, 4  ;;  %s72_s14 = sshll.u32 %s8444_s2, 4  ;;  %s51_s15 = int_to_ptr.vmem [resolvable:$true] %s50_s15  ;;  %s73_s14 = int_to_ptr.vmem [resolvable:$true] %s72_s14 }
  0x5a   :  { %s8310_s6 = scalar_lea.hbm %s9108_s3, 81920 }
  0x5b   :  { %p8311_p12 = scmp.ne.s32.totalorder %s9108_s3, %s8310_s6  ;;  %p8314_p13 = scmp.lt.u32.totalorder %s8310_s6, %s9108_s3 }
  0x5d   :  { %p8316_p0 = pnand %p8314_p13, %p8311_p12 }
  0x5f   :  { %8319 = shalt.err (!%p8316_p0)
}
  0x60   :  { %s8320_s1 = scalar_lea.vmem %s51_s15, 81920  ;;  %p8325_p2 = scmp.lt.s32.totalorder %s51_s15, %s51_s15 }
  0x61   :  { %p8321_p1 = scmp.ne.s32.totalorder %s51_s15, %s8320_s1  ;;  %p8326_p3 = scmp.lt.s32.totalorder %s8320_s1, %s8320_s1 }
  0x63   :  { %p8327_p4 = por %p8326_p3, %p8325_p2 }
  0x65   :  { %p8328_p5 = pnand %p8327_p4, %p8321_p1 }
  0x67   :  { %8331 = shalt.err (!%p8328_p5)
}
  0x68   :  { %56 = dma.hbm_to_vmem [thread:$0]  %s9108_s3, 81920, %s51_s15, [#allocation7], %s8441_s8, %s8441_s8, %s8442_s30  }
  0x69   :  { %s8332_s4 = scalar_lea.hbm %s9110_s5, 256 }
  0x6a   :  { %p8333_p6 = scmp.ne.s32.totalorder %s9110_s5, %s8332_s4  ;;  %p8336_p7 = scmp.lt.u32.totalorder %s8332_s4, %s9110_s5 }
  0x6c   :  { %p8338_p8 = pnand %p8336_p7, %p8333_p6 }
  0x6e   :  { %8341 = shalt.err (!%p8338_p8)
}
  0x6f   :  { %s8342_s11 = scalar_lea.vmem %s73_s14, 256  ;;  %p8347_p10 = scmp.lt.s32.totalorder %s73_s14, %s73_s14 }
  0x70   :  { %p8343_p9 = scmp.ne.s32.totalorder %s73_s14, %s8342_s11  ;;  %p8348_p11 = scmp.lt.s32.totalorder %s8342_s11, %s8342_s11 }
  0x72   :  { %p8349_p12 = por %p8348_p11, %p8347_p10 }
  0x74   :  { %p8350_p13 = pnand %p8349_p12, %p8343_p9 }
  0x76   :  { %8353 = shalt.err (!%p8350_p13)
}
  0x77   :  { %s8445_s3 = smov 2   ;;  %s8446_s13 = smov [#allocation14]  }
  0x78   :  { %78 = dma.hbm_to_vmem [thread:$0]  %s9110_s5, 256, %s73_s14, [#allocation10], %s8442_s30, %s8442_s30, %s8445_s3  }
  0x79   :  { %s97_s15 = sshll.u32 %s8446_s13, 4  ;;  %s8447_s2 = smov [#allocation17]   ;;  %s98_s15 = int_to_ptr.vmem [resolvable:$true] %s97_s15 }
  0x7a   :  { %s119_s17 = sshll.u32 %s8447_s2, 4  ;;  %s8354_s18 = scalar_lea.hbm %s9112_s7, 64  ;;  %s120_s17 = int_to_ptr.vmem [resolvable:$true] %s119_s17 }
  0x7b   :  { %p8355_p0 = scmp.ne.s32.totalorder %s9112_s7, %s8354_s18  ;;  %p8358_p1 = scmp.lt.u32.totalorder %s8354_s18, %s9112_s7 }
  0x7d   :  { %p8360_p2 = pnand %p8358_p1, %p8355_p0 }
  0x7f   :  { %8363 = shalt.err (!%p8360_p2)
}
  0x80   :  { %s8364_s5 = scalar_lea.vmem %s98_s15, 64  ;;  %p8369_p4 = scmp.lt.s32.totalorder %s98_s15, %s98_s15 }
  0x81   :  { %p8365_p3 = scmp.ne.s32.totalorder %s98_s15, %s8364_s5  ;;  %p8370_p5 = scmp.lt.s32.totalorder %s8364_s5, %s8364_s5 }
  0x83   :  { %p8371_p6 = por %p8370_p5, %p8369_p4 }
  0x85   :  { %p8372_p7 = pnand %p8371_p6, %p8365_p3 }
  0x87   :  { %8375 = shalt.err (!%p8372_p7)
}
  0x88   :  { %100 = dma.hbm_to_vmem [thread:$0]  %s9112_s7, 64, %s98_s15, [#allocation13]  }
  0x89   :  { %s8376_s25 = scalar_lea.hbm %s9114_s9, 16 }
  0x8a   :  { %p8377_p8 = scmp.ne.s32.totalorder %s9114_s9, %s8376_s25  ;;  %p8380_p9 = scmp.lt.u32.totalorder %s8376_s25, %s9114_s9 }
  0x8c   :  { %p8382_p10 = pnand %p8380_p9, %p8377_p8 }
  0x8e   :  { %8385 = shalt.err (!%p8382_p10)
}
  0x8f   :  { %s8386_s28 = scalar_lea.vmem %s120_s17, 16  ;;  %s8390_s29 = scalar_lea.vmem %s120_s17, 32 }
  0x90   :  { %p8387_p11 = scmp.ne.s32.totalorder %s120_s17, %s8386_s28  ;;  %p8391_p12 = scmp.lt.s32.totalorder %s120_s17, %s120_s17 }
  0x91   :  { %p8392_p13 = scmp.lt.s32.totalorder %s8390_s29, %s8386_s28 }
  0x93   :  { %p8393_p0 = por %p8392_p13, %p8391_p12 }
  0x95   :  { %p8394_p1 = pnand %p8393_p0, %p8387_p11 }
  0x97   :  { %8397 = shalt.err (!%p8394_p1)
}
  0x98   :  { %122 = dma.hbm_to_vmem [thread:$0]  %s9114_s9, 16, %s120_s17, [#allocation16]  }
  0x99   :  { %8420 = dma.done.wait [#allocation4], 10240  }
  0x9a   :  { %8421 = vsyncadd [#allocation4], 4294957056 }
  0x9b   :  { %8422 = dma.done.wait [#allocation7], 81984  }
  0x9c   :  { %8423 = vsyncadd [#allocation7], 4294885312 }
  0x9d   :  { %8424 = dma.done.wait [#allocation10], 320  }
  0x9e   :  { %8425 = vsyncadd [#allocation10], 4294966976 }
  0x9f   :  { %8426 = dma.done.wait [#allocation13], 32832  }
  0xa0   :  { %8427 = vsyncadd [#allocation13], 4294934464 }
  0xa1   :  { %8428 = dma.done.wait [#allocation16], 4112  }
  0xa2   :  { %8429 = vsyncadd [#allocation16], 4294963184  ;;  %v8448_v0 = vmov 0.0   ;;  %vm215_vm0 = vcmask 1043456   ;;  %vm8449_vm1 = vmmov 1   ;;  %v181_v2 = vld [vmem:[#allocation3 + $0x88] sm:$0xff] }
  0xa3   :  { %292 = vmatprep.mubr.f32.mxu0 %v8448_v0  ;;  %393 = vmatprep.mubr.f32.mxu1 %v8448_v0  ;;  %vm8622_vm2 = vmpackc.low %vm215_vm0, %vm8449_vm1  ;;  %v185_v3 = vld [vmem:[#allocation3 + $0xa8] sm:$0xff]  ;;  %v183_v4 = vld [vmem:[#allocation3 + $0x98] sm:$0xff]  ;;  %vm196_vm3 = vcmask 228352   ;;  %vm2080_vm5 = vcmask 1046528   ;;  %vm2550_vm6 = vcmask 1045504   ;;  %vm2874_vm7 = vcmask 1044480  }
  0xa4   :  { %v6864_v5 = vpack.c.bf16 %v185_v3, %v181_v2  ;;  %v187_v6 = vld [vmem:[#allocation3 + $0xb8] sm:$0xff]  ;;  %v180_v7 = vld [vmem:[#allocation3 + $0x80] sm:$0xff]  ;;  %v182_v11 = vld [vmem:[#allocation3 + $0x90] sm:$0xff]  ;;  %vm3548_vm8 = vcmask 130048  }
  0xa5   :  { %v184_v8 = vld [vmem:[#allocation3 + $0xa0] sm:$0xff]  ;;  %v6874_v9 = vpack.c.bf16 %v187_v6, %v183_v4  ;;  %v186_v12 = vld [vmem:[#allocation3 + $0xb0] sm:$0xff]  ;;  %v189_v13 = vld [vmem:[#allocation3 + $0xc8] sm:$0xff] }
  0xa6   :  { %v6866_v10 = vpack.c.bf16 %v184_v8, %v180_v7  ;;  %6865 = vmatprep.subr.bf16.mxu0 %v6864_v5  ;;  %v6876_v14 = vpack.c.bf16 %v186_v12, %v182_v11  ;;  %v193_v15 = vld [vmem:[#allocation3 + $0xe8] sm:$0xf]  ;;  %v191_v16 = vld [vmem:[#allocation3 + $0xd8] sm:$0xff]  ;;  %v188_v20 = vld [vmem:[#allocation3 + $0xc0] sm:$0xff] }
  0xa7   :  { %v195_v17 = vld [vmem:[#allocation3 + $0xf8] sm:$0xf]  ;;  %6875 = vmatprep.subr.bf16.mxu1 %v6874_v9  ;;  %v6868_v18 = vpack.c.bf16 %v193_v15, %v189_v13  ;;  %v192_v21 = vld [vmem:[#allocation3 + $0xe0] sm:$0xf]  ;;  %v190_v22 = vld [vmem:[#allocation3 + $0xd0] sm:$0xff] }
  0xa8   :  { %6867 = vmatpush1.bf16.msra.mxu0 %v6866_v10  ;;  %v6878_v19 = vpack.c.bf16 %v195_v17, %v191_v16  ;;  %6877 = vmatpush1.bf16.msra.mxu1 %v6876_v14  ;;  %v6871_v23 = vpack.c.bf16 %v192_v21, %v188_v20  ;;  %v194_v24 = vld [vmem:[#allocation3 + $0xf0] sm:$0xf]  ;;  %v158_v26 = vld [vmem:[#allocation3 + $0x8] sm:$0xff]  ;;  %v160_v28 = vld [vmem:[#allocation3 + $0x18] sm:$0xff] }
  0xa9   :  { %6870 = vmatprep.subr.msk.bf16.mxu0 %vm8622_vm2, %v6868_v18  ;;  %v6881_v25 = vpack.c.bf16 %v194_v24, %v190_v22  ;;  %v162_v27 = vld [vmem:[#allocation3 + $0x28] sm:$0xff]  ;;  %v164_v30 = vld [vmem:[#allocation3 + $0x38] sm:$0xff]  ;;  %v157_v31 = vld [vmem:[#allocation3] sm:$0xff] }
  0xaa   :  { %6880 = vmatprep.subr.msk.bf16.mxu1 %vm8622_vm2, %v6878_v19  ;;  %v6884_v29 = vpack.c.bf16 %v162_v27, %v158_v26  ;;  %v161_v32 = vld [vmem:[#allocation3 + $0x20] sm:$0xff]  ;;  %v6894_v34 = vpack.c.bf16 %v164_v30, %v160_v28  ;;  %v159_v35 = vld [vmem:[#allocation3 + $0x10] sm:$0xff]  ;;  %v166_v38 = vld [vmem:[#allocation3 + $0x48] sm:$0xff] }
  0xab   :  { %v173_v33 = vld [vmem:[%s9105_s0 + $0x1] sm:$0xff]  ;;  %v163_v36 = vld [vmem:[#allocation3 + $0x30] sm:$0xff]  ;;  %v6886_v37 = vpack.c.bf16 %v161_v32, %v157_v31  ;;  %v168_v41 = vld [vmem:[#allocation3 + $0x58] sm:$0xff] }
  0xac   :  { %6873 = vmatpush1.bf16.msk.msra.mxu0 %vm8622_vm2, %v6871_v23  ;;  %6883 = vmatpush1.bf16.msk.msra.mxu1 %vm8622_vm2, %v6881_v25  ;;  %v6896_v39 = vpack.c.bf16 %v163_v36, %v159_v35  ;;  %v170_v40 = vld [vmem:[#allocation3 + $0x68] sm:$0xf]  ;;  %v172_v42 = vld [vmem:[#allocation3 + $0x78] sm:$0xf]  ;;  %v165_v45 = vld [vmem:[#allocation3 + $0x40] sm:$0xff] }
  0xad   :  { %6885 = vmatprep.subr.bf16.mxu0 %v6884_v29  ;;  %6895 = vmatprep.subr.bf16.mxu1 %v6894_v34  ;;  %v6888_v43 = vpack.c.bf16 %v170_v40, %v166_v38  ;;  %v6898_v44 = vpack.c.bf16 %v172_v42, %v168_v41  ;;  %v169_v46 = vld [vmem:[#allocation3 + $0x60] sm:$0xf]  ;;  %v167_v47 = vld [vmem:[#allocation3 + $0x50] sm:$0xff]  ;;  %v670_v51 = vld [vmem:[#allocation3 + $0x108] sm:$0xff] }
  0xae   :  { %v174_v48 = vld [vmem:[%s9105_s0 + $0x9] sm:$0xff]  ;;  %v6891_v50 = vpack.c.bf16 %v169_v46, %v165_v45  ;;  %v672_v55 = vld [vmem:[#allocation3 + $0x118] sm:$0xff]  ;;  %v176_v59 = vld [vmem:[%s9105_s0 + $0x21] sm:$0xff] }
  0xaf   :  { %6445 = vmatmul.mubr.msk.f32.vlgmr.msra.gmra.mrb[0].mxu0 %vm196_vm3, %v173_v33  ;;  %6453 = vmatmul.mubr.msk.f32.vlgmr.msra.gmra.mrb[0].mxu1 %vm196_vm3, %v173_v33  ;;  %v171_v49 = vld [vmem:[#allocation3 + $0x70] sm:$0xf]  ;;  %v674_v52 = vld [vmem:[#allocation3 + $0x128] sm:$0xff]  ;;  %v676_v56 = vld [vmem:[#allocation3 + $0x138] sm:$0xff] }
  0xb0   :  { %298 = vmatprep.mubr.f32.mxu0 %v8448_v0  ;;  %399 = vmatprep.mubr.f32.mxu1 %v8448_v0  ;;  %v6901_v53 = vpack.c.bf16 %v171_v49, %v167_v47  ;;  %v6904_v54 = vpack.c.bf16 %v674_v52, %v670_v51  ;;  %v6914_v57 = vpack.c.bf16 %v676_v56, %v672_v55  ;;  %v175_v58 = vld [vmem:[%s9105_s0 + $0x11] sm:$0xff]  ;;  %v177_v60 = vld [vmem:[%s9105_s0 + $0x29] sm:$0xff]  ;;  %v669_v62 = vld [vmem:[#allocation3 + $0x100] sm:$0xff] }
  0xb1   :  { %6887 = vmatpush1.bf16.msra.mxu0 %v6886_v37  ;;  %6897 = vmatpush1.bf16.msra.mxu1 %v6896_v39  ;;  %v178_v61 = vld [vmem:[%s9105_s0 + $0x31] sm:$0xff]  ;;  %v673_v63 = vld [vmem:[#allocation3 + $0x120] sm:$0xff]  ;;  %v678_v4 = vld [vmem:[#allocation3 + $0x148] sm:$0xff] }
  0xb2   :  { %6890 = vmatprep.subr.msk.bf16.mxu0 %vm8622_vm2, %v6888_v43  ;;  %6900 = vmatprep.subr.msk.bf16.mxu1 %vm8622_vm2, %v6898_v44  ;;  %v671_v2 = vld [vmem:[#allocation3 + $0x110] sm:$0xff]  ;;  %v682_v5 = vld [vmem:[#allocation3 + $0x168] sm:$0xf]  ;;  %v151_v6 = vld [vmem:[%s9105_s0] sm:$0xff]  ;;  %v6906_v9 = vpack.c.bf16 %v673_v63, %v669_v62 }
  0xb3   :  { %6446 = vmatmul.mubr.msk.f32.gmra.mrb[2].mxu0 %vm196_vm3, %v174_v48  ;;  %6454 = vmatmul.mubr.msk.f32.gmra.mrb[2].mxu1 %vm196_vm3, %v174_v48  ;;  %v675_v3 = vld [vmem:[#allocation3 + $0x130] sm:$0xff]  ;;  %v680_v7 = vld [vmem:[#allocation3 + $0x158] sm:$0xff]  ;;  %v6908_v11 = vpack.c.bf16 %v682_v5, %v678_v4  ;;  %v677_v12 = vld [vmem:[#allocation3 + $0x140] sm:$0xff] }
  0xb4   :  { %304 = vmatprep.mubr.f32.mxu0 %v8448_v0  ;;  %405 = vmatprep.mubr.f32.mxu1 %v8448_v0  ;;  %v684_v8 = vld [vmem:[#allocation3 + $0x178] sm:$0xf]  ;;  %v6916_v10 = vpack.c.bf16 %v675_v3, %v671_v2  ;;  %v681_v13 = vld [vmem:[#allocation3 + $0x160] sm:$0xf]  ;;  %v679_v14 = vld [vmem:[#allocation3 + $0x150] sm:$0xff] }
  0xb5   :  { %6893 = vmatpush1.bf16.msk.msra.mxu0 %vm8622_vm2, %v6891_v50  ;;  %6903 = vmatpush1.bf16.msk.msra.mxu1 %vm8622_vm2, %v6901_v53  ;;  %v6918_v15 = vpack.c.bf16 %v684_v8, %v680_v7  ;;  %v683_v16 = vld [vmem:[#allocation3 + $0x170] sm:$0xf]  ;;  %v949_v17 = vld [vmem:[#allocation3 + $0x188] sm:$0xff]  ;;  %v951_v20 = vld [vmem:[#allocation3 + $0x198] sm:$0xff]  ;;  %v6911_v22 = vpack.c.bf16 %v681_v13, %v677_v12 }
  0xb6   :  { %6905 = vmatprep.subr.bf16.mxu0 %v6904_v54  ;;  %6915 = vmatprep.subr.bf16.mxu1 %v6914_v57  ;;  %v953_v18 = vld [vmem:[#allocation3 + $0x1a8] sm:$0xff]  ;;  %v955_v21 = vld [vmem:[#allocation3 + $0x1b8] sm:$0xff]  ;;  %v6921_v23 = vpack.c.bf16 %v683_v16, %v679_v14  ;;  %v153_v26 = vld [vmem:[%s9105_s0 + $0x10] sm:$0xff] }
  0xb7   :  { %6447 = vmatmul.mubr.msk.f32.gmra.mrb[4].mxu0 %vm196_vm3, %v175_v58  ;;  %6455 = vmatmul.mubr.msk.f32.gmra.mrb[4].mxu1 %vm196_vm3, %v175_v58  ;;  %v152_v19 = vld [vmem:[%s9105_s0 + $0x8] sm:$0xff]  ;;  %v6924_v24 = vpack.c.bf16 %v953_v18, %v949_v17  ;;  %v6934_v25 = vpack.c.bf16 %v955_v21, %v951_v20  ;;  %v154_v27 = vld [vmem:[%s9105_s0 + $0x20] sm:$0xff]  ;;  %v156_v29 = vld [vmem:[%s9105_s0 + $0x30] sm:$0xff] }
  0xb8   :  { %310 = vmatprep.mubr.f32.mxu0 %v8448_v0  ;;  %411 = vmatprep.mubr.f32.mxu1 %v8448_v0  ;;  %v155_v28 = vld [vmem:[%s9105_s0 + $0x28] sm:$0xff]  ;;  %v948_v30 = vld [vmem:[#allocation3 + $0x180] sm:$0xff]  ;;  %v950_v32 = vld [vmem:[#allocation3 + $0x190] sm:$0xff] }
  0xb9   :  { %v952_v31 = vld [vmem:[#allocation3 + $0x1a0] sm:$0xff]  ;;  %v954_v33 = vld [vmem:[#allocation3 + $0x1b0] sm:$0xff]  ;;  %v957_v35 = vld [vmem:[#allocation3 + $0x1c8] sm:$0xff] }
  0xba   :  { %v662_v34 = vld [vmem:[%s9105_s0 + $0x2] sm:$0xff]  ;;  %v959_v37 = vld [vmem:[#allocation3 + $0x1d8] sm:$0xff]  ;;  %v6926_v41 = vpack.c.bf16 %v952_v31, %v948_v30  ;;  %v958_v42 = vld [vmem:[#allocation3 + $0x1d0] sm:$0xff]  ;;  %v6936_v47 = vpack.c.bf16 %v954_v33, %v950_v32 }
  0xbb   :  { %6448 = vmatmul.mubr.msk.f32.gmra.mrb[6].mxu0 %vm196_vm3, %v176_v59  ;;  %6456 = vmatmul.mubr.msk.f32.gmra.mrb[6].mxu1 %vm196_vm3, %v176_v59  ;;  %v961_v36 = vld [vmem:[#allocation3 + $0x1e8] sm:$0xf]  ;;  %v963_v38 = vld [vmem:[#allocation3 + $0x1f8] sm:$0xf]  ;;  %v956_v39 = vld [vmem:[#allocation3 + $0x1c0] sm:$0xff] }
  0xbc   :  { %316 = vmatprep.mubr.f32.mxu0 %v8448_v0  ;;  %417 = vmatprep.mubr.f32.mxu1 %v8448_v0  ;;  %v960_v40 = vld [vmem:[#allocation3 + $0x1e0] sm:$0xf]  ;;  %v962_v43 = vld [vmem:[#allocation3 + $0x1f0] sm:$0xf]  ;;  %v1228_v44 = vld [vmem:[#allocation3 + $0x208] sm:$0xff]  ;;  %v6928_v48 = vpack.c.bf16 %v961_v36, %v957_v35  ;;  %v6938_v51 = vpack.c.bf16 %v963_v38, %v959_v37 }
  0xbd   :  { %v1232_v45 = vld [vmem:[#allocation3 + $0x228] sm:$0xff]  ;;  %v1230_v49 = vld [vmem:[#allocation3 + $0x218] sm:$0xff]  ;;  %v6931_v52 = vpack.c.bf16 %v960_v40, %v956_v39  ;;  %v6941_v54 = vpack.c.bf16 %v962_v43, %v958_v42  ;;  %v1229_v62 = vld [vmem:[#allocation3 + $0x210] sm:$0xff] }
  0xbe   :  { %v663_v46 = vld [vmem:[%s9105_s0 + $0xa] sm:$0xff]  ;;  %v1234_v50 = vld [vmem:[#allocation3 + $0x238] sm:$0xff]  ;;  %v6944_v55 = vpack.c.bf16 %v1232_v45, %v1228_v44  ;;  %v665_v57 = vld [vmem:[%s9105_s0 + $0x22] sm:$0xff] }
  0xbf   :  { %6449 = vmatmul.mubr.msk.f32.gmra.mrb[8].mxu0 %vm196_vm3, %v177_v60  ;;  %6457 = vmatmul.mubr.msk.f32.gmra.mrb[8].mxu1 %vm196_vm3, %v177_v60  ;;  %v664_v53 = vld [vmem:[%s9105_s0 + $0x12] sm:$0xff]  ;;  %v6954_v56 = vpack.c.bf16 %v1234_v50, %v1230_v49  ;;  %v666_v58 = vld [vmem:[%s9105_s0 + $0x2a] sm:$0xff]  ;;  %v1227_v60 = vld [vmem:[#allocation3 + $0x200] sm:$0xff] }
  0xc0   :  { %322 = vmatprep.mubr.f32.mxu0 %v8448_v0  ;;  %423 = vmatprep.mubr.f32.mxu1 %v8448_v0  ;;  %v667_v59 = vld [vmem:[%s9105_s0 + $0x32] sm:$0xff]  ;;  %v1236_v2 = vld [vmem:[#allocation3 + $0x248] sm:$0xff]  ;;  %v1235_v7 = vld [vmem:[#allocation3 + $0x240] sm:$0xff] }
  0xc1   :  { %v1233_v63 = vld [vmem:[#allocation3 + $0x230] sm:$0xff]  ;;  %v1240_v3 = vld [vmem:[#allocation3 + $0x268] sm:$0xf]  ;;  %v1238_v5 = vld [vmem:[#allocation3 + $0x258] sm:$0xff] }
  0xc2   :  { %v941_v4 = vld [vmem:[%s9105_s0 + $0x3] sm:$0xff]  ;;  %v2099_v12 = vld [vmem:[#allocation8 + $0x408] sm:$0xff]  ;;  %v6948_v16 = vpack.c.bf16 %v1240_v3, %v1236_v2  ;;  %v2104_v30 = vld [vmem:[#allocation8 + $0x430] sm:$0xff] }
  0xc3   :  { %6450 = vmatmul.mubr.msk.f32.gmra.mrb[10].mxu0 %vm196_vm3, %v178_v61  ;;  %6458 = vmatmul.mubr.msk.f32.gmra.mrb[10].mxu1 %vm196_vm3, %v178_v61  ;;  %v1231_v61 = vld [vmem:[#allocation3 + $0x220] sm:$0xff]  ;;  %v2103_v13 = vld [vmem:[#allocation8 + $0x428] sm:$0xff]  ;;  %v2108_v39 = vld [vmem:[#allocation8 + $0x450] sm:$0xff] }
  0xc4   :  { %524 = vmatprep.mubr.f32.mxu0 %v8448_v0  ;;  %625 = vmatprep.mubr.f32.mxu1 %v8448_v0  ;;  %v1239_v8 = vld [vmem:[#allocation3 + $0x260] sm:$0xf]  ;;  %v942_v14 = vld [vmem:[%s9105_s0 + $0xb] sm:$0xff]  ;;  %v943_v21 = vld [vmem:[%s9105_s0 + $0x13] sm:$0xff] }
  0xc5   :  { %v2101_v17 = vld [vmem:[#allocation8 + $0x418] sm:$0xff]  ;;  %v6951_v20 = vpack.c.bf16 %v1239_v8, %v1235_v7  ;;  %v946_v1 = vld [vmem:[%s9105_s0 + $0x33] sm:$0xff]  ;;  %v1220_v33 = vld [vmem:[%s9105_s0 + $0x4] sm:$0xff] }
  0xc6   :  { %v2105_v18 = vld [vmem:[#allocation8 + $0x438] sm:$0xff]  ;;  %v2107_v31 = vld [vmem:[#allocation8 + $0x448] sm:$0xff]  ;;  %v2106_v36 = vld [vmem:[#allocation8 + $0x440] sm:$0xff] }
  0xc7   :  { %6461 = vmatmul.mubr.msk.f32.vlgmr.msra.gmra.mrb[0].mxu0 %vm196_vm3, %v151_v6  ;;  %6469 = vmatmul.mubr.msk.f32.vlgmr.msra.gmra.mrb[0].mxu1 %vm196_vm3, %v151_v6  ;;  %v1242_v6 = vld [vmem:[#allocation3 + $0x278] sm:$0xf]  ;;  %v2111_v32 = vld [vmem:[#allocation8 + $0x468] sm:$0xff]  ;;  %v2113_v35 = vld [vmem:[#allocation8 + $0x478] sm:$0xff] }
  0xc8   :  { %530 = vmatprep.mubr.f32.mxu0 %v8448_v0  ;;  %631 = vmatprep.mubr.f32.mxu1 %v8448_v0  ;;  %v2110_v37 = vld [vmem:[#allocation8 + $0x460] sm:$0xff]  ;;  %v2112_v40 = vld [vmem:[#allocation8 + $0x470] sm:$0xff]  ;;  %v2119_v42 = vld [vmem:[#allocation8 + $0x4a8] sm:$0xff]  ;;  %v6968_v45 = vpack.c.bf16 %v2111_v32, %v2107_v31 }
  0xc9   :  { %6907 = vmatpush1.bf16.msra.mxu0 %v6906_v9  ;;  %6917 = vmatpush1.bf16.msra.mxu1 %v6916_v10  ;;  %v6946_v9 = vpack.c.bf16 %v1231_v61, %v1227_v60  ;;  %v1237_v10 = vld [vmem:[#allocation3 + $0x250] sm:$0xff]  ;;  %v2114_v49 = vld [vmem:[#allocation8 + $0x480] sm:$0xff]  ;;  %v2129_v60 = vld [vmem:[#allocation8 + $0x4f8] sm:$0xff] }
  0xca   :  { %6910 = vmatprep.subr.msk.bf16.mxu0 %vm8622_vm2, %v6908_v11  ;;  %6920 = vmatprep.subr.msk.bf16.mxu1 %vm8622_vm2, %v6918_v15  ;;  %v1241_v11 = vld [vmem:[#allocation3 + $0x270] sm:$0xf]  ;;  %v6956_v15 = vpack.c.bf16 %v1233_v63, %v1229_v62  ;;  %v2118_v50 = vld [vmem:[#allocation8 + $0x4a0] sm:$0xff]  ;;  %v2124_v3 = vld [vmem:[#allocation8 + $0x4d0] sm:$0xff] }
  0xcb   :  { %6462 = vmatmul.mubr.msk.f32.gmra.mrb[2].mxu0 %vm196_vm3, %v152_v19  ;;  %6470 = vmatmul.mubr.msk.f32.gmra.mrb[2].mxu1 %vm196_vm3, %v152_v19  ;;  %v6958_v19 = vpack.c.bf16 %v1242_v6, %v1238_v5  ;;  %v1221_v43 = vld [vmem:[%s9105_s0 + $0xc] sm:$0xff]  ;;  %v2122_v62 = vld [vmem:[#allocation8 + $0x4c0] sm:$0xff]  ;;  %v6974_v2 = vpack.c.bf16 %v2118_v50, %v2114_v49  ;;  %v1225_v32 = vld [vmem:[%s9105_s0 + $0x34] sm:$0xff] }
  0xcc   :  { %536 = vmatprep.mubr.f32.mxu0 %v8448_v0  ;;  %637 = vmatprep.mubr.f32.mxu1 %v8448_v0  ;;  %v2126_v63 = vld [vmem:[#allocation8 + $0x4e0] sm:$0xff]  ;;  %v2131_v5 = vld [vmem:[#allocation8 + $0x508] sm:$0xff] }
  0xcd   :  { %6913 = vmatpush1.bf16.msk.msra.mxu0 %vm8622_vm2, %v6911_v22  ;;  %6923 = vmatpush1.bf16.msk.msra.mxu1 %vm8622_vm2, %v6921_v23  ;;  %v6961_v22 = vpack.c.bf16 %v1241_v11, %v1237_v10  ;;  %v6964_v23 = vpack.c.bf16 %v2103_v13, %v2099_v12  ;;  %v2135_v6 = vld [vmem:[#allocation8 + $0x528] sm:$0xff]  ;;  %v1223_v7 = vld [vmem:[%s9105_s0 + $0x24] sm:$0xff]  ;;  %v2133_v10 = vld [vmem:[#allocation8 + $0x518] sm:$0xff] }
  0xce   :  { %6925 = vmatprep.subr.bf16.mxu0 %v6924_v24  ;;  %6935 = vmatprep.subr.bf16.mxu1 %v6934_v25  ;;  %v7028_v24 = vpack.c.bf16 %v2105_v18, %v2101_v17  ;;  %v944_v25 = vld [vmem:[%s9105_s0 + $0x23] sm:$0xff]  ;;  %v2136_v17 = vld [vmem:[#allocation8 + $0x530] sm:$0xff]  ;;  %v2139_v18 = vld [vmem:[#allocation8 + $0x548] sm:$0xff] }
  0xcf   :  { %6463 = vmatmul.mubr.msk.f32.gmra.mrb[4].mxu0 %vm196_vm3, %v153_v26  ;;  %6471 = vmatmul.mubr.msk.f32.gmra.mrb[4].mxu1 %vm196_vm3, %v153_v26  ;;  %v945_v26 = vld [vmem:[%s9105_s0 + $0x2b] sm:$0xff]  ;;  %v2137_v11 = vld [vmem:[#allocation8 + $0x538] sm:$0xff] }
  0xd0   :  { %542 = vmatprep.mubr.f32.mxu0 %v8448_v0  ;;  %643 = vmatprep.mubr.f32.mxu1 %v8448_v0  ;;  %v2130_v13 = vld [vmem:[#allocation8 + $0x500] sm:$0xff]  ;;  %v2151_v31 = vld [vmem:[#allocation8 + $0x5a8] sm:$0xff] }
  0xd1   :  { %v2159_v49 = vld [vmem:[#allocation8 + $0x5e8] sm:$0xff] }
  0xd3   :  { %6464 = vmatmul.mubr.msk.f32.gmra.mrb[6].mxu0 %vm196_vm3, %v154_v27  ;;  %6472 = vmatmul.mubr.msk.f32.gmra.mrb[6].mxu1 %vm196_vm3, %v154_v27  ;;  %v2098_v27 = vld [vmem:[#allocation8 + $0x400] sm:$0xff] }
  0xd4   :  { %548 = vmatprep.mubr.f32.mxu0 %v8448_v0  ;;  %649 = vmatprep.mubr.f32.mxu1 %v8448_v0 }
  0xd7   :  { %6465 = vmatmul.mubr.msk.f32.gmra.mrb[8].mxu0 %vm196_vm3, %v155_v28  ;;  %6473 = vmatmul.mubr.msk.f32.gmra.mrb[8].mxu1 %vm196_vm3, %v155_v28  ;;  %v2102_v28 = vld [vmem:[#allocation8 + $0x420] sm:$0xff] }
  0xd8   :  { %554 = vmatprep.mubr.f32.mxu0 %v8448_v0  ;;  %655 = vmatprep.mubr.f32.mxu1 %v8448_v0  ;;  %v6966_v38 = vpack.c.bf16 %v2102_v28, %v2098_v27  ;;  %v2140_v28 = vld [vmem:[#allocation8 + $0x550] sm:$0xff] }
  0xdb   :  { %6466 = vmatmul.mubr.msk.f32.gmra.mrb[10].mxu0 %vm196_vm3, %v156_v29  ;;  %6474 = vmatmul.mubr.msk.f32.gmra.mrb[10].mxu1 %vm196_vm3, %v156_v29  ;;  %v2100_v29 = vld [vmem:[#allocation8 + $0x410] sm:$0xff] }
  0xdc   :  { %779 = vmatprep.mubr.f32.mxu0 %v8448_v0  ;;  %880 = vmatprep.mubr.f32.mxu1 %v8448_v0  ;;  %v7030_v44 = vpack.c.bf16 %v2104_v30, %v2100_v29  ;;  %v2144_v29 = vld [vmem:[#allocation8 + $0x570] sm:$0xff]  ;;  %v2147_v30 = vld [vmem:[#allocation8 + $0x588] sm:$0xff] }
  0xdf   :  { %6477 = vmatmul.mubr.msk.f32.vlgmr.msra.gmra.mrb[0].mxu0 %vm196_vm3, %v662_v34  ;;  %6485 = vmatmul.mubr.msk.f32.vlgmr.msra.gmra.mrb[0].mxu1 %vm196_vm3, %v662_v34  ;;  %v2109_v34 = vld [vmem:[#allocation8 + $0x458] sm:$0xff] }
  0xe0   :  { %785 = vmatprep.mubr.f32.mxu0 %v8448_v0  ;;  %886 = vmatprep.mubr.f32.mxu1 %v8448_v0 }
  0xe1   :  { %6927 = vmatpush1.bf16.msra.mxu0 %v6926_v41  ;;  %6937 = vmatpush1.bf16.msra.mxu1 %v6936_v47  ;;  %v2115_v41 = vld [vmem:[#allocation8 + $0x488] sm:$0xff]  ;;  %v2121_v47 = vld [vmem:[#allocation8 + $0x4b8] sm:$0xff] }
  0xe2   :  { %6930 = vmatprep.subr.msk.bf16.mxu0 %vm8622_vm2, %v6928_v48  ;;  %6940 = vmatprep.subr.msk.bf16.mxu1 %vm8622_vm2, %v6938_v51  ;;  %v7032_v48 = vpack.c.bf16 %v2113_v35, %v2109_v34  ;;  %v6970_v51 = vpack.c.bf16 %v2110_v37, %v2106_v36  ;;  %v2149_v35 = vld [vmem:[#allocation8 + $0x598] sm:$0xff] }
  0xe3   :  { %6478 = vmatmul.mubr.msk.f32.gmra.mrb[2].mxu0 %vm196_vm3, %v663_v46  ;;  %6486 = vmatmul.mubr.msk.f32.gmra.mrb[2].mxu1 %vm196_vm3, %v663_v46  ;;  %v2117_v46 = vld [vmem:[#allocation8 + $0x498] sm:$0xff] }
  0xe4   :  { %791 = vmatprep.mubr.f32.mxu0 %v8448_v0  ;;  %892 = vmatprep.mubr.f32.mxu1 %v8448_v0  ;;  %v7036_v61 = vpack.c.bf16 %v2121_v47, %v2117_v46  ;;  %v2153_v36 = vld [vmem:[#allocation8 + $0x5b8] sm:$0xff] }
  0xe5   :  { %6933 = vmatpush1.bf16.msk.msra.mxu0 %vm8622_vm2, %v6931_v52  ;;  %6943 = vmatpush1.bf16.msk.msra.mxu1 %vm8622_vm2, %v6941_v54  ;;  %v2116_v52 = vld [vmem:[#allocation8 + $0x490] sm:$0xff]  ;;  %v2123_v54 = vld [vmem:[#allocation8 + $0x4c8] sm:$0xff] }
  0xe6   :  { %6945 = vmatprep.subr.bf16.mxu0 %v6944_v55  ;;  %6955 = vmatprep.subr.bf16.mxu1 %v6954_v56  ;;  %v2127_v55 = vld [vmem:[#allocation8 + $0x4e8] sm:$0xff]  ;;  %v1222_v56 = vld [vmem:[%s9105_s0 + $0x14] sm:$0xff] }
  0xe7   :  { %6479 = vmatmul.mubr.msk.f32.gmra.mrb[4].mxu0 %vm196_vm3, %v664_v53  ;;  %6487 = vmatmul.mubr.msk.f32.gmra.mrb[4].mxu1 %vm196_vm3, %v664_v53  ;;  %v2120_v53 = vld [vmem:[#allocation8 + $0x4b0] sm:$0xff] }
  0xe8   :  { %797 = vmatprep.mubr.f32.mxu0 %v8448_v0  ;;  %898 = vmatprep.mubr.f32.mxu1 %v8448_v0  ;;  %v7038_v8 = vpack.c.bf16 %v2120_v53, %v2116_v52  ;;  %v2161_v52 = vld [vmem:[#allocation8 + $0x5f8] sm:$0xff]  ;;  %v2154_v53 = vld [vmem:[#allocation8 + $0x5c0] sm:$0xff] }
  0xeb   :  { %6480 = vmatmul.mubr.msk.f32.gmra.mrb[6].mxu0 %vm196_vm3, %v665_v57  ;;  %6488 = vmatmul.mubr.msk.f32.gmra.mrb[6].mxu1 %vm196_vm3, %v665_v57  ;;  %v7034_v57 = vpack.c.bf16 %v2112_v40, %v2108_v39  ;;  %v2150_v39 = vld [vmem:[#allocation8 + $0x5a0] sm:$0xff] }
  0xec   :  { %803 = vmatprep.mubr.f32.mxu0 %v8448_v0  ;;  %904 = vmatprep.mubr.f32.mxu1 %v8448_v0 }
  0xef   :  { %6481 = vmatmul.mubr.msk.f32.gmra.mrb[8].mxu0 %vm196_vm3, %v666_v58  ;;  %6489 = vmatmul.mubr.msk.f32.gmra.mrb[8].mxu1 %vm196_vm3, %v666_v58  ;;  %v6972_v58 = vpack.c.bf16 %v2119_v42, %v2115_v41  ;;  %v2148_v41 = vld [vmem:[#allocation8 + $0x590] sm:$0xff] }
  0xf0   :  { %809 = vmatprep.mubr.f32.mxu0 %v8448_v0  ;;  %910 = vmatprep.mubr.f32.mxu1 %v8448_v0  ;;  %v2152_v42 = vld [vmem:[#allocation8 + $0x5b0] sm:$0xff] }
  0xf1   :  { %v7054_v47 = vpack.c.bf16 %v2152_v42, %v2148_v41  ;;  %v2188_v42 = vld [vmem:[#allocation8 + $0x6d0] sm:$0xff] }
  0xf3   :  { %6482 = vmatmul.mubr.msk.f32.gmra.mrb[10].mxu0 %vm196_vm3, %v667_v59  ;;  %6490 = vmatmul.mubr.msk.f32.gmra.mrb[10].mxu1 %vm196_vm3, %v667_v59  ;;  %v2125_v59 = vld [vmem:[#allocation8 + $0x4d8] sm:$0xff] }
  0xf4   :  { %1058 = vmatprep.mubr.f32.mxu0 %v8448_v0  ;;  %1159 = vmatprep.mubr.f32.mxu1 %v8448_v0  ;;  %v7040_v12 = vpack.c.bf16 %v2129_v60, %v2125_v59  ;;  %v2163_v60 = vld [vmem:[#allocation8 + $0x608] sm:$0xff] }
  0xf7   :  { %6493 = vmatmul.mubr.msk.f32.vlgmr.msra.gmra.mrb[0].mxu0 %vm196_vm3, %v941_v4  ;;  %6501 = vmatmul.mubr.msk.f32.vlgmr.msra.gmra.mrb[0].mxu1 %vm196_vm3, %v941_v4  ;;  %v2128_v4 = vld [vmem:[#allocation8 + $0x4f0] sm:$0xff] }
  0xf8   :  { %1064 = vmatprep.mubr.f32.mxu0 %v8448_v0  ;;  %1165 = vmatprep.mubr.f32.mxu1 %v8448_v0 }
  0xf9   :  { %6947 = vmatpush1.bf16.msra.mxu0 %v6946_v9  ;;  %6957 = vmatpush1.bf16.msra.mxu1 %v6956_v15  ;;  %v6976_v9 = vpack.c.bf16 %v2127_v55, %v2123_v54  ;;  %v6978_v15 = vpack.c.bf16 %v2126_v63, %v2122_v62  ;;  %v2158_v55 = vld [vmem:[#allocation8 + $0x5e0] sm:$0xff]  ;;  %v2165_v62 = vld [vmem:[#allocation8 + $0x618] sm:$0xff] }
  0xfa   :  { %6950 = vmatprep.subr.msk.bf16.mxu0 %vm8622_vm2, %v6948_v16  ;;  %6960 = vmatprep.subr.msk.bf16.mxu1 %vm8622_vm2, %v6958_v19  ;;  %v2132_v16 = vld [vmem:[#allocation8 + $0x510] sm:$0xff]  ;;  %v2143_v19 = vld [vmem:[#allocation8 + $0x568] sm:$0xff] }
  0xfb   :  { %6494 = vmatmul.mubr.msk.f32.gmra.mrb[2].mxu0 %vm196_vm3, %v942_v14  ;;  %6502 = vmatmul.mubr.msk.f32.gmra.mrb[2].mxu1 %vm196_vm3, %v942_v14  ;;  %v2134_v14 = vld [vmem:[#allocation8 + $0x520] sm:$0xff]  ;;  %v6984_v34 = vpack.c.bf16 %v2143_v19, %v2139_v18  ;;  %v2172_v19 = vld [vmem:[#allocation8 + $0x650] sm:$0xff] }
  0xfc   :  { %1070 = vmatprep.mubr.f32.mxu0 %v8448_v0  ;;  %1171 = vmatprep.mubr.f32.mxu1 %v8448_v0  ;;  %v6982_v27 = vpack.c.bf16 %v2134_v14, %v2130_v13  ;;  %v2177_v14 = vld [vmem:[#allocation8 + $0x678] sm:$0xff] }
  0xfd   :  { %6953 = vmatpush1.bf16.msk.msra.mxu0 %vm8622_vm2, %v6951_v20  ;;  %6963 = vmatpush1.bf16.msk.msra.mxu1 %vm8622_vm2, %v6961_v22  ;;  %v1224_v20 = vld [vmem:[%s9105_s0 + $0x2c] sm:$0xff]  ;;  %v6980_v22 = vpack.c.bf16 %v2135_v6, %v2131_v5  ;;  %s8451_s0 = smov [#allocation18]  }
  0xfe   :  { %6965 = vmatprep.subr.bf16.mxu0 %v6964_v23  ;;  %7029 = vmatprep.subr.bf16.mxu1 %v7028_v24  ;;  %v2141_v23 = vld [vmem:[#allocation8 + $0x558] sm:$0xff]  ;;  %s6430_s8 = sshll.u32 %s8451_s0, 4  ;;  %s6431_s8 = int_to_ptr.vmem [resolvable:$true] %s6430_s8 }
  0xff   :  { %6495 = vmatmul.mubr.msk.f32.gmra.mrb[4].mxu0 %vm196_vm3, %v943_v21  ;;  %6503 = vmatmul.mubr.msk.f32.gmra.mrb[4].mxu1 %vm196_vm3, %v943_v21  ;;  %v7042_v21 = vpack.c.bf16 %v2128_v4, %v2124_v3  ;;  %v2145_v24 = vld [vmem:[#allocation8 + $0x578] sm:$0xff]  ;;  %v2162_v3 = vld [vmem:[#allocation8 + $0x600] sm:$0xff]  ;;  %s8398_s12 = scalar_lea.vmem %s6431_s8, 32  ;;  %p8403_p3 = scmp.lt.s32.totalorder %s6431_s8, %s6431_s8 }
 0x100   :  { %1076 = vmatprep.mubr.f32.mxu0 %v8448_v0  ;;  %1177 = vmatprep.mubr.f32.mxu1 %v8448_v0  ;;  %v7048_v37 = vpack.c.bf16 %v2145_v24, %v2141_v23  ;;  %v2166_v4 = vld [vmem:[#allocation8 + $0x620] sm:$0xff]  ;;  %v2183_v23 = vld [vmem:[#allocation8 + $0x6a8] sm:$0xff]  ;;  %v2181_v24 = vld [vmem:[#allocation8 + $0x698] sm:$0xff]  ;;  %p8399_p2 = scmp.ne.s32.totalorder %s6431_s8, %s8398_s12  ;;  %p8404_p4 = scmp.lt.s32.totalorder %s8398_s12, %s8398_s12 }
 0x101   :  { %v6998_v6 = vpack.c.bf16 %v2166_v4, %v2162_v3  ;;  %v2204_v4 = vld [vmem:[#allocation8 + $0x750] sm:$0xff] }
 0x102   :  { %p8405_p5 = por %p8404_p4, %p8403_p3 }
 0x103   :  { %6496 = vmatmul.mubr.msk.f32.gmra.mrb[6].mxu0 %vm196_vm3, %v944_v25  ;;  %6504 = vmatmul.mubr.msk.f32.gmra.mrb[6].mxu1 %vm196_vm3, %v944_v25  ;;  %v7044_v25 = vpack.c.bf16 %v2137_v11, %v2133_v10  ;;  %v2171_v10 = vld [vmem:[#allocation8 + $0x648] sm:$0xff] }
 0x104   :  { %1082 = vmatprep.mubr.f32.mxu0 %v8448_v0  ;;  %1183 = vmatprep.mubr.f32.mxu1 %v8448_v0  ;;  %v2175_v11 = vld [vmem:[#allocation8 + $0x668] sm:$0xff]  ;;  %p8406_p6 = pnand %p8405_p5, %p8399_p2 }
 0x105   :  { %v7000_v13 = vpack.c.bf16 %v2175_v11, %v2171_v10  ;;  %v2217_v11 = vld [vmem:[#allocation8 + $0x7b8] sm:$0xff] }
 0x107   :  { %6497 = vmatmul.mubr.msk.f32.gmra.mrb[8].mxu0 %vm196_vm3, %v945_v26  ;;  %6505 = vmatmul.mubr.msk.f32.gmra.mrb[8].mxu1 %vm196_vm3, %v945_v26  ;;  %v2138_v26 = vld [vmem:[#allocation8 + $0x540] sm:$0xff] }
 0x108   :  { %1088 = vmatprep.mubr.f32.mxu0 %v8448_v0  ;;  %1189 = vmatprep.mubr.f32.mxu1 %v8448_v0 }
 0x10b   :  { %6498 = vmatmul.mubr.msk.f32.gmra.mrb[10].mxu0 %vm196_vm3, %v946_v1  ;;  %6506 = vmatmul.mubr.msk.f32.gmra.mrb[10].mxu1 %vm196_vm3, %v946_v1  ;;  %v2142_v1 = vld [vmem:[#allocation8 + $0x560] sm:$0xff] }
 0x10c   :  { %1337 = vmatprep.mubr.f32.mxu0 %v8448_v0  ;;  %1438 = vmatprep.mubr.f32.mxu1 %v8448_v0  ;;  %v6986_v40 = vpack.c.bf16 %v2142_v1, %v2138_v26  ;;  %v2185_v26 = vld [vmem:[#allocation8 + $0x6b8] sm:$0xff]  ;;  %v2178_v1 = vld [vmem:[#allocation8 + $0x680] sm:$0xff] }
 0x10f   :  { %6509 = vmatmul.mubr.msk.f32.vlgmr.msra.gmra.mrb[0].mxu0 %vm196_vm3, %v1220_v33  ;;  %6517 = vmatmul.mubr.msk.f32.vlgmr.msra.gmra.mrb[0].mxu1 %vm196_vm3, %v1220_v33  ;;  %v7046_v33 = vpack.c.bf16 %v2136_v17, %v2132_v16  ;;  %v2174_v16 = vld [vmem:[#allocation8 + $0x660] sm:$0xff] }
 0x110   :  { %1343 = vmatprep.mubr.f32.mxu0 %v8448_v0  ;;  %1444 = vmatprep.mubr.f32.mxu1 %v8448_v0 }
 0x111   :  { %6967 = vmatpush1.bf16.msra.mxu0 %v6966_v38  ;;  %7031 = vmatpush1.bf16.msra.mxu1 %v7030_v44  ;;  %v2146_v38 = vld [vmem:[#allocation8 + $0x580] sm:$0xff]  ;;  %v6988_v44 = vpack.c.bf16 %v2151_v31, %v2147_v30  ;;  %v2180_v30 = vld [vmem:[#allocation8 + $0x690] sm:$0xff] }
 0x112   :  { %6969 = vmatprep.subr.bf16.mxu0 %v6968_v45  ;;  %7033 = vmatprep.subr.bf16.mxu1 %v7032_v48  ;;  %v7052_v45 = vpack.c.bf16 %v2153_v36, %v2149_v35  ;;  %v6990_v46 = vpack.c.bf16 %v2150_v39, %v2146_v38  ;;  %v2155_v48 = vld [vmem:[#allocation8 + $0x5c8] sm:$0xff]  ;;  %v2184_v31 = vld [vmem:[#allocation8 + $0x6b0] sm:$0xff]  ;;  %v2189_v35 = vld [vmem:[#allocation8 + $0x6d8] sm:$0xff] }
 0x113   :  { %6510 = vmatmul.mubr.msk.f32.gmra.mrb[2].mxu0 %vm196_vm3, %v1221_v43  ;;  %6518 = vmatmul.mubr.msk.f32.gmra.mrb[2].mxu1 %vm196_vm3, %v1221_v43  ;;  %v7050_v43 = vpack.c.bf16 %v2144_v29, %v2140_v28  ;;  %v6992_v50 = vpack.c.bf16 %v2159_v49, %v2155_v48  ;;  %v7068_v28 = vpack.c.bf16 %v2185_v26, %v2181_v24  ;;  %v2186_v38 = vld [vmem:[#allocation8 + $0x6c0] sm:$0xff]  ;;  %v2201_v49 = vld [vmem:[#allocation8 + $0x738] sm:$0xff] }
 0x114   :  { %1349 = vmatprep.mubr.f32.mxu0 %v8448_v0  ;;  %1450 = vmatprep.mubr.f32.mxu1 %v8448_v0  ;;  %v2190_v39 = vld [vmem:[#allocation8 + $0x6e0] sm:$0xff] }
 0x115   :  { %6971 = vmatpush1.bf16.msra.mxu0 %v6970_v51  ;;  %7035 = vmatpush1.bf16.msra.mxu1 %v7034_v57  ;;  %v2157_v51 = vld [vmem:[#allocation8 + $0x5d8] sm:$0xff]  ;;  %v2160_v57 = vld [vmem:[#allocation8 + $0x5f0] sm:$0xff]  ;;  %v7010_v41 = vpack.c.bf16 %v2190_v39, %v2186_v38  ;;  %v2218_v24 = vld [vmem:[#allocation8 + $0x7c0] sm:$0xff] }
 0x116   :  { %6973 = vmatprep.subr.bf16.mxu0 %v6972_v58  ;;  %7037 = vmatprep.subr.bf16.mxu1 %v7036_v61  ;;  %v7056_v54 = vpack.c.bf16 %v2161_v52, %v2157_v51  ;;  %v6994_v58 = vpack.c.bf16 %v2158_v55, %v2154_v53  ;;  %v2167_v61 = vld [vmem:[#allocation8 + $0x628] sm:$0xff]  ;;  %v2198_v51 = vld [vmem:[#allocation8 + $0x720] sm:$0xff]  ;;  %v2200_v55 = vld [vmem:[#allocation8 + $0x730] sm:$0xff] }
 0x117   :  { %6511 = vmatmul.mubr.msk.f32.gmra.mrb[4].mxu0 %vm196_vm3, %v1222_v56  ;;  %6519 = vmatmul.mubr.msk.f32.gmra.mrb[4].mxu1 %vm196_vm3, %v1222_v56  ;;  %v2156_v56 = vld [vmem:[#allocation8 + $0x5d0] sm:$0xff]  ;;  %v6996_v63 = vpack.c.bf16 %v2167_v61, %v2163_v60  ;;  %v2209_v61 = vld [vmem:[#allocation8 + $0x778] sm:$0xff] }
 0x118   :  { %1355 = vmatprep.mubr.f32.mxu0 %v8448_v0  ;;  %1456 = vmatprep.mubr.f32.mxu1 %v8448_v0  ;;  %v7058_v59 = vpack.c.bf16 %v2160_v57, %v2156_v56  ;;  %v2203_v57 = vld [vmem:[#allocation8 + $0x748] sm:$0xff]  ;;  %v1499_v39 = vld [vmem:[#allocation6] sm:$0xf] }
 0x119   :  { %6975 = vmatpush1.bf16.msra.mxu0 %v6974_v2  ;;  %7039 = vmatpush1.bf16.msra.mxu1 %v7038_v8  ;;  %v2169_v2 = vld [vmem:[#allocation8 + $0x638] sm:$0xff]  ;;  %v2168_v8 = vld [vmem:[#allocation8 + $0x630] sm:$0xff] }
 0x11a   :  { %6977 = vmatprep.subr.bf16.mxu0 %v6976_v9  ;;  %7041 = vmatprep.subr.bf16.mxu1 %v7040_v12  ;;  %v7060_v5 = vpack.c.bf16 %v2169_v2, %v2165_v62  ;;  %v2173_v12 = vld [vmem:[#allocation8 + $0x658] sm:$0xff]  ;;  %v2202_v62 = vld [vmem:[#allocation8 + $0x740] sm:$0xff] }
 0x11b   :  { %6512 = vmatmul.mubr.msk.f32.gmra.mrb[6].mxu0 %vm196_vm3, %v1223_v7  ;;  %6520 = vmatmul.mubr.msk.f32.gmra.mrb[6].mxu1 %vm196_vm3, %v1223_v7  ;;  %v2164_v7 = vld [vmem:[#allocation8 + $0x610] sm:$0xff]  ;;  %v7064_v17 = vpack.c.bf16 %v2177_v14, %v2173_v12  ;;  %v2210_v12 = vld [vmem:[#allocation8 + $0x780] sm:$0xff] }
 0x11c   :  { %1361 = vmatprep.mubr.f32.mxu0 %v8448_v0  ;;  %1462 = vmatprep.mubr.f32.mxu1 %v8448_v0  ;;  %v7062_v9 = vpack.c.bf16 %v2168_v8, %v2164_v7  ;;  %v2211_v7 = vld [vmem:[#allocation8 + $0x788] sm:$0xff] }
 0x11d   :  { %6979 = vmatpush1.bf16.msra.mxu0 %v6978_v15  ;;  %7043 = vmatpush1.bf16.msra.mxu1 %v7042_v21  ;;  %v2170_v15 = vld [vmem:[#allocation8 + $0x640] sm:$0xff]  ;;  %v2215_v8 = vld [vmem:[#allocation8 + $0x7a8] sm:$0xff] }
 0x11e   :  { %6981 = vmatprep.subr.bf16.mxu0 %v6980_v22  ;;  %7045 = vmatprep.subr.bf16.mxu1 %v7044_v25  ;;  %v7002_v18 = vpack.c.bf16 %v2174_v16, %v2170_v15  ;;  %v2179_v22 = vld [vmem:[#allocation8 + $0x688] sm:$0xff]  ;;  %v7020_v10 = vpack.c.bf16 %v2215_v8, %v2211_v7  ;;  %v2212_v16 = vld [vmem:[#allocation8 + $0x790] sm:$0xff] }
 0x11f   :  { %6513 = vmatmul.mubr.msk.f32.gmra.mrb[8].mxu0 %vm196_vm3, %v1224_v20  ;;  %6521 = vmatmul.mubr.msk.f32.gmra.mrb[8].mxu1 %vm196_vm3, %v1224_v20  ;;  %v2176_v20 = vld [vmem:[#allocation8 + $0x670] sm:$0xff]  ;;  %v7004_v25 = vpack.c.bf16 %v2183_v23, %v2179_v22  ;;  %v2225_v23 = vld [vmem:[#allocation8 + $0x7f8] sm:$0xff] }
 0x120   :  { %1367 = vmatprep.mubr.f32.mxu0 %v8448_v0  ;;  %1468 = vmatprep.mubr.f32.mxu1 %v8448_v0  ;;  %v7066_v21 = vpack.c.bf16 %v2176_v20, %v2172_v19  ;;  %v2219_v19 = vld [vmem:[#allocation8 + $0x7c8] sm:$0xff] }
 0x121   :  { %6983 = vmatpush1.bf16.msra.mxu0 %v6982_v27  ;;  %7047 = vmatpush1.bf16.msra.mxu1 %v7046_v33  ;;  %v2182_v27 = vld [vmem:[#allocation8 + $0x6a0] sm:$0xff]  ;;  %v2187_v33 = vld [vmem:[#allocation8 + $0x6c8] sm:$0xff] }
 0x122   :  { %6985 = vmatprep.subr.bf16.mxu0 %v6984_v34  ;;  %7049 = vmatprep.subr.bf16.mxu1 %v7048_v37  ;;  %v7006_v29 = vpack.c.bf16 %v2182_v27, %v2178_v1  ;;  %v2191_v34 = vld [vmem:[#allocation8 + $0x6e8] sm:$0xff]  ;;  %v2193_v37 = vld [vmem:[#allocation8 + $0x6f8] sm:$0xff]  ;;  %v2220_v27 = vld [vmem:[#allocation8 + $0x7d0] sm:$0xff] }
 0x123   :  { %6514 = vmatmul.mubr.msk.f32.gmra.mrb[10].mxu0 %vm196_vm3, %v1225_v32  ;;  %6522 = vmatmul.mubr.msk.f32.gmra.mrb[10].mxu1 %vm196_vm3, %v1225_v32  ;;  %v7070_v32 = vpack.c.bf16 %v2184_v31, %v2180_v30  ;;  %v7008_v36 = vpack.c.bf16 %v2191_v34, %v2187_v33  ;;  %v2223_v20 = vld [vmem:[#allocation8 + $0x7e8] sm:$0xff]  ;;  %v1943_v34 = vld [vmem:[#allocation8 + $0x38] sm:$0xff] }
 0x124   :  { %v7024_v22 = vpack.c.bf16 %v2223_v20, %v2219_v19  ;;  %v1937_v30 = vld [vmem:[#allocation8 + $0x8] sm:$0xff] }
 0x125   :  { %6987 = vmatpush1.bf16.msra.mxu0 %v6986_v40  ;;  %7051 = vmatpush1.bf16.msra.mxu1 %v7050_v43  ;;  %v7072_v40 = vpack.c.bf16 %v2193_v37, %v2189_v35  ;;  %v2192_v43 = vld [vmem:[#allocation8 + $0x6f0] sm:$0xff]  ;;  %v1941_v31 = vld [vmem:[#allocation8 + $0x28] sm:$0xff] }
 0x126   :  { %6989 = vmatprep.subr.bf16.mxu0 %v6988_v44  ;;  %7053 = vmatprep.subr.bf16.mxu1 %v7052_v45  ;;  %v7074_v44 = vpack.c.bf16 %v2192_v43, %v2188_v42  ;;  %v2195_v45 = vld [vmem:[#allocation8 + $0x708] sm:$0xff]  ;;  %v7092_v33 = vpack.c.bf16 %v1941_v31, %v1937_v30 }
 0x129   :  { %6991 = vmatpush1.bf16.msra.mxu0 %v6990_v46  ;;  %7055 = vmatpush1.bf16.msra.mxu1 %v7054_v47  ;;  %v2199_v46 = vld [vmem:[#allocation8 + $0x728] sm:$0xff]  ;;  %v2197_v47 = vld [vmem:[#allocation8 + $0x718] sm:$0xff] }
 0x12a   :  { %6993 = vmatprep.subr.bf16.mxu0 %v6992_v50  ;;  %7057 = vmatprep.subr.bf16.mxu1 %v7056_v54  ;;  %v7012_v48 = vpack.c.bf16 %v2199_v46, %v2195_v45  ;;  %v2194_v50 = vld [vmem:[#allocation8 + $0x700] sm:$0xff]  ;;  %v7076_v52 = vpack.c.bf16 %v2201_v49, %v2197_v47  ;;  %v2196_v54 = vld [vmem:[#allocation8 + $0x710] sm:$0xff] }
 0x12b   :  { %v7014_v53 = vpack.c.bf16 %v2198_v51, %v2194_v50  ;;  %v7078_v56 = vpack.c.bf16 %v2200_v55, %v2196_v54  ;;  %v8450_v51 = vmov 1966171168  }
 0x12d   :  { %6995 = vmatpush1.bf16.msra.mxu0 %v6994_v58  ;;  %7059 = vmatpush1.bf16.msra.mxu1 %v7058_v59  ;;  %v2207_v58 = vld [vmem:[#allocation8 + $0x768] sm:$0xff]  ;;  %v2205_v59 = vld [vmem:[#allocation8 + $0x758] sm:$0xff] }
 0x12e   :  { %6997 = vmatprep.subr.bf16.mxu0 %v6996_v63  ;;  %7061 = vmatprep.subr.bf16.mxu1 %v7060_v5  ;;  %v7016_v60 = vpack.c.bf16 %v2207_v58, %v2203_v57  ;;  %v2206_v63 = vld [vmem:[#allocation8 + $0x760] sm:$0xff]  ;;  %v7080_v2 = vpack.c.bf16 %v2209_v61, %v2205_v59  ;;  %v2208_v5 = vld [vmem:[#allocation8 + $0x770] sm:$0xff] }
 0x12f   :  { %v7018_v3 = vpack.c.bf16 %v2206_v63, %v2202_v62 }
 0x131   :  { %6999 = vmatpush1.bf16.msra.mxu0 %v6998_v6  ;;  %7063 = vmatpush1.bf16.msra.mxu1 %v7062_v9  ;;  %v7082_v6 = vpack.c.bf16 %v2208_v5, %v2204_v4  ;;  %v2213_v9 = vld [vmem:[#allocation8 + $0x798] sm:$0xff] }
 0x132   :  { %7001 = vmatprep.subr.bf16.mxu0 %v7000_v13  ;;  %7065 = vmatprep.subr.bf16.mxu1 %v7064_v17  ;;  %v2214_v13 = vld [vmem:[#allocation8 + $0x7a0] sm:$0xff]  ;;  %v7084_v14 = vpack.c.bf16 %v2217_v11, %v2213_v9  ;;  %v2216_v17 = vld [vmem:[#allocation8 + $0x7b0] sm:$0xff] }
 0x133   :  { %v7022_v15 = vpack.c.bf16 %v2214_v13, %v2210_v12 }
 0x135   :  { %7003 = vmatpush1.bf16.msra.mxu0 %v7002_v18  ;;  %7067 = vmatpush1.bf16.msra.mxu1 %v7066_v21  ;;  %v7086_v18 = vpack.c.bf16 %v2216_v17, %v2212_v16  ;;  %v2221_v21 = vld [vmem:[#allocation8 + $0x7d8] sm:$0xff] }
 0x136   :  { %7005 = vmatprep.subr.bf16.mxu0 %v7004_v25  ;;  %7069 = vmatprep.subr.bf16.mxu1 %v7068_v28  ;;  %v2222_v25 = vld [vmem:[#allocation8 + $0x7e0] sm:$0xff]  ;;  %v7088_v26 = vpack.c.bf16 %v2225_v23, %v2221_v21  ;;  %v2224_v28 = vld [vmem:[#allocation8 + $0x7f0] sm:$0xff] }
 0x137   :  { %v7026_v1 = vpack.c.bf16 %v2222_v25, %v2218_v24 }
 0x139   :  { %7007 = vmatpush1.bf16.msra.mxu0 %v7006_v29  ;;  %7071 = vmatpush1.bf16.msra.mxu1 %v7070_v32  ;;  %v7090_v29 = vpack.c.bf16 %v2224_v28, %v2220_v27  ;;  %v1939_v32 = vld [vmem:[#allocation8 + $0x18] sm:$0xff] }
 0x13a   :  { %7009 = vmatprep.subr.bf16.mxu0 %v7008_v36  ;;  %7073 = vmatprep.subr.bf16.mxu1 %v7072_v40  ;;  %v7156_v35 = vpack.c.bf16 %v1943_v34, %v1939_v32  ;;  %v1501_v36 = vlaneseq }
 0x13c   :  { %v1502_v37 = vshrl.u32 %v1501_v36, 7  ;;  %vm8908_vm4 = vcmp.lt.s32.totalorder %v1501_v36, 256 }
 0x13d   :  { %7011 = vmatpush1.bf16.msra.mxu0 %v7010_v41  ;;  %7075 = vmatpush1.bf16.msra.mxu1 %v7074_v44 }
 0x13e   :  { %7013 = vmatprep.subr.bf16.mxu0 %v7012_v48  ;;  %7077 = vmatprep.subr.bf16.mxu1 %v7076_v52  ;;  %v8874_v38 = vsub.s32 0, %v1502_v37  ;;  %v8876_v40 = vsub.s32 2, %v1502_v37  ;;  %v8878_v41 = vsub.s32 1, %v1502_v37  ;;  %v8880_v42 = vsub.s32 3, %v1502_v37 }
 0x13f   :  { %v1603_v52 = vunpack.c.l.s4 %v8450_v51 }
 0x140   :  { %v8883_v43 = vrot.slane %v1499_v39, %v8874_v38  ;;  %v8886_v44 = vrot.slane %v1499_v39, %v8876_v40  ;;  %v8889_v45 = vrot.slane %v1499_v39, %v8878_v41  ;;  %v8892_v46 = vrot.slane %v1499_v39, %v8880_v42 }
 0x141   :  { %7015 = vmatpush1.bf16.msra.mxu0 %v7014_v53  ;;  %7079 = vmatpush1.bf16.msra.mxu1 %v7078_v56  ;;  %v1604_v62 = vunpack.c.0.s8 %v1603_v52 }
 0x142   :  { %7017 = vmatprep.subr.bf16.mxu0 %v7016_v60  ;;  %7081 = vmatprep.subr.bf16.mxu1 %v7080_v2 }
 0x143   :  { %v8902_v16 = vsub.s32 %v1604_v62, %v1502_v37 }
 0x145   :  { %7019 = vmatpush1.bf16.msra.mxu0 %v7018_v3  ;;  %7083 = vmatpush1.bf16.msra.mxu1 %v7082_v6 }
 0x146   :  { %7021 = vmatprep.subr.bf16.mxu0 %v7020_v10  ;;  %7085 = vmatprep.subr.bf16.mxu1 %v7084_v14 }
 0x149   :  { %7023 = vmatpush1.bf16.msra.mxu0 %v7022_v15  ;;  %7087 = vmatpush1.bf16.msra.mxu1 %v7086_v18 }
 0x14a   :  { %7025 = vmatprep.subr.bf16.mxu0 %v7024_v22  ;;  %7089 = vmatprep.subr.bf16.mxu1 %v7088_v26 }
 0x14d   :  { %7027 = vmatpush1.bf16.msra.mxu0 %v7026_v1  ;;  %7091 = vmatpush1.bf16.msra.mxu1 %v7090_v29 }
 0x14e   :  { %7093 = vmatprep.subr.bf16.mxu0 %v7092_v33  ;;  %7157 = vmatprep.subr.bf16.mxu1 %v7156_v35 }
 0x1e2   :  { %v1339_v47 = vpop.f32.mrb[0].mxu0  ;;  %v1440_v49 = vpop.f32.mrb[0].mxu1 }
 0x1e3   :  { %v1521_v48 = vadd.f32 %v8883_v43, %v1339_v47  ;;  %v1341_v50 = vpop.f32.mrb[1].mxu0  ;;  %v1523_v53 = vadd.f32 %v8886_v44, %v1440_v49  ;;  %v1442_v55 = vpop.f32.mrb[1].mxu1 }
 0x1e4   :  { %v1522_v54 = vadd.f32 %v8889_v45, %v1341_v50  ;;  %v1524_v57 = vadd.f32 %v8892_v46, %v1442_v55 }
 0x1e5   :  { %v1545_v56 = vmax.f32 %v1521_v48, 0.0  ;;  %v1547_v58 = vmax.f32 %v1523_v53, 0.0 }
 0x1e6   :  { %v1546_v59 = vmax.f32 %v1522_v54, 0.0  ;;  %v1345_v60 = vpop.f32.mrb[2].mxu0  ;;  %v1548_v61 = vmax.f32 %v1524_v57, 0.0  ;;  %v1446_v2 = vpop.f32.mrb[2].mxu1 }
 0x1e7   :  { %v1525_v63 = vadd.f32 %v8883_v43, %v1345_v60  ;;  %v1347_v3 = vpop.f32.mrb[3].mxu0  ;;  %v1569_v4 = vmax.f32 %v1545_v56, %v1547_v58  ;;  %v1527_v5 = vadd.f32 %v8886_v44, %v1446_v2  ;;  %v1448_v7 = vpop.f32.mrb[3].mxu1 }
 0x1e8   :  { %v1526_v6 = vadd.f32 %v8889_v45, %v1347_v3  ;;  %v1570_v8 = vmax.f32 %v1546_v59, %v1548_v61  ;;  %v1528_v10 = vadd.f32 %v8892_v46, %v1448_v7 }
 0x1e9   :  { %v1549_v9 = vmax.f32 %v1525_v63, 0.0  ;;  %v1585_v11 = vrot.slane %v1569_v4, 1  ;;  %v1551_v12 = vmax.f32 %v1527_v5, 0.0 }
 0x1ea   :  { %v1550_v13 = vmax.f32 %v1526_v6, 0.0  ;;  %v1351_v14 = vpop.f32.mrb[4].mxu0  ;;  %v1586_v15 = vrot.slane %v1570_v8, 1  ;;  %v1552_v17 = vmax.f32 %v1528_v10, 0.0  ;;  %v1452_v19 = vpop.f32.mrb[4].mxu1 }
 0x1eb   :  { %v1529_v18 = vadd.f32 %v8883_v43, %v1351_v14  ;;  %v1353_v20 = vpop.f32.mrb[5].mxu0  ;;  %v1593_v21 = vmax.f32 %v1569_v4, %v1585_v11  ;;  %v1571_v22 = vmax.f32 %v1549_v9, %v1551_v12  ;;  %v1531_v23 = vadd.f32 %v8886_v44, %v1452_v19  ;;  %v1454_v25 = vpop.f32.mrb[5].mxu1 }
 0x1ec   :  { %v1530_v24 = vadd.f32 %v8889_v45, %v1353_v20  ;;  %v1594_v26 = vmax.f32 %v1570_v8, %v1586_v15  ;;  %v1572_v1 = vmax.f32 %v1550_v13, %v1552_v17  ;;  %v1532_v28 = vadd.f32 %v8892_v46, %v1454_v25 }
 0x1ed   :  { %v1553_v27 = vmax.f32 %v1529_v18, 0.0  ;;  %v1704_v30 = vrot.slane %v1571_v22, 1  ;;  %v1555_v31 = vmax.f32 %v1531_v23, 0.0 }
 0x1ee   :  { %v1554_v32 = vmax.f32 %v1530_v24, 0.0  ;;  %v1357_v33 = vpop.f32.mrb[6].mxu0  ;;  %v1601_v34 = vcombine.low %v1593_v21, %v1594_v26  ;;  %v1652_v35 = vcombine.high %v1593_v21, %v1594_v26  ;;  %v1705_v37 = vrot.slane %v1572_v1, 1  ;;  %v1458_v47 = vpop.f32.mrb[6].mxu1 }
 0x1ef   :  { %v1556_v39 = vmax.f32 %v1532_v28, 0.0  ;;  %v1359_v48 = vpop.f32.mrb[7].mxu0  ;;  %v1712_v49 = vmax.f32 %v1571_v22, %v1704_v30  ;;  %v1573_v50 = vmax.f32 %v1553_v27, %v1555_v31  ;;  %v1533_v51 = vadd.f32 %v8883_v43, %v1357_v33  ;;  %v1460_v36 = vpop.f32.mrb[7].mxu1 }
 0x1f0   :  { %v1535_v52 = vadd.f32 %v8886_v44, %v1458_v47  ;;  %v1608_v53 = vrot.slane %v1601_v34, %v8902_v16  ;;  %v1659_v54 = vrot.slane %v1652_v35, %v8902_v16  ;;  %v1713_v55 = vmax.f32 %v1572_v1, %v1705_v37 }
 0x1f1   :  { %v1574_v56 = vmax.f32 %v1554_v32, %v1556_v39  ;;  %v1820_v57 = vrot.slane %v1573_v50, 1  ;;  %v1557_v58 = vmax.f32 %v1533_v51, 0.0  ;;  %v1534_v60 = vadd.f32 %v8889_v45, %v1359_v48 }
 0x1f2   :  { %v1559_v59 = vmax.f32 %v1535_v52, 0.0  ;;  %v1363_v61 = vpop.f32.mrb[8].mxu0  ;;  %v1615_v62 = vrot.slane %v1608_v53, %v8902_v16  ;;  %v1666_v63 = vrot.slane %v1659_v54, %v8902_v16  ;;  %v1720_v2 = vcombine.low %v1712_v49, %v1713_v55  ;;  %v1464_v4 = vpop.f32.mrb[8].mxu1 }
 0x1f3   :  { %v1768_v3 = vcombine.high %v1712_v49, %v1713_v55  ;;  %v1365_v5 = vpop.f32.mrb[9].mxu0  ;;  %v1828_v6 = vmax.f32 %v1573_v50, %v1820_v57  ;;  %v1821_v7 = vrot.slane %v1574_v56, 1  ;;  %v1558_v9 = vmax.f32 %v1534_v60, 0.0  ;;  %v1466_v10 = vpop.f32.mrb[9].mxu1 }
 0x1f4   :  { %v1575_v8 = vmax.f32 %v1557_v58, %v1559_v59  ;;  %1637 = vst.msk [vmem:[#allocation2] ss:$8 sm:$0x3] %vm8908_vm4, %v1615_v62  ;;  %v1642_v11 = vcombine.high %v1615_v62, %v1615_v62  ;;  %1685 = vst.msk [vmem:[#allocation2 + $0x2] ss:$8 sm:$0x3] %vm8908_vm4, %v1666_v63  ;;  %v1690_v12 = vcombine.high %v1666_v63, %v1666_v63 }
 0x1f5   :  { %v1727_v13 = vrot.slane %v1720_v2, %v8902_v16  ;;  %v1775_v14 = vrot.slane %v1768_v3, %v8902_v16  ;;  %v1829_v15 = vmax.f32 %v1574_v56, %v1821_v7  ;;  %v1536_v18 = vadd.f32 %v8892_v46, %v1460_v36 }
 0x1f6   :  { %v1587_v17 = vrot.slane %v1575_v8, 1  ;;  %v1537_v19 = vadd.f32 %v8883_v43, %v1363_v61  ;;  %v1369_v20 = vpop.f32.mrb[10].mxu0  ;;  %1647 = vst.msk [vmem:[#allocation2 + $0x1] ss:$8 sm:$0x3] %vm8908_vm4, %v1642_v11  ;;  %v1539_v23 = vadd.f32 %v8886_v44, %v1464_v4  ;;  %v1538_v24 = vadd.f32 %v8889_v45, %v1365_v5  ;;  %v1470_v25 = vpop.f32.mrb[10].mxu1 }
 0x1f7   :  { %1695 = vst.msk [vmem:[#allocation2 + $0x3] ss:$8 sm:$0x3] %vm8908_vm4, %v1690_v12  ;;  %v1734_v21 = vrot.slane %v1727_v13, %v8902_v16  ;;  %v1782_v22 = vrot.slane %v1775_v14, %v8902_v16  ;;  %v1371_v26 = vpop.f32.mrb[11].mxu0  ;;  %v1836_v1 = vcombine.low %v1828_v6, %v1829_v15  ;;  %v1884_v27 = vcombine.high %v1828_v6, %v1829_v15  ;;  %v1472_v31 = vpop.f32.mrb[11].mxu1  ;;  %v8960_v4 = vld [vmem:[#allocation8] sm:$0xff] }
 0x1f8   :  { %v1595_v28 = vmax.f32 %v1575_v8, %v1587_v17  ;;  %v1560_v30 = vmax.f32 %v1536_v18, 0.0  ;;  %v1561_v34 = vmax.f32 %v1537_v19, 0.0  ;;  %v1563_v35 = vmax.f32 %v1539_v23, 0.0  ;;  %v8962_v5 = vld [vmem:[#allocation8 + $0x20] sm:$0xff]  ;;  %v1938_v17 = vld [vmem:[#allocation8 + $0x10] sm:$0xff]  ;;  %v8968_v19 = vld [vmem:[#allocation8 + $0x48] sm:$0xff] }
 0x1f9   :  { %1753 = vst.msk [vmem:[#allocation2 + $0x4] ss:$8 sm:$0x3] %vm8908_vm4, %v1734_v21  ;;  %v1758_v32 = vcombine.high %v1734_v21, %v1734_v21  ;;  %1801 = vst.msk [vmem:[#allocation2 + $0x6] ss:$8 sm:$0x3] %vm8908_vm4, %v1782_v22  ;;  %v1806_v33 = vcombine.high %v1782_v22, %v1782_v22  ;;  %v1843_v37 = vrot.slane %v1836_v1, %v8902_v16 }
 0x1fa   :  { %v1891_v39 = vrot.slane %v1884_v27, %v8902_v16  ;;  %v1576_v47 = vmax.f32 %v1558_v9, %v1560_v30  ;;  %v1562_v48 = vmax.f32 %v1538_v24, 0.0  ;;  %v1577_v49 = vmax.f32 %v1561_v34, %v1563_v35  ;;  %v1942_v18 = vld [vmem:[#allocation8 + $0x30] sm:$0xff]  ;;  %v1949_v24 = vld [vmem:[#allocation8 + $0x68] sm:$0xff] }
 0x1fb   :  { %1763 = vst.msk [vmem:[#allocation2 + $0x5] ss:$8 sm:$0x3] %vm8908_vm4, %v1758_v32  ;;  %1811 = vst.msk [vmem:[#allocation2 + $0x7] ss:$8 sm:$0x3] %vm8908_vm4, %v1806_v33  ;;  %v1540_v50 = vadd.f32 %v8892_v46, %v1466_v10  ;;  %v1541_v51 = vadd.f32 %v8883_v43, %v1369_v20  ;;  %v1543_v52 = vadd.f32 %v8886_v44, %v1470_v25 }
 0x1fc   :  { %v1850_v36 = vrot.slane %v1843_v37, %v8902_v16  ;;  %v1898_v53 = vrot.slane %v1891_v39, %v8902_v16  ;;  %v1588_v54 = vrot.slane %v1576_v47, 1  ;;  %v1542_v55 = vadd.f32 %v8889_v45, %v1371_v26  ;;  %v1947_v25 = vld [vmem:[#allocation8 + $0x58] sm:$0xff] }
 0x1fd   :  { %v1706_v56 = vrot.slane %v1577_v49, 1  ;;  %v1564_v57 = vmax.f32 %v1540_v50, 0.0  ;;  %v1565_v58 = vmax.f32 %v1541_v51, 0.0  ;;  %v1567_v59 = vmax.f32 %v1543_v52, 0.0  ;;  %v1951_v26 = vld [vmem:[#allocation8 + $0x78] sm:$0xff] }
 0x1fe   :  { %1869 = vst.msk [vmem:[#allocation2 + $0x10] ss:$8 sm:$0x3] %vm8908_vm4, %v1850_v36  ;;  %v1874_v60 = vcombine.high %v1850_v36, %v1850_v36  ;;  %1917 = vst.msk [vmem:[#allocation2 + $0x12] ss:$8 sm:$0x3] %vm8908_vm4, %v1898_v53  ;;  %v1922_v43 = vcombine.high %v1898_v53, %v1898_v53  ;;  %v1596_v44 = vmax.f32 %v1576_v47, %v1588_v54 }
 0x1ff   :  { %v1578_v61 = vmax.f32 %v1562_v48, %v1564_v57  ;;  %v1579_v62 = vmax.f32 %v1565_v58, %v1567_v59  ;;  %v1566_v63 = vmax.f32 %v1542_v55, 0.0  ;;  %v1544_v2 = vadd.f32 %v8892_v46, %v1472_v31  ;;  %v1944_v53 = vld [vmem:[#allocation8 + $0x40] sm:$0xff]  ;;  %v1946_v55 = vld [vmem:[#allocation8 + $0x50] sm:$0xff] }
 0x200   :  { %1879 = vst.msk [vmem:[#allocation2 + $0x11] ss:$8 sm:$0x3] %vm8908_vm4, %v1874_v60  ;;  %1927 = vst.msk [vmem:[#allocation2 + $0x13] ss:$8 sm:$0x3] %vm8908_vm4, %v1922_v43  ;;  %v1616_v45 = vcombine.low %v1595_v28, %v1596_v44  ;;  %v1667_v3 = vcombine.high %v1595_v28, %v1596_v44  ;;  %v1714_v6 = vmax.f32 %v1577_v49, %v1706_v56 }
 0x201   :  { %v1707_v7 = vrot.slane %v1578_v61, 1  ;;  %v1822_v8 = vrot.slane %v1579_v62, 1  ;;  %v1568_v9 = vmax.f32 %v1544_v2, 0.0  ;;  %v7094_v15 = vpack.c.bf16 %v8962_v5, %v8960_v4  ;;  %v1948_v54 = vld [vmem:[#allocation8 + $0x60] sm:$0xff]  ;;  %v1950_v60 = vld [vmem:[#allocation8 + $0x70] sm:$0xff]  ;;  %v1953_v43 = vld [vmem:[#allocation8 + $0x88] sm:$0xff] }
 0x202   :  { %v1623_v10 = vrot.slane %v1616_v45, %v8902_v16  ;;  %v1674_v46 = vrot.slane %v1667_v3, %v8902_v16  ;;  %v2065_v11 = vld [vmem:[#allocation2 + $0x8] sm:$0xfe]  ;;  %v2064_v12 = vld [vmem:[#allocation2] sm:$0xfe]  ;;  %v7158_v49 = vpack.c.bf16 %v1942_v18, %v1938_v17  ;;  %v7096_v52 = vpack.c.bf16 %v1949_v24, %v8968_v19 }
 0x203   :  { %v1715_v13 = vmax.f32 %v1578_v61, %v1707_v7  ;;  %v1580_v14 = vmax.f32 %v1566_v63, %v1568_v9  ;;  %v1830_v22 = vmax.f32 %v1579_v62, %v1822_v8  ;;  %v2084_v23 = vrot.slane %v2065_v11, 1  ;;  %v1957_v44 = vld [vmem:[#allocation8 + $0xa8] sm:$0xff]  ;;  %v1955_v61 = vld [vmem:[#allocation8 + $0x98] sm:$0xff]  ;;  %v1952_v7 = vld [vmem:[#allocation8 + $0x80] sm:$0xff] }
 0x204   :  { %v1630_v20 = vrot.slane %v1623_v10, %v8902_v16  ;;  %v1681_v21 = vrot.slane %v1674_v46, %v8902_v16  ;;  %v2081_v32 = vrot.slane %v2064_v12, 1  ;;  %v7160_v36 = vpack.c.bf16 %v1951_v26, %v1947_v25  ;;  %v1959_v62 = vld [vmem:[#allocation8 + $0xb8] sm:$0xff]  ;;  %v1956_v8 = vld [vmem:[#allocation8 + $0xa0] sm:$0xff]  ;;  %v1954_v11 = vld [vmem:[#allocation8 + $0x90] sm:$0xff] }
 0x205   :  { %v1735_v1 = vcombine.low %v1714_v6, %v1715_v13  ;;  %v1783_v27 = vcombine.high %v1714_v6, %v1715_v13  ;;  %v1823_v28 = vrot.slane %v1580_v14, 1  ;;  %v2067_v30 = vld [vmem:[#allocation2 + $0x18] sm:$0x1]  ;;  %v2066_v31 = vld [vmem:[#allocation2 + $0x10] sm:$0x1]  ;;  %v7098_v4 = vpack.c.bf16 %v1948_v54, %v1944_v53  ;;  %v1967_v17 = vld [vmem:[#allocation8 + $0xf8] sm:$0xff] }
 0x206   :  { %1640 = vst.msk [vmem:[#allocation2 + $0x20] ss:$8 sm:$0x3] %vm8908_vm4, %v1630_v20  ;;  %v1643_v33 = vcombine.high %v1630_v20, %v1630_v20  ;;  %1688 = vst.msk [vmem:[#allocation2 + $0x22] ss:$8 sm:$0x3] %vm8908_vm4, %v1681_v21  ;;  %v1691_v34 = vcombine.high %v1681_v21, %v1681_v21  ;;  %v7162_v5 = vpack.c.bf16 %v1950_v60, %v1946_v55 }
 0x207   :  { %v2085_v35 = vrot.slane %v2067_v30, 1  ;;  %v2082_v37 = vrot.slane %v2066_v31, 1  ;;  %v1742_v39 = vrot.slane %v1735_v1, %v8902_v16  ;;  %v1790_v47 = vrot.slane %v1783_v27, %v8902_v16  ;;  %v1958_v12 = vld [vmem:[#allocation8 + $0xb0] sm:$0xff]  ;;  %v1961_v13 = vld [vmem:[#allocation8 + $0xc8] sm:$0xff]  ;;  %v1960_v21 = vld [vmem:[#allocation8 + $0xc0] sm:$0xff] }
 0x208   :  { %v1831_v48 = vmax.f32 %v1580_v14, %v1823_v28  ;;  %1650 = vst.msk [vmem:[#allocation2 + $0x21] ss:$8 sm:$0x3] %vm8908_vm4, %v1643_v33  ;;  %1698 = vst.msk [vmem:[#allocation2 + $0x23] ss:$8 sm:$0x3] %vm8908_vm4, %v1691_v34  ;;  %v7100_v6 = vpack.c.bf16 %v1957_v44, %v1953_v43  ;;  %v7164_v46 = vpack.c.bf16 %v1959_v62, %v1955_v61 }
 0x209   :  { %v2086_v50 = vsel %vm2080_vm5, %v2084_v23, %v2085_v35  ;;  %v2083_v51 = vsel %vm2080_vm5, %v2081_v32, %v2082_v37  ;;  %v1749_v56 = vrot.slane %v1742_v39, %v8902_v16  ;;  %v1797_v57 = vrot.slane %v1790_v47, %v8902_v16  ;;  %v1965_v14 = vld [vmem:[#allocation8 + $0xe8] sm:$0xff]  ;;  %v1962_v25 = vld [vmem:[#allocation8 + $0xd0] sm:$0xff]  ;;  %v1971_v28 = vld [vmem:[#allocation8 + $0x118] sm:$0xff] }
 0x20a   :  { %v1851_v58 = vcombine.low %v1830_v22, %v1831_v48  ;;  %v1899_v59 = vcombine.high %v1830_v22, %v1831_v48  ;;  %2290 = vmatprep.mubr.f32.mxu0 %v2086_v50  ;;  %2367 = vmatprep.mubr.f32.mxu1 %v2086_v50  ;;  %v7166_v20 = vpack.c.bf16 %v1958_v12, %v1954_v11  ;;  %v1964_v22 = vld [vmem:[#allocation8 + $0xe0] sm:$0xff]  ;;  %v1966_v26 = vld [vmem:[#allocation8 + $0xf0] sm:$0xff]  ;;  %v1969_v1 = vld [vmem:[#allocation8 + $0x108] sm:$0xff] }
 0x20b   :  { %2291 = vmatmul.mubr.f32.vlgmr.msra.gmra.mrb[12].mxu0 %v2083_v51  ;;  %1756 = vst.msk [vmem:[#allocation2 + $0x24] ss:$8 sm:$0x3] %vm8908_vm4, %v1749_v56  ;;  %v1759_v63 = vcombine.high %v1749_v56, %v1749_v56  ;;  %1804 = vst.msk [vmem:[#allocation2 + $0x26] ss:$8 sm:$0x3] %vm8908_vm4, %v1797_v57  ;;  %v1807_v2 = vcombine.high %v1797_v57, %v1797_v57  ;;  %2368 = vmatmul.mubr.f32.vlgmr.msra.gmra.mrb[12].mxu1 %v2083_v51 }
 0x20c   :  { %v1858_v45 = vrot.slane %v1851_v58, %v8902_v16  ;;  %v1906_v3 = vrot.slane %v1899_v59, %v8902_v16  ;;  %7095 = vmatpush1.bf16.msra.mxu0 %v7094_v15  ;;  %7159 = vmatpush1.bf16.msra.mxu1 %v7158_v49  ;;  %v1963_v15 = vld [vmem:[#allocation8 + $0xd8] sm:$0xff]  ;;  %v7104_v23 = vpack.c.bf16 %v1965_v14, %v1961_v13  ;;  %v1973_v27 = vld [vmem:[#allocation8 + $0x128] sm:$0xff]  ;;  %v1968_v31 = vld [vmem:[#allocation8 + $0x100] sm:$0xff] }
 0x20d   :  { %1766 = vst.msk [vmem:[#allocation2 + $0x25] ss:$8 sm:$0x3] %vm8908_vm4, %v1759_v63  ;;  %1814 = vst.msk [vmem:[#allocation2 + $0x27] ss:$8 sm:$0x3] %vm8908_vm4, %v1807_v2  ;;  %7097 = vmatprep.subr.bf16.mxu0 %v7096_v52  ;;  %7161 = vmatprep.subr.bf16.mxu1 %v7160_v36  ;;  %v7168_v24 = vpack.c.bf16 %v1967_v17, %v1963_v15  ;;  %v7106_v34 = vpack.c.bf16 %v1964_v22, %v1960_v21 }
 0x20e   :  { %v1865_v9 = vrot.slane %v1858_v45, %v8902_v16  ;;  %v1913_v10 = vrot.slane %v1906_v3, %v8902_v16  ;;  %v7102_v16 = vpack.c.bf16 %v1956_v8, %v1952_v7  ;;  %v1975_v30 = vld [vmem:[#allocation8 + $0x138] sm:$0xff]  ;;  %v7170_v35 = vpack.c.bf16 %v1966_v26, %v1962_v25  ;;  %v1972_v37 = vld [vmem:[#allocation8 + $0x120] sm:$0xff]  ;;  %v1970_v47 = vld [vmem:[#allocation8 + $0x110] sm:$0xff] }
 0x20f   :  { %v7108_v29 = vpack.c.bf16 %v1973_v27, %v1969_v1  ;;  %v7172_v39 = vpack.c.bf16 %v1975_v30, %v1971_v28  ;;  %v1974_v48 = vld [vmem:[#allocation8 + $0x130] sm:$0xff]  ;;  %v1977_v49 = vld [vmem:[#allocation8 + $0x148] sm:$0xff]  ;;  %v1979_v56 = vld [vmem:[#allocation8 + $0x158] sm:$0xff]  ;;  %v7110_v58 = vpack.c.bf16 %v1972_v37, %v1968_v31 }
 0x210   :  { %1872 = vst.msk [vmem:[#allocation2 + $0x30] ss:$8 sm:$0x3] %vm8908_vm4, %v1865_v9  ;;  %v1875_v18 = vcombine.high %v1865_v9, %v1865_v9  ;;  %1920 = vst.msk [vmem:[#allocation2 + $0x32] ss:$8 sm:$0x3] %vm8908_vm4, %v1913_v10  ;;  %v1923_v19 = vcombine.high %v1913_v10, %v1913_v10  ;;  %7099 = vmatpush1.bf16.msra.mxu0 %v7098_v4  ;;  %7163 = vmatpush1.bf16.msra.mxu1 %v7162_v5 }
 0x211   :  { %7101 = vmatprep.subr.bf16.mxu0 %v7100_v6  ;;  %7165 = vmatprep.subr.bf16.mxu1 %v7164_v46  ;;  %v1981_v52 = vld [vmem:[#allocation8 + $0x168] sm:$0xff]  ;;  %v1983_v57 = vld [vmem:[#allocation8 + $0x178] sm:$0xff]  ;;  %v7174_v43 = vpack.c.bf16 %v1974_v48, %v1970_v47  ;;  %v1976_v44 = vld [vmem:[#allocation8 + $0x140] sm:$0xff] }
 0x212   :  { %1882 = vst.msk [vmem:[#allocation2 + $0x31] ss:$8 sm:$0x3] %vm8908_vm4, %v1875_v18  ;;  %1930 = vst.msk [vmem:[#allocation2 + $0x33] ss:$8 sm:$0x3] %vm8908_vm4, %v1923_v19  ;;  %v7112_v63 = vpack.c.bf16 %v1981_v52, %v1977_v49  ;;  %v7176_v2 = vpack.c.bf16 %v1983_v57, %v1979_v56 }
 0x213   :  { %v1980_v61 = vld [vmem:[#allocation8 + $0x160] sm:$0xff]  ;;  %v1978_v62 = vld [vmem:[#allocation8 + $0x150] sm:$0xff]  ;;  %v1985_v3 = vld [vmem:[#allocation8 + $0x188] sm:$0xff] }
 0x214   :  { %7103 = vmatpush1.bf16.msra.mxu0 %v7102_v16  ;;  %7167 = vmatpush1.bf16.msra.mxu1 %v7166_v20  ;;  %v2069_v32 = vld [vmem:[#allocation2 + $0x28] sm:$0xfe]  ;;  %v2068_v33 = vld [vmem:[#allocation2 + $0x20] sm:$0xfe]  ;;  %v1982_v45 = vld [vmem:[#allocation8 + $0x170] sm:$0xff]  ;;  %v7114_v8 = vpack.c.bf16 %v1980_v61, %v1976_v44 }
 0x215   :  { %7105 = vmatprep.subr.bf16.mxu0 %v7104_v23  ;;  %7169 = vmatprep.subr.bf16.mxu1 %v7168_v24  ;;  %v2090_v36 = vrot.slane %v2069_v32, 1  ;;  %v2087_v54 = vrot.slane %v2068_v33, 1  ;;  %v1989_v4 = vld [vmem:[#allocation8 + $0x1a8] sm:$0xff]  ;;  %v1987_v6 = vld [vmem:[#allocation8 + $0x198] sm:$0xff]  ;;  %v7178_v9 = vpack.c.bf16 %v1982_v45, %v1978_v62  ;;  %v1984_v10 = vld [vmem:[#allocation8 + $0x180] sm:$0xff] }
 0x216   :  { %v1933_v5 = vld [vmem:[#allocation2 + $0x8] sm:$0xff]  ;;  %v1991_v7 = vld [vmem:[#allocation8 + $0x1b8] sm:$0xff]  ;;  %v7116_v11 = vpack.c.bf16 %v1989_v4, %v1985_v3  ;;  %v1986_v13 = vld [vmem:[#allocation8 + $0x190] sm:$0xff] }
 0x217   :  { %v2071_v50 = vld [vmem:[#allocation2 + $0x38] sm:$0x1]  ;;  %v2070_v51 = vld [vmem:[#allocation2 + $0x30] sm:$0x1]  ;;  %v1988_v46 = vld [vmem:[#allocation8 + $0x1a0] sm:$0xff]  ;;  %v7180_v12 = vpack.c.bf16 %v1991_v7, %v1987_v6 }
 0x218   :  { %v2091_v53 = vrot.slane %v2071_v50, 1  ;;  %v2088_v55 = vrot.slane %v2070_v51, 1  ;;  %7107 = vmatpush1.bf16.msra.mxu0 %v7106_v34  ;;  %7171 = vmatpush1.bf16.msra.mxu1 %v7170_v35  ;;  %v1990_v14 = vld [vmem:[#allocation8 + $0x1b0] sm:$0xff]  ;;  %v1993_v15 = vld [vmem:[#allocation8 + $0x1c8] sm:$0xff]  ;;  %v1995_v18 = vld [vmem:[#allocation8 + $0x1d8] sm:$0xff]  ;;  %v7118_v16 = vpack.c.bf16 %v1988_v46, %v1984_v10 }
 0x219   :  { %7109 = vmatprep.subr.bf16.mxu0 %v7108_v29  ;;  %7173 = vmatprep.subr.bf16.mxu1 %v7172_v39  ;;  %v1997_v17 = vld [vmem:[#allocation8 + $0x1e8] sm:$0xff]  ;;  %v1999_v19 = vld [vmem:[#allocation8 + $0x1f8] sm:$0xff]  ;;  %v7182_v20 = vpack.c.bf16 %v1990_v14, %v1986_v13  ;;  %v1992_v21 = vld [vmem:[#allocation8 + $0x1c0] sm:$0xff] }
 0x21a   :  { %v2092_v59 = vsel %vm2080_vm5, %v2090_v36, %v2091_v53  ;;  %v2089_v60 = vsel %vm2080_vm5, %v2087_v54, %v2088_v55  ;;  %v1996_v22 = vld [vmem:[#allocation8 + $0x1e0] sm:$0xff]  ;;  %v7120_v23 = vpack.c.bf16 %v1997_v17, %v1993_v15  ;;  %v7184_v24 = vpack.c.bf16 %v1999_v19, %v1995_v18  ;;  %v1994_v25 = vld [vmem:[#allocation8 + $0x1d0] sm:$0xff]  ;;  %v2001_v1 = vld [vmem:[#allocation8 + $0x208] sm:$0xff] }
 0x21b   :  { %2296 = vmatprep.mubr.f32.mxu0 %v2092_v59  ;;  %2373 = vmatprep.mubr.f32.mxu1 %v2092_v59  ;;  %v1998_v26 = vld [vmem:[#allocation8 + $0x1f0] sm:$0xff]  ;;  %v2005_v27 = vld [vmem:[#allocation8 + $0x228] sm:$0xff]  ;;  %v2003_v28 = vld [vmem:[#allocation8 + $0x218] sm:$0xff]  ;;  %v7122_v31 = vpack.c.bf16 %v1996_v22, %v1992_v21 }
 0x21c   :  { %2297 = vmatmul.mubr.f32.gmra.mrb[14].mxu0 %v2089_v60  ;;  %2374 = vmatmul.mubr.f32.gmra.mrb[14].mxu1 %v2089_v60  ;;  %v2007_v30 = vld [vmem:[#allocation8 + $0x238] sm:$0xff]  ;;  %v7186_v32 = vpack.c.bf16 %v1998_v26, %v1994_v25  ;;  %v2000_v33 = vld [vmem:[#allocation8 + $0x200] sm:$0xff]  ;;  %v7124_v35 = vpack.c.bf16 %v2005_v27, %v2001_v1  ;;  %v2002_v29 = vld [vmem:[#allocation8 + $0x210] sm:$0xff] }
 0x21d   :  { %2444 = vmatprep.mubr.f32.mxu0 %v1933_v5  ;;  %2521 = vmatprep.mubr.f32.mxu1 %v1933_v5  ;;  %v2004_v34 = vld [vmem:[#allocation8 + $0x220] sm:$0xff]  ;;  %v7188_v37 = vpack.c.bf16 %v2007_v30, %v2003_v28  ;;  %v2006_v39 = vld [vmem:[#allocation8 + $0x230] sm:$0xff]  ;;  %v2009_v47 = vld [vmem:[#allocation8 + $0x248] sm:$0xff] }
 0x21e   :  { %7111 = vmatpush1.bf16.msra.mxu0 %v7110_v58  ;;  %7175 = vmatpush1.bf16.msra.mxu1 %v7174_v43  ;;  %v2013_v48 = vld [vmem:[#allocation8 + $0x268] sm:$0xff]  ;;  %v2011_v49 = vld [vmem:[#allocation8 + $0x258] sm:$0xff]  ;;  %v7126_v51 = vpack.c.bf16 %v2004_v34, %v2000_v33  ;;  %v7190_v52 = vpack.c.bf16 %v2006_v39, %v2002_v29  ;;  %v2008_v36 = vld [vmem:[#allocation8 + $0x240] sm:$0xff] }
 0x21f   :  { %7113 = vmatprep.subr.bf16.mxu0 %v7112_v63  ;;  %7177 = vmatprep.subr.bf16.mxu1 %v7176_v2  ;;  %v2015_v50 = vld [vmem:[#allocation8 + $0x278] sm:$0xff]  ;;  %v2012_v53 = vld [vmem:[#allocation8 + $0x260] sm:$0xff]  ;;  %v7128_v54 = vpack.c.bf16 %v2013_v48, %v2009_v47  ;;  %v2010_v56 = vld [vmem:[#allocation8 + $0x250] sm:$0xff] }
 0x220   :  { %v7192_v55 = vpack.c.bf16 %v2015_v50, %v2011_v49  ;;  %v2014_v57 = vld [vmem:[#allocation8 + $0x270] sm:$0xff]  ;;  %v2017_v58 = vld [vmem:[#allocation8 + $0x288] sm:$0xff]  ;;  %v2019_v60 = vld [vmem:[#allocation8 + $0x298] sm:$0xff]  ;;  %v7130_v44 = vpack.c.bf16 %v2012_v53, %v2008_v36 }
 0x221   :  { %v2021_v59 = vld [vmem:[#allocation8 + $0x2a8] sm:$0xff]  ;;  %v2023_v43 = vld [vmem:[#allocation8 + $0x2b8] sm:$0xff]  ;;  %v7194_v61 = vpack.c.bf16 %v2014_v57, %v2010_v56  ;;  %v2016_v62 = vld [vmem:[#allocation8 + $0x280] sm:$0xff] }
 0x222   :  { %7115 = vmatpush1.bf16.msra.mxu0 %v7114_v8  ;;  %7179 = vmatpush1.bf16.msra.mxu1 %v7178_v9  ;;  %v2020_v63 = vld [vmem:[#allocation8 + $0x2a0] sm:$0xff]  ;;  %v7132_v2 = vpack.c.bf16 %v2021_v59, %v2017_v58  ;;  %v7196_v45 = vpack.c.bf16 %v2023_v43, %v2019_v60  ;;  %v2018_v3 = vld [vmem:[#allocation8 + $0x290] sm:$0xff]  ;;  %v2025_v5 = vld [vmem:[#allocation8 + $0x2c8] sm:$0xff] }
 0x223   :  { %7117 = vmatprep.subr.bf16.mxu0 %v7116_v11  ;;  %7181 = vmatprep.subr.bf16.mxu1 %v7180_v12  ;;  %v2022_v4 = vld [vmem:[#allocation8 + $0x2b0] sm:$0xff]  ;;  %v2029_v6 = vld [vmem:[#allocation8 + $0x2e8] sm:$0xff]  ;;  %v2027_v7 = vld [vmem:[#allocation8 + $0x2d8] sm:$0xff]  ;;  %v7134_v9 = vpack.c.bf16 %v2020_v63, %v2016_v62 }
 0x224   :  { %v2031_v8 = vld [vmem:[#allocation8 + $0x2f8] sm:$0xff]  ;;  %v7198_v10 = vpack.c.bf16 %v2022_v4, %v2018_v3  ;;  %v2024_v46 = vld [vmem:[#allocation8 + $0x2c0] sm:$0xff]  ;;  %v7136_v12 = vpack.c.bf16 %v2029_v6, %v2025_v5  ;;  %v2026_v14 = vld [vmem:[#allocation8 + $0x2d0] sm:$0xff] }
 0x225   :  { %v2028_v11 = vld [vmem:[#allocation8 + $0x2e0] sm:$0xff]  ;;  %v7200_v13 = vpack.c.bf16 %v2031_v8, %v2027_v7  ;;  %v2030_v15 = vld [vmem:[#allocation8 + $0x2f0] sm:$0xff]  ;;  %v2033_v17 = vld [vmem:[#allocation8 + $0x308] sm:$0xff] }
 0x226   :  { %7119 = vmatpush1.bf16.msra.mxu0 %v7118_v16  ;;  %7183 = vmatpush1.bf16.msra.mxu1 %v7182_v20  ;;  %v2037_v18 = vld [vmem:[#allocation8 + $0x328] sm:$0xff]  ;;  %v2035_v19 = vld [vmem:[#allocation8 + $0x318] sm:$0xff]  ;;  %v7138_v20 = vpack.c.bf16 %v2028_v11, %v2024_v46  ;;  %v7202_v21 = vpack.c.bf16 %v2030_v15, %v2026_v14  ;;  %v2032_v22 = vld [vmem:[#allocation8 + $0x300] sm:$0xff] }
 0x227   :  { %7121 = vmatprep.subr.bf16.mxu0 %v7120_v23  ;;  %7185 = vmatprep.subr.bf16.mxu1 %v7184_v24  ;;  %v2039_v16 = vld [vmem:[#allocation8 + $0x338] sm:$0xff]  ;;  %v2036_v23 = vld [vmem:[#allocation8 + $0x320] sm:$0xff]  ;;  %v7140_v24 = vpack.c.bf16 %v2037_v18, %v2033_v17  ;;  %v2034_v26 = vld [vmem:[#allocation8 + $0x310] sm:$0xff] }
 0x228   :  { %v7204_v25 = vpack.c.bf16 %v2039_v16, %v2035_v19  ;;  %v2038_v1 = vld [vmem:[#allocation8 + $0x330] sm:$0xff]  ;;  %v2041_v27 = vld [vmem:[#allocation8 + $0x348] sm:$0xff]  ;;  %v2043_v30 = vld [vmem:[#allocation8 + $0x358] sm:$0xff] }
 0x229   :  { %v2045_v28 = vld [vmem:[#allocation8 + $0x368] sm:$0xff]  ;;  %v7206_v33 = vpack.c.bf16 %v2038_v1, %v2034_v26  ;;  %v2040_v34 = vld [vmem:[#allocation8 + $0x340] sm:$0xff]  ;;  %v2042_v39 = vld [vmem:[#allocation8 + $0x350] sm:$0xff] }
 0x22a   :  { %7123 = vmatpush1.bf16.msra.mxu0 %v7122_v31  ;;  %7187 = vmatpush1.bf16.msra.mxu1 %v7186_v32  ;;  %v2047_v31 = vld [vmem:[#allocation8 + $0x378] sm:$0xff]  ;;  %v7142_v32 = vpack.c.bf16 %v2036_v23, %v2032_v22  ;;  %v2046_v47 = vld [vmem:[#allocation8 + $0x370] sm:$0xff]  ;;  %v2049_v48 = vld [vmem:[#allocation8 + $0x388] sm:$0xff] }
 0x22b   :  { %7125 = vmatprep.subr.bf16.mxu0 %v7124_v35  ;;  %7189 = vmatprep.subr.bf16.mxu1 %v7188_v37  ;;  %v2044_v35 = vld [vmem:[#allocation8 + $0x360] sm:$0xff]  ;;  %v7144_v37 = vpack.c.bf16 %v2045_v28, %v2041_v27  ;;  %v7208_v29 = vpack.c.bf16 %v2047_v31, %v2043_v30  ;;  %v2053_v49 = vld [vmem:[#allocation8 + $0x3a8] sm:$0xff]  ;;  %v2051_v50 = vld [vmem:[#allocation8 + $0x398] sm:$0xff]  ;;  %v7210_v36 = vpack.c.bf16 %v2046_v47, %v2042_v39 }
 0x22c   :  { %v2048_v53 = vld [vmem:[#allocation8 + $0x380] sm:$0xff]  ;;  %v2050_v57 = vld [vmem:[#allocation8 + $0x390] sm:$0xff]  ;;  %v2057_v59 = vld [vmem:[#allocation8 + $0x3c8] sm:$0xff] }
 0x22d   :  { %v2054_v58 = vld [vmem:[#allocation8 + $0x3b0] sm:$0xff]  ;;  %v2061_v60 = vld [vmem:[#allocation8 + $0x3e8] sm:$0xff]  ;;  %v2059_v43 = vld [vmem:[#allocation8 + $0x3d8] sm:$0xff] }
 0x22e   :  { %7127 = vmatpush1.bf16.msra.mxu0 %v7126_v51  ;;  %7191 = vmatpush1.bf16.msra.mxu1 %v7190_v52  ;;  %v2055_v51 = vld [vmem:[#allocation8 + $0x3b8] sm:$0xff]  ;;  %v7146_v52 = vpack.c.bf16 %v2044_v35, %v2040_v34  ;;  %v7214_v62 = vpack.c.bf16 %v2054_v58, %v2050_v57  ;;  %v2056_v63 = vld [vmem:[#allocation8 + $0x3c0] sm:$0xff]  ;;  %v2058_v4 = vld [vmem:[#allocation8 + $0x3d0] sm:$0xff] }
 0x22f   :  { %7129 = vmatprep.subr.bf16.mxu0 %v7128_v54  ;;  %7193 = vmatprep.subr.bf16.mxu1 %v7192_v55  ;;  %v2052_v54 = vld [vmem:[#allocation8 + $0x3a0] sm:$0xff]  ;;  %v7148_v55 = vpack.c.bf16 %v2053_v49, %v2049_v48  ;;  %v7212_v56 = vpack.c.bf16 %v2055_v51, %v2051_v50  ;;  %v2062_v5 = vld [vmem:[#allocation8 + $0x3f0] sm:$0xff]  ;;  %v2569_v6 = vld [vmem:[#allocation8 + $0x808] sm:$0xff] }
 0x230   :  { %v2573_v7 = vld [vmem:[#allocation8 + $0x828] sm:$0xff]  ;;  %v2571_v8 = vld [vmem:[#allocation8 + $0x818] sm:$0xff]  ;;  %v7218_v46 = vpack.c.bf16 %v2062_v5, %v2058_v4  ;;  %v2572_v14 = vld [vmem:[#allocation8 + $0x820] sm:$0xff] }
 0x231   :  { %v7220_v11 = vpack.c.bf16 %v2573_v7, %v2569_v6  ;;  %v2570_v15 = vld [vmem:[#allocation8 + $0x810] sm:$0xff]  ;;  %v2577_v18 = vld [vmem:[#allocation8 + $0x848] sm:$0xff]  ;;  %v2579_v16 = vld [vmem:[#allocation8 + $0x858] sm:$0xff] }
 0x232   :  { %7131 = vmatpush1.bf16.msra.mxu0 %v7130_v44  ;;  %7195 = vmatpush1.bf16.msra.mxu1 %v7194_v61  ;;  %v2063_v44 = vld [vmem:[#allocation8 + $0x3f8] sm:$0xff]  ;;  %v7150_v61 = vpack.c.bf16 %v2052_v54, %v2048_v53  ;;  %v2574_v17 = vld [vmem:[#allocation8 + $0x830] sm:$0xff]  ;;  %v2581_v19 = vld [vmem:[#allocation8 + $0x868] sm:$0xff] }
 0x233   :  { %7133 = vmatprep.subr.bf16.mxu0 %v7132_v2  ;;  %7197 = vmatprep.subr.bf16.mxu1 %v7196_v45  ;;  %v2060_v2 = vld [vmem:[#allocation8 + $0x3e0] sm:$0xff]  ;;  %v7152_v45 = vpack.c.bf16 %v2061_v60, %v2057_v59  ;;  %v7216_v3 = vpack.c.bf16 %v2063_v44, %v2059_v43  ;;  %v2537_v23 = vld [vmem:[#allocation2 + $0x18] sm:$0x3]  ;;  %v2585_v27 = vld [vmem:[#allocation8 + $0x888] sm:$0xff]  ;;  %v7224_v30 = vpack.c.bf16 %v2581_v19, %v2577_v18 }
 0x234   :  { %v2580_v22 = vld [vmem:[#allocation8 + $0x860] sm:$0xff]  ;;  %v2578_v26 = vld [vmem:[#allocation8 + $0x850] sm:$0xff]  ;;  %v2555_v35 = vrot.slane %v2537_v23, 2  ;;  %v2597_v57 = vld [vmem:[#allocation8 + $0x8e8] sm:$0xff] }
 0x235   :  { %v2582_v1 = vld [vmem:[#allocation8 + $0x870] sm:$0xff]  ;;  %v1932_v28 = vld [vmem:[#allocation2] sm:$0xff]  ;;  %v1935_v34 = vld [vmem:[#allocation2 + $0x28] sm:$0xff] }
 0x236   :  { %7135 = vmatpush1.bf16.msra.mxu0 %v7134_v9  ;;  %7199 = vmatpush1.bf16.msra.mxu1 %v7198_v10  ;;  %v2575_v9 = vld [vmem:[#allocation8 + $0x838] sm:$0xff]  ;;  %v7154_v10 = vpack.c.bf16 %v2060_v2, %v2056_v63  ;;  %v7290_v48 = vpack.c.bf16 %v2582_v1, %v2578_v26  ;;  %v2584_v49 = vld [vmem:[#allocation8 + $0x880] sm:$0xff]  ;;  %v2586_v51 = vld [vmem:[#allocation8 + $0x890] sm:$0xff] }
 0x237   :  { %7137 = vmatprep.subr.bf16.mxu0 %v7136_v12  ;;  %7201 = vmatprep.subr.bf16.mxu1 %v7200_v13  ;;  %v7284_v12 = vpack.c.bf16 %v2575_v9, %v2571_v8  ;;  %v2568_v13 = vld [vmem:[#allocation8 + $0x800] sm:$0xff]  ;;  %v2590_v54 = vld [vmem:[#allocation8 + $0x8b0] sm:$0xff]  ;;  %v2595_v58 = vld [vmem:[#allocation8 + $0x8d8] sm:$0xff] }
 0x238   :  { %v2588_v50 = vld [vmem:[#allocation8 + $0x8a0] sm:$0xff]  ;;  %v2599_v59 = vld [vmem:[#allocation8 + $0x8f8] sm:$0xff]  ;;  %v7294_v43 = vpack.c.bf16 %v2590_v54, %v2586_v51  ;;  %v2594_v2 = vld [vmem:[#allocation8 + $0x8d0] sm:$0xff] }
 0x239   :  { %v7230_v60 = vpack.c.bf16 %v2588_v50, %v2584_v49  ;;  %v2592_v44 = vld [vmem:[#allocation8 + $0x8c0] sm:$0xff]  ;;  %v7296_v63 = vpack.c.bf16 %v2599_v59, %v2595_v58  ;;  %v2605_v4 = vld [vmem:[#allocation8 + $0x928] sm:$0xff]  ;;  %v2603_v5 = vld [vmem:[#allocation8 + $0x918] sm:$0xff] }
 0x23a   :  { %7139 = vmatpush1.bf16.msra.mxu0 %v7138_v20  ;;  %7203 = vmatpush1.bf16.msra.mxu1 %v7202_v21  ;;  %v2583_v20 = vld [vmem:[#allocation8 + $0x878] sm:$0xff]  ;;  %v2576_v21 = vld [vmem:[#allocation8 + $0x840] sm:$0xff]  ;;  %v2617_v26 = vld [vmem:[#allocation8 + $0x988] sm:$0xff] }
 0x23b   :  { %7141 = vmatprep.subr.bf16.mxu0 %v7140_v24  ;;  %7205 = vmatprep.subr.bf16.mxu1 %v7204_v25  ;;  %v7222_v24 = vpack.c.bf16 %v2572_v14, %v2568_v13  ;;  %v7286_v25 = vpack.c.bf16 %v2574_v17, %v2570_v15  ;;  %v7288_v31 = vpack.c.bf16 %v2583_v20, %v2579_v16  ;;  %v2607_v6 = vld [vmem:[#allocation8 + $0x938] sm:$0xff]  ;;  %v2600_v9 = vld [vmem:[#allocation8 + $0x900] sm:$0xff]  ;;  %v2606_v13 = vld [vmem:[#allocation8 + $0x930] sm:$0xff] }
 0x23c   :  { %v7226_v39 = vpack.c.bf16 %v2580_v22, %v2576_v21  ;;  %v2609_v14 = vld [vmem:[#allocation8 + $0x948] sm:$0xff]  ;;  %v2611_v17 = vld [vmem:[#allocation8 + $0x958] sm:$0xff]  ;;  %v2608_v20 = vld [vmem:[#allocation8 + $0x940] sm:$0xff] }
 0x23d   :  { %v2613_v15 = vld [vmem:[#allocation8 + $0x968] sm:$0xff]  ;;  %v2615_v18 = vld [vmem:[#allocation8 + $0x978] sm:$0xff]  ;;  %v2612_v21 = vld [vmem:[#allocation8 + $0x960] sm:$0xff] }
 0x23e   :  { %7143 = vmatpush1.bf16.msra.mxu0 %v7142_v32  ;;  %7207 = vmatpush1.bf16.msra.mxu1 %v7206_v33  ;;  %v2535_v32 = vld [vmem:[#allocation2 + $0x8] sm:$0xfc]  ;;  %v7240_v22 = vpack.c.bf16 %v2613_v15, %v2609_v14  ;;  %v7304_v23 = vpack.c.bf16 %v2615_v18, %v2611_v17  ;;  %v2631_v49 = vld [vmem:[#allocation8 + $0x9f8] sm:$0xff]  ;;  %v2646_v14 = vld [vmem:[#allocation8 + $0xa70] sm:$0xff] }
 0x23f   :  { %7145 = vmatprep.subr.bf16.mxu0 %v7144_v37  ;;  %7209 = vmatprep.subr.bf16.mxu1 %v7208_v29  ;;  %v2589_v33 = vld [vmem:[#allocation8 + $0x8a8] sm:$0xff]  ;;  %v2587_v37 = vld [vmem:[#allocation8 + $0x898] sm:$0xff]  ;;  %v2554_v47 = vrot.slane %v2535_v32, 2  ;;  %v2616_v32 = vld [vmem:[#allocation8 + $0x980] sm:$0xff] }
 0x240   :  { %v2591_v29 = vld [vmem:[#allocation8 + $0x8b8] sm:$0xff]  ;;  %v2621_v1 = vld [vmem:[#allocation8 + $0x9a8] sm:$0xff] }
 0x241   :  { %v7292_v53 = vpack.c.bf16 %v2591_v29, %v2587_v37  ;;  %v2618_v37 = vld [vmem:[#allocation8 + $0x990] sm:$0xff]  ;;  %v2637_v58 = vld [vmem:[#allocation8 + $0xa28] sm:$0xff]  ;;  %v2635_v59 = vld [vmem:[#allocation8 + $0xa18] sm:$0xff] }
 0x242   :  { %7147 = vmatpush1.bf16.msra.mxu0 %v7146_v52  ;;  %7211 = vmatpush1.bf16.msra.mxu1 %v7210_v36  ;;  %v1934_v52 = vld [vmem:[#allocation2 + $0x20] sm:$0xff]  ;;  %v7228_v36 = vpack.c.bf16 %v2589_v33, %v2585_v27  ;;  %v2622_v29 = vld [vmem:[#allocation8 + $0x9b0] sm:$0xff]  ;;  %v2649_v15 = vld [vmem:[#allocation8 + $0xa88] sm:$0xff] }
 0x243   :  { %7149 = vmatprep.subr.bf16.mxu0 %v7148_v55  ;;  %7213 = vmatprep.subr.bf16.mxu1 %v7212_v56  ;;  %v2593_v55 = vld [vmem:[#allocation8 + $0x8c8] sm:$0xff]  ;;  %v2556_v56 = vsel %vm2550_vm6, %v2554_v47, %v2555_v35  ;;  %v2619_v27 = vld [vmem:[#allocation8 + $0x998] sm:$0xff]  ;;  %v2620_v33 = vld [vmem:[#allocation8 + $0x9a0] sm:$0xff]  ;;  %v7310_v51 = vpack.c.bf16 %v2622_v29, %v2618_v37 }
 0x244   :  { %v2629_v47 = vld [vmem:[#allocation8 + $0x9e8] sm:$0xff]  ;;  %v7246_v50 = vpack.c.bf16 %v2620_v33, %v2616_v32  ;;  %v2651_v18 = vld [vmem:[#allocation8 + $0xa98] sm:$0xff]  ;;  %v2656_v33 = vld [vmem:[#allocation8 + $0xac0] sm:$0xff] }
 0x245   :  { %v2653_v17 = vld [vmem:[#allocation8 + $0xaa8] sm:$0xff]  ;;  %v2658_v29 = vld [vmem:[#allocation8 + $0xad0] sm:$0xff] }
 0x246   :  { %7151 = vmatpush1.bf16.msra.mxu0 %v7150_v61  ;;  %7215 = vmatpush1.bf16.msra.mxu1 %v7214_v62  ;;  %v2596_v61 = vld [vmem:[#allocation8 + $0x8e0] sm:$0xff]  ;;  %v7232_v62 = vpack.c.bf16 %v2597_v57, %v2593_v55  ;;  %v2626_v55 = vld [vmem:[#allocation8 + $0x9d0] sm:$0xff]  ;;  %v2633_v57 = vld [vmem:[#allocation8 + $0xa08] sm:$0xff] }
 0x247   :  { %7153 = vmatprep.subr.bf16.mxu0 %v7152_v45  ;;  %7217 = vmatprep.subr.bf16.mxu1 %v7216_v3  ;;  %v2598_v45 = vld [vmem:[#allocation8 + $0x8f0] sm:$0xff]  ;;  %v2601_v3 = vld [vmem:[#allocation8 + $0x908] sm:$0xff]  ;;  %v7234_v7 = vpack.c.bf16 %v2596_v61, %v2592_v44  ;;  %v2632_v61 = vld [vmem:[#allocation8 + $0xa00] sm:$0xff] }
 0x248   :  { %v7298_v8 = vpack.c.bf16 %v2598_v45, %v2594_v2  ;;  %v2634_v45 = vld [vmem:[#allocation8 + $0xa10] sm:$0xff] }
 0x24a   :  { %7155 = vmatpush1.bf16.msra.mxu0 %v7154_v10  ;;  %7219 = vmatpush1.bf16.msra.mxu1 %v7218_v46  ;;  %v2604_v10 = vld [vmem:[#allocation8 + $0x920] sm:$0xff]  ;;  %v7236_v46 = vpack.c.bf16 %v2605_v4, %v2601_v3  ;;  %v2638_v3 = vld [vmem:[#allocation8 + $0xa30] sm:$0xff]  ;;  %v2641_v4 = vld [vmem:[#allocation8 + $0xa48] sm:$0xff] }
 0x24b   :  { %7221 = vmatprep.subr.bf16.mxu0 %v7220_v11  ;;  %7285 = vmatprep.subr.bf16.mxu1 %v7284_v12  ;;  %v7300_v11 = vpack.c.bf16 %v2607_v6, %v2603_v5  ;;  %v2602_v12 = vld [vmem:[#allocation8 + $0x910] sm:$0xff]  ;;  %v7238_v19 = vpack.c.bf16 %v2604_v10, %v2600_v9  ;;  %v2645_v5 = vld [vmem:[#allocation8 + $0xa68] sm:$0xff]  ;;  %v2643_v6 = vld [vmem:[#allocation8 + $0xa58] sm:$0xff]  ;;  %v7318_v9 = vpack.c.bf16 %v2638_v3, %v2634_v45 }
 0x24c   :  { %v7302_v16 = vpack.c.bf16 %v2606_v13, %v2602_v12  ;;  %v2640_v10 = vld [vmem:[#allocation8 + $0xa40] sm:$0xff]  ;;  %v2642_v13 = vld [vmem:[#allocation8 + $0xa50] sm:$0xff] }
 0x24d   :  { %2445 = vmatmul.mubr.f32.vlgmr.msra.gmra.mrb[12].mxu0 %v1932_v28  ;;  %2522 = vmatmul.mubr.f32.vlgmr.msra.gmra.mrb[12].mxu1 %v1932_v28  ;;  %v2623_v28 = vld [vmem:[#allocation8 + $0x9b8] sm:$0xff]  ;;  %v2674_v3 = vld [vmem:[#allocation8 + $0xb50] sm:$0xff] }
 0x24e   :  { %2450 = vmatprep.mubr.f32.mxu0 %v1935_v34  ;;  %2527 = vmatprep.mubr.f32.mxu1 %v1935_v34  ;;  %v7244_v34 = vpack.c.bf16 %v2621_v1, %v2617_v26  ;;  %v7308_v35 = vpack.c.bf16 %v2623_v28, %v2619_v27  ;;  %v2654_v26 = vld [vmem:[#allocation8 + $0xab0] sm:$0xff]  ;;  %v2657_v1 = vld [vmem:[#allocation8 + $0xac8] sm:$0xff]  ;;  %v2659_v28 = vld [vmem:[#allocation8 + $0xad8] sm:$0xff] }
 0x24f   :  { %7223 = vmatpush1.bf16.msra.mxu0 %v7222_v24  ;;  %7287 = vmatpush1.bf16.msra.mxu1 %v7286_v25  ;;  %v2610_v24 = vld [vmem:[#allocation8 + $0x950] sm:$0xff]  ;;  %v2661_v27 = vld [vmem:[#allocation8 + $0xae8] sm:$0xff] }
 0x250   :  { %7225 = vmatprep.subr.bf16.mxu0 %v7224_v30  ;;  %7289 = vmatprep.subr.bf16.mxu1 %v7288_v31  ;;  %v2614_v25 = vld [vmem:[#allocation8 + $0x970] sm:$0xff]  ;;  %v7242_v30 = vpack.c.bf16 %v2612_v21, %v2608_v20  ;;  %v7322_v20 = vpack.c.bf16 %v2646_v14, %v2642_v13  ;;  %v2648_v21 = vld [vmem:[#allocation8 + $0xa80] sm:$0xff] }
 0x251   :  { %2451 = vmatmul.mubr.f32.gmra.mrb[14].mxu0 %v1934_v52  ;;  %2528 = vmatmul.mubr.f32.gmra.mrb[14].mxu1 %v1934_v52  ;;  %v7306_v31 = vpack.c.bf16 %v2614_v25, %v2610_v24  ;;  %v2624_v52 = vld [vmem:[#allocation8 + $0x9c0] sm:$0xff]  ;;  %v2650_v25 = vld [vmem:[#allocation8 + $0xa90] sm:$0xff] }
 0x252   :  { %2760 = vmatprep.mubr.f32.mxu0 %v2556_v56  ;;  %2837 = vmatprep.mubr.f32.mxu1 %v2556_v56  ;;  %v2630_v56 = vld [vmem:[#allocation8 + $0x9f0] sm:$0xff]  ;;  %v7326_v32 = vpack.c.bf16 %v2654_v26, %v2650_v25 }
 0x253   :  { %7227 = vmatpush1.bf16.msra.mxu0 %v7226_v39  ;;  %7291 = vmatpush1.bf16.msra.mxu1 %v7290_v48  ;;  %v2625_v39 = vld [vmem:[#allocation8 + $0x9c8] sm:$0xff]  ;;  %v2627_v48 = vld [vmem:[#allocation8 + $0x9d8] sm:$0xff]  ;;  %v7314_v44 = vpack.c.bf16 %v2630_v56, %v2626_v55  ;;  %v2666_v56 = vld [vmem:[#allocation8 + $0xb10] sm:$0xff] }
 0x254   :  { %7229 = vmatprep.subr.bf16.mxu0 %v7228_v36  ;;  %7293 = vmatprep.subr.bf16.mxu1 %v7292_v53  ;;  %v2628_v36 = vld [vmem:[#allocation8 + $0x9e0] sm:$0xff]  ;;  %v7248_v53 = vpack.c.bf16 %v2629_v47, %v2625_v39  ;;  %v7312_v54 = vpack.c.bf16 %v2631_v49, %v2627_v48  ;;  %v2662_v39 = vld [vmem:[#allocation8 + $0xaf0] sm:$0xff]  ;;  %v2665_v47 = vld [vmem:[#allocation8 + $0xb08] sm:$0xff] }
 0x255   :  { %v2669_v48 = vld [vmem:[#allocation8 + $0xb28] sm:$0xff]  ;;  %v2667_v49 = vld [vmem:[#allocation8 + $0xb18] sm:$0xff]  ;;  %v2682_v14 = vld [vmem:[#allocation8 + $0xb90] sm:$0xff] }
 0x256   :  { %v2690_v26 = vld [vmem:[#allocation8 + $0xbd0] sm:$0xff] }
 0x257   :  { %7231 = vmatpush1.bf16.msra.mxu0 %v7230_v60  ;;  %7295 = vmatpush1.bf16.msra.mxu1 %v7294_v43  ;;  %v2639_v60 = vld [vmem:[#allocation8 + $0xa38] sm:$0xff]  ;;  %v7250_v43 = vpack.c.bf16 %v2628_v36, %v2624_v52  ;;  %v7330_v52 = vpack.c.bf16 %v2662_v39, %v2658_v29  ;;  %v2664_v36 = vld [vmem:[#allocation8 + $0xb00] sm:$0xff] }
 0x258   :  { %7233 = vmatprep.subr.bf16.mxu0 %v7232_v62  ;;  %7297 = vmatprep.subr.bf16.mxu1 %v7296_v63  ;;  %v2636_v62 = vld [vmem:[#allocation8 + $0xa20] sm:$0xff]  ;;  %v7252_v63 = vpack.c.bf16 %v2637_v58, %v2633_v57  ;;  %v7316_v2 = vpack.c.bf16 %v2639_v60, %v2635_v59  ;;  %v2670_v57 = vld [vmem:[#allocation8 + $0xb30] sm:$0xff]  ;;  %v2673_v58 = vld [vmem:[#allocation8 + $0xb48] sm:$0xff] }
 0x259   :  { %v2677_v59 = vld [vmem:[#allocation8 + $0xb68] sm:$0xff]  ;;  %v2675_v60 = vld [vmem:[#allocation8 + $0xb58] sm:$0xff]  ;;  %v2892_v29 = vld [vmem:[#allocation8 + $0xc00] sm:$0xff] }
 0x25b   :  { %7235 = vmatpush1.bf16.msra.mxu0 %v7234_v7  ;;  %7299 = vmatpush1.bf16.msra.mxu1 %v7298_v8  ;;  %v2647_v7 = vld [vmem:[#allocation8 + $0xa78] sm:$0xff]  ;;  %v7254_v8 = vpack.c.bf16 %v2636_v62, %v2632_v61  ;;  %v7334_v61 = vpack.c.bf16 %v2670_v57, %v2666_v56  ;;  %v2672_v62 = vld [vmem:[#allocation8 + $0xb40] sm:$0xff] }
 0x25c   :  { %7237 = vmatprep.subr.bf16.mxu0 %v7236_v46  ;;  %7301 = vmatprep.subr.bf16.mxu1 %v7300_v11  ;;  %v2644_v46 = vld [vmem:[#allocation8 + $0xa60] sm:$0xff]  ;;  %v7256_v11 = vpack.c.bf16 %v2645_v5, %v2641_v4  ;;  %v7320_v12 = vpack.c.bf16 %v2647_v7, %v2643_v6  ;;  %v2678_v4 = vld [vmem:[#allocation8 + $0xb70] sm:$0xff]  ;;  %v2681_v5 = vld [vmem:[#allocation8 + $0xb88] sm:$0xff] }
 0x25d   :  { %v2685_v6 = vld [vmem:[#allocation8 + $0xba8] sm:$0xff]  ;;  %v2683_v7 = vld [vmem:[#allocation8 + $0xb98] sm:$0xff] }
 0x25e   :  { %v2903_v56 = vld [vmem:[#allocation8 + $0xc58] sm:$0xff] }
 0x25f   :  { %7239 = vmatpush1.bf16.msra.mxu0 %v7238_v19  ;;  %7303 = vmatpush1.bf16.msra.mxu1 %v7302_v16  ;;  %v2655_v19 = vld [vmem:[#allocation8 + $0xab8] sm:$0xff]  ;;  %v7258_v16 = vpack.c.bf16 %v2644_v46, %v2640_v10  ;;  %v7338_v10 = vpack.c.bf16 %v2678_v4, %v2674_v3  ;;  %v2680_v46 = vld [vmem:[#allocation8 + $0xb80] sm:$0xff] }
 0x260   :  { %7241 = vmatprep.subr.bf16.mxu0 %v7240_v22  ;;  %7305 = vmatprep.subr.bf16.mxu1 %v7304_v23  ;;  %v2652_v22 = vld [vmem:[#allocation8 + $0xaa0] sm:$0xff]  ;;  %v7260_v23 = vpack.c.bf16 %v2653_v17, %v2649_v15  ;;  %v7324_v24 = vpack.c.bf16 %v2655_v19, %v2651_v18  ;;  %v2686_v15 = vld [vmem:[#allocation8 + $0xbb0] sm:$0xff]  ;;  %v2689_v17 = vld [vmem:[#allocation8 + $0xbc8] sm:$0xff] }
 0x261   :  { %v2693_v18 = vld [vmem:[#allocation8 + $0xbe8] sm:$0xff]  ;;  %v2691_v19 = vld [vmem:[#allocation8 + $0xbd8] sm:$0xff] }
 0x262   :  { %v2907_v57 = vld [vmem:[#allocation8 + $0xc78] sm:$0xff] }
 0x263   :  { %7243 = vmatpush1.bf16.msra.mxu0 %v7242_v30  ;;  %7307 = vmatpush1.bf16.msra.mxu1 %v7306_v31  ;;  %v2663_v30 = vld [vmem:[#allocation8 + $0xaf8] sm:$0xff]  ;;  %v7262_v31 = vpack.c.bf16 %v2652_v22, %v2648_v21  ;;  %v7342_v21 = vpack.c.bf16 %v2686_v15, %v2682_v14  ;;  %v2688_v22 = vld [vmem:[#allocation8 + $0xbc0] sm:$0xff] }
 0x264   :  { %7245 = vmatprep.subr.bf16.mxu0 %v7244_v34  ;;  %7309 = vmatprep.subr.bf16.mxu1 %v7308_v35  ;;  %v2660_v34 = vld [vmem:[#allocation8 + $0xae0] sm:$0xff]  ;;  %v7264_v35 = vpack.c.bf16 %v2661_v27, %v2657_v1  ;;  %v7328_v37 = vpack.c.bf16 %v2663_v30, %v2659_v28  ;;  %v2694_v1 = vld [vmem:[#allocation8 + $0xbf0] sm:$0xff]  ;;  %v2893_v27 = vld [vmem:[#allocation8 + $0xc08] sm:$0xff] }
 0x265   :  { %v2897_v28 = vld [vmem:[#allocation8 + $0xc28] sm:$0xff]  ;;  %v2895_v30 = vld [vmem:[#allocation8 + $0xc18] sm:$0xff] }
 0x266   :  { %v7348_v39 = vpack.c.bf16 %v2897_v28, %v2893_v27  ;;  %v2923_v27 = vld [vmem:[#allocation8 + $0xcf8] sm:$0xff] }
 0x267   :  { %7247 = vmatpush1.bf16.msra.mxu0 %v7246_v50  ;;  %7311 = vmatpush1.bf16.msra.mxu1 %v7310_v51  ;;  %v2671_v50 = vld [vmem:[#allocation8 + $0xb38] sm:$0xff]  ;;  %v7266_v51 = vpack.c.bf16 %v2660_v34, %v2656_v33  ;;  %v7346_v34 = vpack.c.bf16 %v2694_v1, %v2690_v26  ;;  %v2921_v26 = vld [vmem:[#allocation8 + $0xce8] sm:$0xff] }
 0x268   :  { %7249 = vmatprep.subr.bf16.mxu0 %v7248_v53  ;;  %7313 = vmatprep.subr.bf16.mxu1 %v7312_v54  ;;  %v2668_v53 = vld [vmem:[#allocation8 + $0xb20] sm:$0xff]  ;;  %v7268_v54 = vpack.c.bf16 %v2669_v48, %v2665_v47  ;;  %v7332_v55 = vpack.c.bf16 %v2671_v50, %v2667_v49  ;;  %v2894_v49 = vld [vmem:[#allocation8 + $0xc10] sm:$0xff]  ;;  %v2919_v1 = vld [vmem:[#allocation8 + $0xcd8] sm:$0xff] }
 0x269   :  { %v2896_v48 = vld [vmem:[#allocation8 + $0xc20] sm:$0xff]  ;;  %v2898_v50 = vld [vmem:[#allocation8 + $0xc30] sm:$0xff] }
 0x26b   :  { %7251 = vmatpush1.bf16.msra.mxu0 %v7250_v43  ;;  %7315 = vmatpush1.bf16.msra.mxu1 %v7314_v44  ;;  %v2679_v43 = vld [vmem:[#allocation8 + $0xb78] sm:$0xff]  ;;  %v7270_v44 = vpack.c.bf16 %v2668_v53, %v2664_v36  ;;  %v2901_v36 = vld [vmem:[#allocation8 + $0xc48] sm:$0xff] }
 0x26c   :  { %7253 = vmatprep.subr.bf16.mxu0 %v7252_v63  ;;  %7317 = vmatprep.subr.bf16.mxu1 %v7316_v2  ;;  %v2676_v63 = vld [vmem:[#allocation8 + $0xb60] sm:$0xff]  ;;  %v7272_v2 = vpack.c.bf16 %v2677_v59, %v2673_v58  ;;  %v7336_v45 = vpack.c.bf16 %v2679_v43, %v2675_v60  ;;  %v2905_v53 = vld [vmem:[#allocation8 + $0xc68] sm:$0xff]  ;;  %v2861_v60 = vld [vmem:[#allocation2 + $0x18] sm:$0x7] }
 0x26d   :  { %v2859_v59 = vld [vmem:[#allocation2 + $0x8] sm:$0xf8]  ;;  %v7352_v4 = vpack.c.bf16 %v2905_v53, %v2901_v36 }
 0x26e   :  { %v2878_v15 = vrot.slane %v2859_v59, 3  ;;  %v2939_v59 = vld [vmem:[#allocation8 + $0xd78] sm:$0xff] }
 0x26f   :  { %7255 = vmatpush1.bf16.msra.mxu0 %v7254_v8  ;;  %7319 = vmatpush1.bf16.msra.mxu1 %v7318_v9  ;;  %v2687_v8 = vld [vmem:[#allocation8 + $0xbb8] sm:$0xff]  ;;  %v7274_v9 = vpack.c.bf16 %v2676_v63, %v2672_v62  ;;  %v2900_v63 = vld [vmem:[#allocation8 + $0xc40] sm:$0xff] }
 0x270   :  { %7257 = vmatprep.subr.bf16.mxu0 %v7256_v11  ;;  %7321 = vmatprep.subr.bf16.mxu1 %v7320_v12  ;;  %v2684_v11 = vld [vmem:[#allocation8 + $0xba0] sm:$0xff]  ;;  %v7276_v12 = vpack.c.bf16 %v2685_v6, %v2681_v5  ;;  %v7340_v13 = vpack.c.bf16 %v2687_v8, %v2683_v7  ;;  %v7416_v5 = vpack.c.bf16 %v2907_v57, %v2903_v56  ;;  %v2902_v6 = vld [vmem:[#allocation8 + $0xc50] sm:$0xff]  ;;  %v2909_v8 = vld [vmem:[#allocation8 + $0xc88] sm:$0xff] }
 0x271   :  { %v2538_v62 = vld [vmem:[#allocation2 + $0x20] sm:$0xfc]  ;;  %v2906_v7 = vld [vmem:[#allocation8 + $0xc70] sm:$0xff]  ;;  %v2933_v56 = vld [vmem:[#allocation8 + $0xd48] sm:$0xff] }
 0x272   :  { %v2937_v57 = vld [vmem:[#allocation8 + $0xd68] sm:$0xff] }
 0x273   :  { %7259 = vmatpush1.bf16.msra.mxu0 %v7258_v16  ;;  %7323 = vmatpush1.bf16.msra.mxu1 %v7322_v20  ;;  %v2695_v16 = vld [vmem:[#allocation8 + $0xbf8] sm:$0xff]  ;;  %v7278_v20 = vpack.c.bf16 %v2684_v11, %v2680_v46  ;;  %v2913_v46 = vld [vmem:[#allocation8 + $0xca8] sm:$0xff] }
 0x274   :  { %7261 = vmatprep.subr.bf16.mxu0 %v7260_v23  ;;  %7325 = vmatprep.subr.bf16.mxu1 %v7324_v24  ;;  %v2692_v23 = vld [vmem:[#allocation8 + $0xbe0] sm:$0xff]  ;;  %v7280_v24 = vpack.c.bf16 %v2693_v18, %v2689_v17  ;;  %v7344_v25 = vpack.c.bf16 %v2695_v16, %v2691_v19  ;;  %v2911_v11 = vld [vmem:[#allocation8 + $0xc98] sm:$0xff]  ;;  %v7418_v17 = vpack.c.bf16 %v2906_v7, %v2902_v6 }
 0x275   :  { %v7282_v33 = vpack.c.bf16 %v2692_v23, %v2688_v22  ;;  %v2908_v18 = vld [vmem:[#allocation8 + $0xc80] sm:$0xff]  ;;  %v2910_v22 = vld [vmem:[#allocation8 + $0xc90] sm:$0xff]  ;;  %v2947_v6 = vld [vmem:[#allocation8 + $0xdb8] sm:$0xff] }
 0x276   :  { %v2912_v19 = vld [vmem:[#allocation8 + $0xca0] sm:$0xff]  ;;  %v2914_v23 = vld [vmem:[#allocation8 + $0xcb0] sm:$0xff] }
 0x277   :  { %7263 = vmatpush1.bf16.msra.mxu0 %v7262_v31  ;;  %7327 = vmatpush1.bf16.msra.mxu1 %v7326_v32  ;;  %v2899_v31 = vld [vmem:[#allocation8 + $0xc38] sm:$0xff]  ;;  %v2536_v32 = vld [vmem:[#allocation2 + $0x10] sm:$0x3]  ;;  %v7358_v28 = vpack.c.bf16 %v2912_v19, %v2908_v18 }
 0x278   :  { %7265 = vmatprep.subr.bf16.mxu0 %v7264_v35  ;;  %7329 = vmatprep.subr.bf16.mxu1 %v7328_v37  ;;  %v2534_v35 = vld [vmem:[#allocation2] sm:$0xfc]  ;;  %v2541_v37 = vld [vmem:[#allocation2 + $0x38] sm:$0x3]  ;;  %v7412_v47 = vpack.c.bf16 %v2899_v31, %v2895_v30  ;;  %v7422_v30 = vpack.c.bf16 %v2914_v23, %v2910_v22 }
 0x279   :  { %v2551_v58 = vrot.slane %v2534_v35, 2  ;;  %v2916_v31 = vld [vmem:[#allocation8 + $0xcc0] sm:$0xff]  ;;  %v2918_v35 = vld [vmem:[#allocation8 + $0xcd0] sm:$0xff]  ;;  %v2955_v18 = vld [vmem:[#allocation8 + $0xdf8] sm:$0xff] }
 0x27b   :  { %7267 = vmatpush1.bf16.msra.mxu0 %v7266_v51  ;;  %7331 = vmatpush1.bf16.msra.mxu1 %v7330_v52  ;;  %v2552_v51 = vrot.slane %v2536_v32, 2  ;;  %v2539_v52 = vld [vmem:[#allocation2 + $0x28] sm:$0xfc] }
 0x27c   :  { %7269 = vmatprep.subr.bf16.mxu0 %v7268_v54  ;;  %7333 = vmatprep.subr.bf16.mxu1 %v7332_v55  ;;  %v2561_v54 = vrot.slane %v2541_v37, 2  ;;  %v2540_v55 = vld [vmem:[#allocation2 + $0x30] sm:$0x3]  ;;  %v2560_v43 = vrot.slane %v2539_v52, 2  ;;  %v2920_v32 = vld [vmem:[#allocation8 + $0xce0] sm:$0xff]  ;;  %v2922_v37 = vld [vmem:[#allocation8 + $0xcf0] sm:$0xff] }
 0x27d   :  { %v2558_v3 = vrot.slane %v2540_v55, 2  ;;  %v2928_v52 = vld [vmem:[#allocation8 + $0xd20] sm:$0xff]  ;;  %v2930_v55 = vld [vmem:[#allocation8 + $0xd30] sm:$0xff] }
 0x27f   :  { %7271 = vmatpush1.bf16.msra.mxu0 %v7270_v44  ;;  %7335 = vmatpush1.bf16.msra.mxu1 %v7334_v61  ;;  %v7350_v44 = vpack.c.bf16 %v2896_v48, %v2892_v29  ;;  %v7414_v61 = vpack.c.bf16 %v2898_v50, %v2894_v49  ;;  %v2925_v29 = vld [vmem:[#allocation8 + $0xd08] sm:$0xff]  ;;  %v2931_v48 = vld [vmem:[#allocation8 + $0xd38] sm:$0xff]  ;;  %v7362_v49 = vpack.c.bf16 %v2920_v32, %v2916_v31  ;;  %v2956_v32 = vld [vmem:[#allocation8 + $0xe00] sm:$0xff] }
 0x280   :  { %7273 = vmatprep.subr.bf16.mxu0 %v7272_v2  ;;  %7337 = vmatprep.subr.bf16.mxu1 %v7336_v45  ;;  %v2904_v2 = vld [vmem:[#allocation8 + $0xc60] sm:$0xff]  ;;  %v2553_v45 = vsel %vm2550_vm6, %v2551_v58, %v2552_v51  ;;  %v7426_v50 = vpack.c.bf16 %v2922_v37, %v2918_v35  ;;  %v2935_v58 = vld [vmem:[#allocation8 + $0xd58] sm:$0xff]  ;;  %v2958_v37 = vld [vmem:[#allocation8 + $0xe10] sm:$0xff] }
 0x281   :  { %v7354_v14 = vpack.c.bf16 %v2904_v2, %v2900_v63  ;;  %v2924_v51 = vld [vmem:[#allocation8 + $0xd00] sm:$0xff]  ;;  %v7432_v63 = vpack.c.bf16 %v2939_v59, %v2935_v58  ;;  %v2934_v2 = vld [vmem:[#allocation8 + $0xd50] sm:$0xff]  ;;  %v2977_v58 = vld [vmem:[#allocation8 + $0xea8] sm:$0xff] }
 0x282   :  { %v2975_v59 = vld [vmem:[#allocation8 + $0xe98] sm:$0xff] }
 0x283   :  { %7275 = vmatpush1.bf16.msra.mxu0 %v7274_v9  ;;  %7339 = vmatpush1.bf16.msra.mxu1 %v7338_v10  ;;  %v2562_v9 = vsel %vm2550_vm6, %v2560_v43, %v2561_v54  ;;  %v2879_v10 = vrot.slane %v2861_v60, 3  ;;  %v2926_v54 = vld [vmem:[#allocation8 + $0xd10] sm:$0xff]  ;;  %v7366_v60 = vpack.c.bf16 %v2928_v52, %v2924_v51  ;;  %v2964_v52 = vld [vmem:[#allocation8 + $0xe40] sm:$0xff] }
 0x284   :  { %7277 = vmatprep.subr.bf16.mxu0 %v7276_v12  ;;  %7341 = vmatprep.subr.bf16.mxu1 %v7340_v13  ;;  %v2915_v12 = vld [vmem:[#allocation8 + $0xcb8] sm:$0xff]  ;;  %v2557_v13 = vrot.slane %v2538_v62, 2  ;;  %v7430_v43 = vpack.c.bf16 %v2930_v55, %v2926_v54  ;;  %v7368_v62 = vpack.c.bf16 %v2937_v57, %v2933_v56  ;;  %v2966_v55 = vld [vmem:[#allocation8 + $0xe50] sm:$0xff]  ;;  %v2973_v57 = vld [vmem:[#allocation8 + $0xe88] sm:$0xff] }
 0x285   :  { %v2970_v56 = vld [vmem:[#allocation8 + $0xe70] sm:$0xff] }
 0x286   :  { %v2559_v16 = vsel %vm2550_vm6, %v2557_v13, %v2558_v3  ;;  %v2941_v3 = vld [vmem:[#allocation8 + $0xd88] sm:$0xff]  ;;  %v2946_v13 = vld [vmem:[#allocation8 + $0xdb0] sm:$0xff] }
 0x287   :  { %7279 = vmatpush1.bf16.msra.mxu0 %v7278_v20  ;;  %7343 = vmatpush1.bf16.msra.mxu1 %v7342_v21  ;;  %v7356_v20 = vpack.c.bf16 %v2913_v46, %v2909_v8  ;;  %v7420_v21 = vpack.c.bf16 %v2915_v12, %v2911_v11  ;;  %v2942_v12 = vld [vmem:[#allocation8 + $0xd90] sm:$0xff] }
 0x288   :  { %7281 = vmatprep.subr.bf16.mxu0 %v7280_v24  ;;  %7345 = vmatprep.subr.bf16.mxu1 %v7344_v25  ;;  %v2917_v24 = vld [vmem:[#allocation8 + $0xcc8] sm:$0xff]  ;;  %v2880_v25 = vsel %vm2874_vm7, %v2878_v15, %v2879_v10  ;;  %v2944_v10 = vld [vmem:[#allocation8 + $0xda0] sm:$0xff] }
 0x289   :  { %v2953_v15 = vld [vmem:[#allocation8 + $0xde8] sm:$0xff] }
 0x28b   :  { %7283 = vmatpush1.bf16.msra.mxu0 %v7282_v33  ;;  %7347 = vmatpush1.bf16.msra.mxu1 %v7346_v34  ;;  %v7360_v33 = vpack.c.bf16 %v2921_v26, %v2917_v24  ;;  %v7424_v34 = vpack.c.bf16 %v2923_v27, %v2919_v1  ;;  %v2950_v24 = vld [vmem:[#allocation8 + $0xdd0] sm:$0xff]  ;;  %v2957_v26 = vld [vmem:[#allocation8 + $0xe08] sm:$0xff]  ;;  %v2959_v27 = vld [vmem:[#allocation8 + $0xe18] sm:$0xff] }
 0x28c   :  { %7349 = vmatprep.subr.bf16.mxu0 %v7348_v39  ;;  %7413 = vmatprep.subr.bf16.mxu1 %v7412_v47  ;;  %v2929_v39 = vld [vmem:[#allocation8 + $0xd28] sm:$0xff]  ;;  %v2927_v47 = vld [vmem:[#allocation8 + $0xd18] sm:$0xff] }
 0x28d   :  { %v7364_v36 = vpack.c.bf16 %v2929_v39, %v2925_v29  ;;  %v7428_v53 = vpack.c.bf16 %v2931_v48, %v2927_v47  ;;  %v2961_v1 = vld [vmem:[#allocation8 + $0xe28] sm:$0xff]  ;;  %v2962_v29 = vld [vmem:[#allocation8 + $0xe30] sm:$0xff]  ;;  %v2967_v48 = vld [vmem:[#allocation8 + $0xe58] sm:$0xff] }
 0x28e   :  { %2761 = vmatmul.mubr.f32.vlgmr.msra.gmra.mrb[12].mxu0 %v2553_v45  ;;  %2838 = vmatmul.mubr.f32.vlgmr.msra.gmra.mrb[12].mxu1 %v2553_v45  ;;  %v2938_v45 = vld [vmem:[#allocation8 + $0xd70] sm:$0xff]  ;;  %v2965_v39 = vld [vmem:[#allocation8 + $0xe48] sm:$0xff]  ;;  %v7446_v51 = vpack.c.bf16 %v2962_v29, %v2958_v37 }
 0x28f   :  { %2766 = vmatprep.mubr.f32.mxu0 %v2562_v9  ;;  %2843 = vmatprep.mubr.f32.mxu1 %v2562_v9  ;;  %v7434_v8 = vpack.c.bf16 %v2938_v45, %v2934_v2  ;;  %v2940_v9 = vld [vmem:[#allocation8 + $0xd80] sm:$0xff]  ;;  %v2969_v47 = vld [vmem:[#allocation8 + $0xe68] sm:$0xff]  ;;  %v2974_v45 = vld [vmem:[#allocation8 + $0xe90] sm:$0xff] }
 0x290   :  { %7351 = vmatpush1.bf16.msra.mxu0 %v7350_v44  ;;  %7415 = vmatpush1.bf16.msra.mxu1 %v7414_v61  ;;  %v2932_v44 = vld [vmem:[#allocation8 + $0xd40] sm:$0xff]  ;;  %v7374_v19 = vpack.c.bf16 %v2944_v10, %v2940_v9  ;;  %v2998_v29 = vld [vmem:[#allocation8 + $0xf50] sm:$0xff] }
 0x291   :  { %7353 = vmatprep.subr.bf16.mxu0 %v7352_v4  ;;  %7417 = vmatprep.subr.bf16.mxu1 %v7416_v5  ;;  %v2936_v61 = vld [vmem:[#allocation8 + $0xd60] sm:$0xff]  ;;  %v2945_v4 = vld [vmem:[#allocation8 + $0xda8] sm:$0xff]  ;;  %v2943_v5 = vld [vmem:[#allocation8 + $0xd98] sm:$0xff] }
 0x292   :  { %2767 = vmatmul.mubr.f32.gmra.mrb[14].mxu0 %v2559_v16  ;;  %2844 = vmatmul.mubr.f32.gmra.mrb[14].mxu1 %v2559_v16  ;;  %v7370_v7 = vpack.c.bf16 %v2936_v61, %v2932_v44  ;;  %v7372_v46 = vpack.c.bf16 %v2945_v4, %v2941_v3  ;;  %v7436_v11 = vpack.c.bf16 %v2947_v6, %v2943_v5  ;;  %v2972_v61 = vld [vmem:[#allocation8 + $0xe80] sm:$0xff]  ;;  %v2978_v3 = vld [vmem:[#allocation8 + $0xeb0] sm:$0xff]  ;;  %v2981_v4 = vld [vmem:[#allocation8 + $0xec8] sm:$0xff] }
 0x293   :  { %3084 = vmatprep.mubr.f32.mxu0 %v2880_v25  ;;  %3161 = vmatprep.mubr.f32.mxu1 %v2880_v25  ;;  %v7438_v16 = vpack.c.bf16 %v2946_v13, %v2942_v12  ;;  %v2954_v25 = vld [vmem:[#allocation8 + $0xdf0] sm:$0xff]  ;;  %v7450_v44 = vpack.c.bf16 %v2970_v56, %v2966_v55  ;;  %v2985_v5 = vld [vmem:[#allocation8 + $0xee8] sm:$0xff]  ;;  %v2983_v6 = vld [vmem:[#allocation8 + $0xed8] sm:$0xff]  ;;  %v7454_v9 = vpack.c.bf16 %v2978_v3, %v2974_v45 }
 0x294   :  { %7355 = vmatpush1.bf16.msra.mxu0 %v7354_v14  ;;  %7419 = vmatpush1.bf16.msra.mxu1 %v7418_v17  ;;  %v2949_v14 = vld [vmem:[#allocation8 + $0xdc8] sm:$0xff]  ;;  %v2951_v17 = vld [vmem:[#allocation8 + $0xdd8] sm:$0xff]  ;;  %v7442_v31 = vpack.c.bf16 %v2954_v25, %v2950_v24  ;;  %v2980_v10 = vld [vmem:[#allocation8 + $0xec0] sm:$0xff] }
 0x295   :  { %7357 = vmatprep.subr.bf16.mxu0 %v7356_v20  ;;  %7421 = vmatprep.subr.bf16.mxu1 %v7420_v21  ;;  %v2948_v20 = vld [vmem:[#allocation8 + $0xdc0] sm:$0xff]  ;;  %v7376_v22 = vpack.c.bf16 %v2953_v15, %v2949_v14  ;;  %v7440_v23 = vpack.c.bf16 %v2955_v18, %v2951_v17  ;;  %v2982_v13 = vld [vmem:[#allocation8 + $0xed0] sm:$0xff]  ;;  %v2989_v15 = vld [vmem:[#allocation8 + $0xf08] sm:$0xff] }
 0x296   :  { %v2952_v21 = vld [vmem:[#allocation8 + $0xde0] sm:$0xff]  ;;  %v2986_v14 = vld [vmem:[#allocation8 + $0xef0] sm:$0xff]  ;;  %v2993_v17 = vld [vmem:[#allocation8 + $0xf28] sm:$0xff] }
 0x297   :  { %v2991_v18 = vld [vmem:[#allocation8 + $0xf18] sm:$0xff]  ;;  %v2990_v25 = vld [vmem:[#allocation8 + $0xf10] sm:$0xff] }
 0x298   :  { %7359 = vmatpush1.bf16.msra.mxu0 %v7358_v28  ;;  %7423 = vmatpush1.bf16.msra.mxu1 %v7422_v30  ;;  %v2963_v28 = vld [vmem:[#allocation8 + $0xe38] sm:$0xff]  ;;  %v7378_v30 = vpack.c.bf16 %v2952_v21, %v2948_v20  ;;  %v7458_v20 = vpack.c.bf16 %v2986_v14, %v2982_v13  ;;  %v2988_v21 = vld [vmem:[#allocation8 + $0xf00] sm:$0xff]  ;;  %v3006_v56 = vld [vmem:[#allocation8 + $0xf90] sm:$0xff] }
 0x299   :  { %7361 = vmatprep.subr.bf16.mxu0 %v7360_v33  ;;  %7425 = vmatprep.subr.bf16.mxu1 %v7424_v34  ;;  %v2960_v33 = vld [vmem:[#allocation8 + $0xe20] sm:$0xff]  ;;  %v7380_v34 = vpack.c.bf16 %v2961_v1, %v2957_v26  ;;  %v7444_v35 = vpack.c.bf16 %v2963_v28, %v2959_v27  ;;  %v2994_v26 = vld [vmem:[#allocation8 + $0xf30] sm:$0xff]  ;;  %v2997_v1 = vld [vmem:[#allocation8 + $0xf48] sm:$0xff] }
 0x29a   :  { %v3001_v27 = vld [vmem:[#allocation8 + $0xf68] sm:$0xff]  ;;  %v2999_v28 = vld [vmem:[#allocation8 + $0xf58] sm:$0xff]  ;;  %v3014_v3 = vld [vmem:[#allocation8 + $0xfd0] sm:$0xff] }
 0x29b   :  { %v2865_v13 = vld [vmem:[#allocation2 + $0x38] sm:$0x7] }
 0x29c   :  { %7363 = vmatpush1.bf16.msra.mxu0 %v7362_v49  ;;  %7427 = vmatpush1.bf16.msra.mxu1 %v7426_v50  ;;  %v2971_v49 = vld [vmem:[#allocation8 + $0xe78] sm:$0xff]  ;;  %v7382_v50 = vpack.c.bf16 %v2960_v33, %v2956_v32  ;;  %v7462_v32 = vpack.c.bf16 %v2994_v26, %v2990_v25  ;;  %v2996_v33 = vld [vmem:[#allocation8 + $0xf40] sm:$0xff] }
 0x29d   :  { %7365 = vmatprep.subr.bf16.mxu0 %v7364_v36  ;;  %7429 = vmatprep.subr.bf16.mxu1 %v7428_v53  ;;  %v2968_v36 = vld [vmem:[#allocation8 + $0xe60] sm:$0xff]  ;;  %v7384_v53 = vpack.c.bf16 %v2969_v47, %v2965_v39  ;;  %v7448_v54 = vpack.c.bf16 %v2971_v49, %v2967_v48  ;;  %v3002_v39 = vld [vmem:[#allocation8 + $0xf70] sm:$0xff]  ;;  %v3005_v47 = vld [vmem:[#allocation8 + $0xf88] sm:$0xff] }
 0x29e   :  { %v3009_v48 = vld [vmem:[#allocation8 + $0xfa8] sm:$0xff]  ;;  %v3007_v49 = vld [vmem:[#allocation8 + $0xf98] sm:$0xff] }
 0x29f   :  { %v3226_v25 = vld [vmem:[#allocation8 + $0x1058] sm:$0xff] }
 0x2a0   :  { %7367 = vmatpush1.bf16.msra.mxu0 %v7366_v60  ;;  %7431 = vmatpush1.bf16.msra.mxu1 %v7430_v43  ;;  %v2979_v60 = vld [vmem:[#allocation8 + $0xeb8] sm:$0xff]  ;;  %v7386_v43 = vpack.c.bf16 %v2968_v36, %v2964_v52  ;;  %v7466_v52 = vpack.c.bf16 %v3002_v39, %v2998_v29  ;;  %v3004_v36 = vld [vmem:[#allocation8 + $0xf80] sm:$0xff] }
 0x2a1   :  { %7369 = vmatprep.subr.bf16.mxu0 %v7368_v62  ;;  %7433 = vmatprep.subr.bf16.mxu1 %v7432_v63  ;;  %v2976_v62 = vld [vmem:[#allocation8 + $0xea0] sm:$0xff]  ;;  %v7388_v63 = vpack.c.bf16 %v2977_v58, %v2973_v57  ;;  %v7452_v2 = vpack.c.bf16 %v2979_v60, %v2975_v59  ;;  %v3010_v57 = vld [vmem:[#allocation8 + $0xfb0] sm:$0xff]  ;;  %v3013_v58 = vld [vmem:[#allocation8 + $0xfc8] sm:$0xff] }
 0x2a2   :  { %v3017_v59 = vld [vmem:[#allocation8 + $0xfe8] sm:$0xff]  ;;  %v3015_v60 = vld [vmem:[#allocation8 + $0xfd8] sm:$0xff] }
 0x2a3   :  { %v3230_v26 = vld [vmem:[#allocation8 + $0x1078] sm:$0xff] }
 0x2a4   :  { %7371 = vmatpush1.bf16.msra.mxu0 %v7370_v7  ;;  %7435 = vmatpush1.bf16.msra.mxu1 %v7434_v8  ;;  %v2987_v7 = vld [vmem:[#allocation8 + $0xef8] sm:$0xff]  ;;  %v7390_v8 = vpack.c.bf16 %v2976_v62, %v2972_v61  ;;  %v7470_v61 = vpack.c.bf16 %v3010_v57, %v3006_v56  ;;  %v3012_v62 = vld [vmem:[#allocation8 + $0xfc0] sm:$0xff] }
 0x2a5   :  { %7373 = vmatprep.subr.bf16.mxu0 %v7372_v46  ;;  %7437 = vmatprep.subr.bf16.mxu1 %v7436_v11  ;;  %v2984_v46 = vld [vmem:[#allocation8 + $0xee0] sm:$0xff]  ;;  %v7392_v11 = vpack.c.bf16 %v2985_v5, %v2981_v4  ;;  %v7456_v12 = vpack.c.bf16 %v2987_v7, %v2983_v6  ;;  %v3018_v4 = vld [vmem:[#allocation8 + $0xff0] sm:$0xff]  ;;  %v3216_v5 = vld [vmem:[#allocation8 + $0x1008] sm:$0xff] }
 0x2a6   :  { %v3220_v6 = vld [vmem:[#allocation8 + $0x1028] sm:$0xff]  ;;  %v3218_v7 = vld [vmem:[#allocation8 + $0x1018] sm:$0xff] }
 0x2a7   :  { %v7476_v14 = vpack.c.bf16 %v3220_v6, %v3216_v5  ;;  %v3246_v5 = vld [vmem:[#allocation8 + $0x10f8] sm:$0xff] }
 0x2a8   :  { %7375 = vmatpush1.bf16.msra.mxu0 %v7374_v19  ;;  %7439 = vmatpush1.bf16.msra.mxu1 %v7438_v16  ;;  %v2995_v19 = vld [vmem:[#allocation8 + $0xf38] sm:$0xff]  ;;  %v7394_v16 = vpack.c.bf16 %v2984_v46, %v2980_v10  ;;  %v7474_v46 = vpack.c.bf16 %v3018_v4, %v3014_v3  ;;  %v3244_v3 = vld [vmem:[#allocation8 + $0x10e8] sm:$0xff] }
 0x2a9   :  { %7377 = vmatprep.subr.bf16.mxu0 %v7376_v22  ;;  %7441 = vmatprep.subr.bf16.mxu1 %v7440_v23  ;;  %v2992_v22 = vld [vmem:[#allocation8 + $0xf20] sm:$0xff]  ;;  %v7396_v23 = vpack.c.bf16 %v2993_v17, %v2989_v15  ;;  %v7460_v24 = vpack.c.bf16 %v2995_v19, %v2991_v18  ;;  %v2864_v19 = vld [vmem:[#allocation2 + $0x30] sm:$0x7]  ;;  %v3242_v4 = vld [vmem:[#allocation8 + $0x10d8] sm:$0xff] }
 0x2aa   :  { %v3215_v17 = vld [vmem:[#allocation8 + $0x1000] sm:$0xff]  ;;  %v2882_v29 = vrot.slane %v2864_v19, 3 }
 0x2ab   :  { %v3219_v18 = vld [vmem:[#allocation8 + $0x1020] sm:$0xff] }
 0x2ac   :  { %7379 = vmatpush1.bf16.msra.mxu0 %v7378_v30  ;;  %7443 = vmatpush1.bf16.msra.mxu1 %v7442_v31  ;;  %v3003_v30 = vld [vmem:[#allocation8 + $0xf78] sm:$0xff]  ;;  %v7398_v31 = vpack.c.bf16 %v2992_v22, %v2988_v21  ;;  %v3221_v21 = vld [vmem:[#allocation8 + $0x1030] sm:$0xff]  ;;  %v3224_v22 = vld [vmem:[#allocation8 + $0x1048] sm:$0xff] }
 0x2ad   :  { %7381 = vmatprep.subr.bf16.mxu0 %v7380_v34  ;;  %7445 = vmatprep.subr.bf16.mxu1 %v7444_v35  ;;  %v3000_v34 = vld [vmem:[#allocation8 + $0xf60] sm:$0xff]  ;;  %v7400_v35 = vpack.c.bf16 %v3001_v27, %v2997_v1  ;;  %v7464_v37 = vpack.c.bf16 %v3003_v30, %v2999_v28  ;;  %v3183_v27 = vld [vmem:[#allocation2 + $0x8] sm:$0xf0]  ;;  %v3185_v28 = vld [vmem:[#allocation2 + $0x18] sm:$0xf] }
 0x2ae   :  { %v3201_v57 = vrot.slane %v3183_v27, 4  ;;  %v3262_v27 = vld [vmem:[#allocation8 + $0x1178] sm:$0xff] }
 0x2b0   :  { %7383 = vmatpush1.bf16.msra.mxu0 %v7382_v50  ;;  %7447 = vmatpush1.bf16.msra.mxu1 %v7446_v51  ;;  %v3011_v50 = vld [vmem:[#allocation8 + $0xfb8] sm:$0xff]  ;;  %v7402_v51 = vpack.c.bf16 %v3000_v34, %v2996_v33  ;;  %v3223_v34 = vld [vmem:[#allocation8 + $0x1040] sm:$0xff] }
 0x2b1   :  { %7385 = vmatprep.subr.bf16.mxu0 %v7384_v53  ;;  %7449 = vmatprep.subr.bf16.mxu1 %v7448_v54  ;;  %v3008_v53 = vld [vmem:[#allocation8 + $0xfa0] sm:$0xff]  ;;  %v7404_v54 = vpack.c.bf16 %v3009_v48, %v3005_v47  ;;  %v7468_v55 = vpack.c.bf16 %v3011_v50, %v3007_v49  ;;  %v7544_v47 = vpack.c.bf16 %v3230_v26, %v3226_v25  ;;  %v3225_v48 = vld [vmem:[#allocation8 + $0x1050] sm:$0xff]  ;;  %v3232_v50 = vld [vmem:[#allocation8 + $0x1088] sm:$0xff] }
 0x2b2   :  { %v2862_v33 = vld [vmem:[#allocation2 + $0x20] sm:$0xf8]  ;;  %v3229_v49 = vld [vmem:[#allocation8 + $0x1070] sm:$0xff]  ;;  %v3256_v25 = vld [vmem:[#allocation8 + $0x1148] sm:$0xff] }
 0x2b3   :  { %v3260_v26 = vld [vmem:[#allocation8 + $0x1168] sm:$0xff] }
 0x2b4   :  { %7387 = vmatpush1.bf16.msra.mxu0 %v7386_v43  ;;  %7451 = vmatpush1.bf16.msra.mxu1 %v7450_v44  ;;  %v3019_v43 = vld [vmem:[#allocation8 + $0xff8] sm:$0xff]  ;;  %v7406_v44 = vpack.c.bf16 %v3008_v53, %v3004_v36  ;;  %v3236_v36 = vld [vmem:[#allocation8 + $0x10a8] sm:$0xff] }
 0x2b5   :  { %7389 = vmatprep.subr.bf16.mxu0 %v7388_v63  ;;  %7453 = vmatprep.subr.bf16.mxu1 %v7452_v2  ;;  %v3016_v63 = vld [vmem:[#allocation8 + $0xfe0] sm:$0xff]  ;;  %v7408_v2 = vpack.c.bf16 %v3017_v59, %v3013_v58  ;;  %v7472_v45 = vpack.c.bf16 %v3019_v43, %v3015_v60  ;;  %v3234_v53 = vld [vmem:[#allocation8 + $0x1098] sm:$0xff]  ;;  %v7546_v58 = vpack.c.bf16 %v3229_v49, %v3225_v48 }
 0x2b6   :  { %v7410_v10 = vpack.c.bf16 %v3016_v63, %v3012_v62  ;;  %v3231_v59 = vld [vmem:[#allocation8 + $0x1080] sm:$0xff]  ;;  %v3233_v62 = vld [vmem:[#allocation8 + $0x1090] sm:$0xff]  ;;  %v3270_v48 = vld [vmem:[#allocation8 + $0x11b8] sm:$0xff] }
 0x2b7   :  { %v3235_v60 = vld [vmem:[#allocation8 + $0x10a0] sm:$0xff]  ;;  %v3237_v63 = vld [vmem:[#allocation8 + $0x10b0] sm:$0xff] }
 0x2b8   :  { %7391 = vmatpush1.bf16.msra.mxu0 %v7390_v8  ;;  %7455 = vmatpush1.bf16.msra.mxu1 %v7454_v9  ;;  %v3222_v8 = vld [vmem:[#allocation8 + $0x1038] sm:$0xff]  ;;  %v2860_v9 = vld [vmem:[#allocation2 + $0x10] sm:$0x7]  ;;  %v7486_v6 = vpack.c.bf16 %v3235_v60, %v3231_v59 }
 0x2b9   :  { %7393 = vmatprep.subr.bf16.mxu0 %v7392_v11  ;;  %7457 = vmatprep.subr.bf16.mxu1 %v7456_v12  ;;  %v2858_v11 = vld [vmem:[#allocation2] sm:$0xf8]  ;;  %v2863_v12 = vld [vmem:[#allocation2 + $0x28] sm:$0xf8]  ;;  %v7540_v15 = vpack.c.bf16 %v3222_v8, %v3218_v7  ;;  %v7550_v7 = vpack.c.bf16 %v3237_v63, %v3233_v62 }
 0x2ba   :  { %v2875_v1 = vrot.slane %v2858_v11, 3  ;;  %v2884_v30 = vrot.slane %v2863_v12, 3  ;;  %v3239_v8 = vld [vmem:[#allocation8 + $0x10c0] sm:$0xff]  ;;  %v3241_v11 = vld [vmem:[#allocation8 + $0x10d0] sm:$0xff]  ;;  %v3278_v59 = vld [vmem:[#allocation8 + $0x11f8] sm:$0xff] }
 0x2bb   :  { %v3245_v12 = vld [vmem:[#allocation8 + $0x10f0] sm:$0xff] }
 0x2bc   :  { %7395 = vmatpush1.bf16.msra.mxu0 %v7394_v16  ;;  %7459 = vmatpush1.bf16.msra.mxu1 %v7458_v20  ;;  %v2876_v16 = vrot.slane %v2860_v9, 3  ;;  %v3217_v20 = vld [vmem:[#allocation8 + $0x1010] sm:$0xff]  ;;  %v3243_v9 = vld [vmem:[#allocation8 + $0x10e0] sm:$0xff]  ;;  %v7554_v19 = vpack.c.bf16 %v3245_v12, %v3241_v11 }
 0x2bd   :  { %7397 = vmatprep.subr.bf16.mxu0 %v7396_v23  ;;  %7461 = vmatprep.subr.bf16.mxu1 %v7460_v24  ;;  %v2885_v23 = vrot.slane %v2865_v13, 3  ;;  %v3228_v24 = vld [vmem:[#allocation8 + $0x1068] sm:$0xff]  ;;  %v3281_v12 = vld [vmem:[#allocation8 + $0x1210] sm:$0xff] }
 0x2be   :  { %v7480_v39 = vpack.c.bf16 %v3228_v24, %v3224_v22  ;;  %v3248_v13 = vld [vmem:[#allocation8 + $0x1108] sm:$0xff]  ;;  %v3253_v24 = vld [vmem:[#allocation8 + $0x1130] sm:$0xff] }
 0x2c0   :  { %7399 = vmatpush1.bf16.msra.mxu0 %v7398_v31  ;;  %7463 = vmatpush1.bf16.msra.mxu1 %v7462_v32  ;;  %v7478_v31 = vpack.c.bf16 %v3219_v18, %v3215_v17  ;;  %v7542_v32 = vpack.c.bf16 %v3221_v21, %v3217_v20  ;;  %v3254_v17 = vld [vmem:[#allocation8 + $0x1138] sm:$0xff]  ;;  %v7490_v18 = vpack.c.bf16 %v3243_v9, %v3239_v8  ;;  %v3251_v20 = vld [vmem:[#allocation8 + $0x1120] sm:$0xff] }
 0x2c1   :  { %7401 = vmatprep.subr.bf16.mxu0 %v7400_v35  ;;  %7465 = vmatprep.subr.bf16.mxu1 %v7464_v37  ;;  %v3227_v35 = vld [vmem:[#allocation8 + $0x1060] sm:$0xff]  ;;  %v2877_v37 = vsel %vm2874_vm7, %v2875_v1, %v2876_v16  ;;  %v3258_v1 = vld [vmem:[#allocation8 + $0x1158] sm:$0xff] }
 0x2c2   :  { %v7482_v56 = vpack.c.bf16 %v3227_v35, %v3223_v34  ;;  %v3247_v16 = vld [vmem:[#allocation8 + $0x1100] sm:$0xff]  ;;  %v7560_v34 = vpack.c.bf16 %v3262_v27, %v3258_v1  ;;  %v3257_v35 = vld [vmem:[#allocation8 + $0x1150] sm:$0xff]  ;;  %v3300_v1 = vld [vmem:[#allocation8 + $0x12a8] sm:$0xff] }
 0x2c3   :  { %v3279_v9 = vld [vmem:[#allocation8 + $0x1200] sm:$0xff]  ;;  %v3298_v27 = vld [vmem:[#allocation8 + $0x1298] sm:$0xff] }
 0x2c4   :  { %7403 = vmatpush1.bf16.msra.mxu0 %v7402_v51  ;;  %7467 = vmatpush1.bf16.msra.mxu1 %v7466_v52  ;;  %v2886_v51 = vsel %vm2874_vm7, %v2884_v30, %v2885_v23  ;;  %v3202_v52 = vrot.slane %v3185_v28, 4  ;;  %v3249_v23 = vld [vmem:[#allocation8 + $0x1110] sm:$0xff]  ;;  %v7494_v28 = vpack.c.bf16 %v3251_v20, %v3247_v16  ;;  %v3287_v20 = vld [vmem:[#allocation8 + $0x1240] sm:$0xff] }
 0x2c5   :  { %7405 = vmatprep.subr.bf16.mxu0 %v7404_v54  ;;  %7469 = vmatprep.subr.bf16.mxu1 %v7468_v55  ;;  %v3238_v54 = vld [vmem:[#allocation8 + $0x10b8] sm:$0xff]  ;;  %v2881_v55 = vrot.slane %v2862_v33, 3  ;;  %v7558_v30 = vpack.c.bf16 %v3253_v24, %v3249_v23  ;;  %v7496_v33 = vpack.c.bf16 %v3260_v26, %v3256_v25  ;;  %v3289_v24 = vld [vmem:[#allocation8 + $0x1250] sm:$0xff]  ;;  %v3296_v26 = vld [vmem:[#allocation8 + $0x1288] sm:$0xff] }
 0x2c6   :  { %v3293_v25 = vld [vmem:[#allocation8 + $0x1270] sm:$0xff] }
 0x2c7   :  { %v2883_v43 = vsel %vm2874_vm7, %v2881_v55, %v2882_v29  ;;  %v3264_v29 = vld [vmem:[#allocation8 + $0x1188] sm:$0xff]  ;;  %v3269_v55 = vld [vmem:[#allocation8 + $0x11b0] sm:$0xff] }
 0x2c8   :  { %7407 = vmatpush1.bf16.msra.mxu0 %v7406_v44  ;;  %7471 = vmatpush1.bf16.msra.mxu1 %v7470_v61  ;;  %v7484_v44 = vpack.c.bf16 %v3236_v36, %v3232_v50  ;;  %v7548_v61 = vpack.c.bf16 %v3238_v54, %v3234_v53  ;;  %v3265_v54 = vld [vmem:[#allocation8 + $0x1190] sm:$0xff] }
 0x2c9   :  { %7409 = vmatprep.subr.bf16.mxu0 %v7408_v2  ;;  %7473 = vmatprep.subr.bf16.mxu1 %v7472_v45  ;;  %v3240_v2 = vld [vmem:[#allocation8 + $0x10c8] sm:$0xff]  ;;  %v3203_v45 = vsel %vm215_vm0, %v3201_v57, %v3202_v52  ;;  %v3267_v52 = vld [vmem:[#allocation8 + $0x11a0] sm:$0xff] }
 0x2ca   :  { %v3276_v57 = vld [vmem:[#allocation8 + $0x11e8] sm:$0xff] }
 0x2cc   :  { %7411 = vmatpush1.bf16.msra.mxu0 %v7410_v10  ;;  %7475 = vmatpush1.bf16.msra.mxu1 %v7474_v46  ;;  %v7488_v10 = vpack.c.bf16 %v3244_v3, %v3240_v2  ;;  %v7552_v46 = vpack.c.bf16 %v3246_v5, %v3242_v4  ;;  %v3273_v2 = vld [vmem:[#allocation8 + $0x11d0] sm:$0xff]  ;;  %v3280_v3 = vld [vmem:[#allocation8 + $0x1208] sm:$0xff]  ;;  %v3282_v5 = vld [vmem:[#allocation8 + $0x1218] sm:$0xff] }
 0x2cd   :  { %7477 = vmatprep.subr.bf16.mxu0 %v7476_v14  ;;  %7541 = vmatprep.subr.bf16.mxu1 %v7540_v15  ;;  %v3252_v14 = vld [vmem:[#allocation8 + $0x1128] sm:$0xff]  ;;  %v3250_v15 = vld [vmem:[#allocation8 + $0x1118] sm:$0xff] }
 0x2ce   :  { %v7492_v21 = vpack.c.bf16 %v3252_v14, %v3248_v13  ;;  %v7556_v22 = vpack.c.bf16 %v3254_v17, %v3250_v15  ;;  %v3284_v4 = vld [vmem:[#allocation8 + $0x1228] sm:$0xff]  ;;  %v3285_v13 = vld [vmem:[#allocation8 + $0x1230] sm:$0xff]  ;;  %v3290_v17 = vld [vmem:[#allocation8 + $0x1258] sm:$0xff] }
 0x2cf   :  { %3085 = vmatmul.mubr.f32.vlgmr.msra.gmra.mrb[12].mxu0 %v2877_v37  ;;  %3162 = vmatmul.mubr.f32.vlgmr.msra.gmra.mrb[12].mxu1 %v2877_v37  ;;  %v3261_v37 = vld [vmem:[#allocation8 + $0x1170] sm:$0xff]  ;;  %v3288_v14 = vld [vmem:[#allocation8 + $0x1248] sm:$0xff]  ;;  %v7574_v16 = vpack.c.bf16 %v3285_v13, %v3281_v12 }
 0x2d0   :  { %3090 = vmatprep.mubr.f32.mxu0 %v2886_v51  ;;  %3167 = vmatprep.mubr.f32.mxu1 %v2886_v51  ;;  %v7562_v50 = vpack.c.bf16 %v3261_v37, %v3257_v35  ;;  %v3263_v51 = vld [vmem:[#allocation8 + $0x1180] sm:$0xff]  ;;  %v3292_v15 = vld [vmem:[#allocation8 + $0x1268] sm:$0xff]  ;;  %v3297_v37 = vld [vmem:[#allocation8 + $0x1290] sm:$0xff] }
 0x2d1   :  { %7479 = vmatpush1.bf16.msra.mxu0 %v7478_v31  ;;  %7543 = vmatpush1.bf16.msra.mxu1 %v7542_v32  ;;  %v3255_v31 = vld [vmem:[#allocation8 + $0x1140] sm:$0xff]  ;;  %v7502_v60 = vpack.c.bf16 %v3267_v52, %v3263_v51  ;;  %v3321_v13 = vld [vmem:[#allocation8 + $0x1350] sm:$0xff] }
 0x2d2   :  { %7481 = vmatprep.subr.bf16.mxu0 %v7480_v39  ;;  %7545 = vmatprep.subr.bf16.mxu1 %v7544_v47  ;;  %v3259_v32 = vld [vmem:[#allocation8 + $0x1160] sm:$0xff]  ;;  %v3268_v39 = vld [vmem:[#allocation8 + $0x11a8] sm:$0xff]  ;;  %v3266_v47 = vld [vmem:[#allocation8 + $0x1198] sm:$0xff] }
 0x2d3   :  { %3091 = vmatmul.mubr.f32.gmra.mrb[14].mxu0 %v2883_v43  ;;  %3168 = vmatmul.mubr.f32.gmra.mrb[14].mxu1 %v2883_v43  ;;  %v7498_v49 = vpack.c.bf16 %v3259_v32, %v3255_v31  ;;  %v7500_v36 = vpack.c.bf16 %v3268_v39, %v3264_v29  ;;  %v7564_v53 = vpack.c.bf16 %v3270_v48, %v3266_v47  ;;  %v3295_v32 = vld [vmem:[#allocation8 + $0x1280] sm:$0xff]  ;;  %v3301_v29 = vld [vmem:[#allocation8 + $0x12b0] sm:$0xff]  ;;  %v3304_v39 = vld [vmem:[#allocation8 + $0x12c8] sm:$0xff] }
 0x2d4   :  { %3407 = vmatprep.mubr.f32.mxu0 %v3203_v45  ;;  %3484 = vmatprep.mubr.f32.mxu1 %v3203_v45  ;;  %v7566_v43 = vpack.c.bf16 %v3269_v55, %v3265_v54  ;;  %v3277_v45 = vld [vmem:[#allocation8 + $0x11f0] sm:$0xff]  ;;  %v7578_v31 = vpack.c.bf16 %v3293_v25, %v3289_v24  ;;  %v3308_v47 = vld [vmem:[#allocation8 + $0x12e8] sm:$0xff]  ;;  %v3306_v48 = vld [vmem:[#allocation8 + $0x12d8] sm:$0xff]  ;;  %v7582_v51 = vpack.c.bf16 %v3301_v29, %v3297_v37 }
 0x2d5   :  { %7483 = vmatpush1.bf16.msra.mxu0 %v7482_v56  ;;  %7547 = vmatpush1.bf16.msra.mxu1 %v7546_v58  ;;  %v3272_v56 = vld [vmem:[#allocation8 + $0x11c8] sm:$0xff]  ;;  %v3274_v58 = vld [vmem:[#allocation8 + $0x11d8] sm:$0xff]  ;;  %v7570_v8 = vpack.c.bf16 %v3277_v45, %v3273_v2  ;;  %v3303_v52 = vld [vmem:[#allocation8 + $0x12c0] sm:$0xff] }
 0x2d6   :  { %7485 = vmatprep.subr.bf16.mxu0 %v7484_v44  ;;  %7549 = vmatprep.subr.bf16.mxu1 %v7548_v61  ;;  %v3271_v44 = vld [vmem:[#allocation8 + $0x11c0] sm:$0xff]  ;;  %v7504_v62 = vpack.c.bf16 %v3276_v57, %v3272_v56  ;;  %v7568_v63 = vpack.c.bf16 %v3278_v59, %v3274_v58  ;;  %v3305_v55 = vld [vmem:[#allocation8 + $0x12d0] sm:$0xff]  ;;  %v3312_v57 = vld [vmem:[#allocation8 + $0x1308] sm:$0xff] }
 0x2d7   :  { %v3275_v61 = vld [vmem:[#allocation8 + $0x11e0] sm:$0xff]  ;;  %v3309_v56 = vld [vmem:[#allocation8 + $0x12f0] sm:$0xff]  ;;  %v3316_v58 = vld [vmem:[#allocation8 + $0x1328] sm:$0xff] }
 0x2d8   :  { %v3314_v59 = vld [vmem:[#allocation8 + $0x1318] sm:$0xff]  ;;  %v3313_v45 = vld [vmem:[#allocation8 + $0x1310] sm:$0xff]  ;;  %v3339_v37 = vld [vmem:[#allocation8 + $0x13e0] sm:$0xff] }
 0x2d9   :  { %7487 = vmatpush1.bf16.msra.mxu0 %v7486_v6  ;;  %7551 = vmatpush1.bf16.msra.mxu1 %v7550_v7  ;;  %v3286_v6 = vld [vmem:[#allocation8 + $0x1238] sm:$0xff]  ;;  %v7506_v7 = vpack.c.bf16 %v3275_v61, %v3271_v44  ;;  %v7586_v44 = vpack.c.bf16 %v3309_v56, %v3305_v55  ;;  %v3311_v61 = vld [vmem:[#allocation8 + $0x1300] sm:$0xff]  ;;  %v3329_v25 = vld [vmem:[#allocation8 + $0x1390] sm:$0xff] }
 0x2da   :  { %7489 = vmatprep.subr.bf16.mxu0 %v7488_v10  ;;  %7553 = vmatprep.subr.bf16.mxu1 %v7552_v46  ;;  %v3283_v10 = vld [vmem:[#allocation8 + $0x1220] sm:$0xff]  ;;  %v7508_v46 = vpack.c.bf16 %v3284_v4, %v3280_v3  ;;  %v7572_v11 = vpack.c.bf16 %v3286_v6, %v3282_v5  ;;  %v3317_v3 = vld [vmem:[#allocation8 + $0x1330] sm:$0xff]  ;;  %v3320_v4 = vld [vmem:[#allocation8 + $0x1348] sm:$0xff] }
 0x2db   :  { %v3324_v5 = vld [vmem:[#allocation8 + $0x1368] sm:$0xff]  ;;  %v3322_v6 = vld [vmem:[#allocation8 + $0x1358] sm:$0xff]  ;;  %v3337_v29 = vld [vmem:[#allocation8 + $0x13d0] sm:$0xff] }
 0x2dd   :  { %7491 = vmatpush1.bf16.msra.mxu0 %v7490_v18  ;;  %7555 = vmatpush1.bf16.msra.mxu1 %v7554_v19  ;;  %v3294_v18 = vld [vmem:[#allocation8 + $0x1278] sm:$0xff]  ;;  %v7510_v19 = vpack.c.bf16 %v3283_v10, %v3279_v9  ;;  %v7590_v9 = vpack.c.bf16 %v3317_v3, %v3313_v45  ;;  %v3319_v10 = vld [vmem:[#allocation8 + $0x1340] sm:$0xff] }
 0x2de   :  { %7493 = vmatprep.subr.bf16.mxu0 %v7492_v21  ;;  %7557 = vmatprep.subr.bf16.mxu1 %v7556_v22  ;;  %v3291_v21 = vld [vmem:[#allocation8 + $0x1260] sm:$0xff]  ;;  %v7512_v22 = vpack.c.bf16 %v3292_v15, %v3288_v14  ;;  %v7576_v23 = vpack.c.bf16 %v3294_v18, %v3290_v17  ;;  %v3325_v14 = vld [vmem:[#allocation8 + $0x1370] sm:$0xff]  ;;  %v3328_v15 = vld [vmem:[#allocation8 + $0x1388] sm:$0xff] }
 0x2df   :  { %v3332_v17 = vld [vmem:[#allocation8 + $0x13a8] sm:$0xff]  ;;  %v3330_v18 = vld [vmem:[#allocation8 + $0x1398] sm:$0xff] }
 0x2e1   :  { %7495 = vmatpush1.bf16.msra.mxu0 %v7494_v28  ;;  %7559 = vmatpush1.bf16.msra.mxu1 %v7558_v30  ;;  %v3302_v28 = vld [vmem:[#allocation8 + $0x12b8] sm:$0xff]  ;;  %v7514_v30 = vpack.c.bf16 %v3291_v21, %v3287_v20  ;;  %v7594_v20 = vpack.c.bf16 %v3325_v14, %v3321_v13  ;;  %v3327_v21 = vld [vmem:[#allocation8 + $0x1380] sm:$0xff] }
 0x2e2   :  { %7497 = vmatprep.subr.bf16.mxu0 %v7496_v33  ;;  %7561 = vmatprep.subr.bf16.mxu1 %v7560_v34  ;;  %v3299_v33 = vld [vmem:[#allocation8 + $0x12a0] sm:$0xff]  ;;  %v7516_v34 = vpack.c.bf16 %v3300_v1, %v3296_v26  ;;  %v7580_v35 = vpack.c.bf16 %v3302_v28, %v3298_v27  ;;  %v3333_v26 = vld [vmem:[#allocation8 + $0x13b0] sm:$0xff]  ;;  %v3336_v1 = vld [vmem:[#allocation8 + $0x13c8] sm:$0xff] }
 0x2e3   :  { %v3340_v27 = vld [vmem:[#allocation8 + $0x13e8] sm:$0xff]  ;;  %v3338_v28 = vld [vmem:[#allocation8 + $0x13d8] sm:$0xff] }
 0x2e5   :  { %7499 = vmatpush1.bf16.msra.mxu0 %v7498_v49  ;;  %7563 = vmatpush1.bf16.msra.mxu1 %v7562_v50  ;;  %v3310_v49 = vld [vmem:[#allocation8 + $0x12f8] sm:$0xff]  ;;  %v7518_v50 = vpack.c.bf16 %v3299_v33, %v3295_v32  ;;  %v7598_v32 = vpack.c.bf16 %v3333_v26, %v3329_v25  ;;  %v3335_v33 = vld [vmem:[#allocation8 + $0x13c0] sm:$0xff] }
 0x2e6   :  { %7501 = vmatprep.subr.bf16.mxu0 %v7500_v36  ;;  %7565 = vmatprep.subr.bf16.mxu1 %v7564_v53  ;;  %v3307_v36 = vld [vmem:[#allocation8 + $0x12e0] sm:$0xff]  ;;  %v7520_v53 = vpack.c.bf16 %v3308_v47, %v3304_v39  ;;  %v7584_v54 = vpack.c.bf16 %v3310_v49, %v3306_v48  ;;  %v3341_v39 = vld [vmem:[#allocation8 + $0x13f0] sm:$0xff]  ;;  %v3184_v47 = vld [vmem:[#allocation2 + $0x10] sm:$0xf]  ;;  %v7538_v48 = vpack.c.bf16 %v3339_v37, %v3335_v33 }
 0x2e7   :  { %v7602_v49 = vpack.c.bf16 %v3341_v39, %v3337_v29  ;;  %v3624_v33 = vld [vmem:[#allocation11 + $0x2] sm:$0x3]  ;;  %v3768_v37 = vld [vmem:[#allocation11 + $0x4] sm:$0x3]  ;;  %v3844_v29 = vld [vmem:[#allocation11 + $0x6] sm:$0x3] }
 0x2e8   :  { %v7784_v39 = vld [vmem:[#allocation12 + $0x200] ss:$16 sps:$4 sm:$0xff]  }
 0x2e9   :  { %7503 = vmatpush1.bf16.msra.mxu0 %v7502_v60  ;;  %7567 = vmatpush1.bf16.msra.mxu1 %v7566_v43  ;;  %v3318_v60 = vld [vmem:[#allocation8 + $0x1338] sm:$0xff]  ;;  %v7522_v43 = vpack.c.bf16 %v3307_v36, %v3303_v52  ;;  %v3199_v52 = vrot.slane %v3184_v47, 4  ;;  %v3187_v36 = vld [vmem:[#allocation2 + $0x28] sm:$0xf0] }
 0x2ea   :  { %7505 = vmatprep.subr.bf16.mxu0 %v7504_v62  ;;  %7569 = vmatprep.subr.bf16.mxu1 %v7568_v63  ;;  %v3315_v62 = vld [vmem:[#allocation8 + $0x1320] sm:$0xff]  ;;  %v7524_v63 = vpack.c.bf16 %v3316_v58, %v3312_v57  ;;  %v7588_v2 = vpack.c.bf16 %v3318_v60, %v3314_v59  ;;  %v3207_v56 = vrot.slane %v3187_v36, 4  ;;  %v7787_v47 = vld [vmem:[#allocation12 + $0x208] ss:$16 sps:$4 sm:$0xff]  }
 0x2eb   :  { %v3186_v57 = vld [vmem:[#allocation2 + $0x20] sm:$0xf0] }
 0x2ec   :  { %v7801_v36 = vld [vmem:[#allocation12 + $0x24c] ss:$16 sps:$4 sm:$0xff]  }
 0x2ed   :  { %7507 = vmatpush1.bf16.msra.mxu0 %v7506_v7  ;;  %7571 = vmatpush1.bf16.msra.mxu1 %v7570_v8  ;;  %v3326_v7 = vld [vmem:[#allocation8 + $0x1378] sm:$0xff]  ;;  %v7526_v8 = vpack.c.bf16 %v3315_v62, %v3311_v61  ;;  %v3505_v61 = vld [vmem:[#allocation9] sm:$0xf] }
 0x2ee   :  { %7509 = vmatprep.subr.bf16.mxu0 %v7508_v46  ;;  %7573 = vmatprep.subr.bf16.mxu1 %v7572_v11  ;;  %v3323_v46 = vld [vmem:[#allocation8 + $0x1360] sm:$0xff]  ;;  %v7528_v11 = vpack.c.bf16 %v3324_v5, %v3320_v4  ;;  %v7592_v12 = vpack.c.bf16 %v3326_v7, %v3322_v6  ;;  %v3510_v62 = vrot.slane %v3505_v61, %v8874_v38 }
 0x2ef   :  { %v3522_v45 = vrot.slane %v3505_v61, %v8880_v42 }
 0x2f1   :  { %7511 = vmatpush1.bf16.msra.mxu0 %v7510_v19  ;;  %7575 = vmatpush1.bf16.msra.mxu1 %v7574_v16  ;;  %v3334_v19 = vld [vmem:[#allocation8 + $0x13b8] sm:$0xff]  ;;  %v7530_v16 = vpack.c.bf16 %v3323_v46, %v3319_v10 }
 0x2f2   :  { %7513 = vmatprep.subr.bf16.mxu0 %v7512_v22  ;;  %7577 = vmatprep.subr.bf16.mxu1 %v7576_v23  ;;  %v3331_v22 = vld [vmem:[#allocation8 + $0x13a0] sm:$0xff]  ;;  %v7532_v23 = vpack.c.bf16 %v3332_v17, %v3328_v15  ;;  %v7596_v24 = vpack.c.bf16 %v3334_v19, %v3330_v18 }
 0x2f5   :  { %7515 = vmatpush1.bf16.msra.mxu0 %v7514_v30  ;;  %7579 = vmatpush1.bf16.msra.mxu1 %v7578_v31  ;;  %v3342_v30 = vld [vmem:[#allocation8 + $0x13f8] sm:$0xff]  ;;  %v7534_v31 = vpack.c.bf16 %v3331_v22, %v3327_v21 }
 0x2f6   :  { %7517 = vmatprep.subr.bf16.mxu0 %v7516_v34  ;;  %7581 = vmatprep.subr.bf16.mxu1 %v7580_v35  ;;  %v7536_v34 = vpack.c.bf16 %v3340_v27, %v3336_v1  ;;  %v7600_v35 = vpack.c.bf16 %v3342_v30, %v3338_v28 }
 0x2f9   :  { %7519 = vmatpush1.bf16.msra.mxu0 %v7518_v50  ;;  %7583 = vmatpush1.bf16.msra.mxu1 %v7582_v51  ;;  %v3189_v50 = vld [vmem:[#allocation2 + $0x38] sm:$0xf]  ;;  %v3182_v51 = vld [vmem:[#allocation2] sm:$0xf0] }
 0x2fa   :  { %7521 = vmatprep.subr.bf16.mxu0 %v7520_v53  ;;  %7585 = vmatprep.subr.bf16.mxu1 %v7584_v54  ;;  %v3208_v53 = vrot.slane %v3189_v50, 4  ;;  %v3188_v54 = vld [vmem:[#allocation2 + $0x30] sm:$0xf]  ;;  %v3198_v55 = vrot.slane %v3182_v51, 4  ;;  %v7790_v50 = vld [vmem:[#allocation12 + $0x220] ss:$16 sps:$4 sm:$0xff]  }
 0x2fb   :  { %v3205_v59 = vrot.slane %v3188_v54, 4  ;;  %v7793_v51 = vld [vmem:[#allocation12 + $0x228] ss:$16 sps:$4 sm:$0xff]  }
 0x2fc   :  { %v3200_v58 = vsel %vm215_vm0, %v3198_v55, %v3199_v52  ;;  %v3209_v60 = vsel %vm215_vm0, %v3207_v56, %v3208_v53  ;;  %v7798_v52 = vld [vmem:[#allocation12 + $0x244] ss:$16 sps:$4 sm:$0xff]   ;;  %v7796_v53 = vld [vmem:[#allocation12 + $0x240] ss:$16 sps:$4 sm:$0xff]   ;;  %v7799_v54 = vld [vmem:[#allocation12 + $0x248] ss:$16 sps:$4 sm:$0xff]  }
 0x2fd   :  { %7523 = vmatpush1.bf16.msra.mxu0 %v7522_v43  ;;  %7587 = vmatpush1.bf16.msra.mxu1 %v7586_v44  ;;  %v3204_v43 = vrot.slane %v3186_v57, 4  ;;  %v7804_v55 = vld [vmem:[#allocation12 + $0x264] ss:$16 sps:$4 sm:$0xff]   ;;  %v7807_v56 = vld [vmem:[#allocation12 + $0x26c] ss:$16 sps:$4 sm:$0xff]  }
 0x2fe   :  { %7525 = vmatprep.subr.bf16.mxu0 %v7524_v63  ;;  %7589 = vmatprep.subr.bf16.mxu1 %v7588_v2  ;;  %v3518_v63 = vrot.slane %v3505_v61, %v8876_v40  ;;  %v3514_v2 = vrot.slane %v3505_v61, %v8878_v41  ;;  %v7802_v57 = vld [vmem:[#allocation12 + $0x260] ss:$16 sps:$4 sm:$0xff]   ;;  %v7816_v61 = vld [vmem:[#allocation12 + $0x2a4] ss:$16 sps:$4 sm:$0xff]  }
 0x2ff   :  { %v3206_v44 = vsel %vm215_vm0, %v3204_v43, %v3205_v59  ;;  %v7810_v59 = vld [vmem:[#allocation12 + $0x284] ss:$16 sps:$4 sm:$0xff]   ;;  %v7808_v43 = vld [vmem:[#allocation12 + $0x280] ss:$16 sps:$4 sm:$0xff]  }
 0x301   :  { %7527 = vmatpush1.bf16.msra.mxu0 %v7526_v8  ;;  %7591 = vmatpush1.bf16.msra.mxu1 %v7590_v9 }
 0x302   :  { %7529 = vmatprep.subr.bf16.mxu0 %v7528_v11  ;;  %7593 = vmatprep.subr.bf16.mxu1 %v7592_v12 }
 0x305   :  { %7531 = vmatpush1.bf16.msra.mxu0 %v7530_v16  ;;  %7595 = vmatpush1.bf16.msra.mxu1 %v7594_v20 }
 0x306   :  { %7533 = vmatprep.subr.bf16.mxu0 %v7532_v23  ;;  %7597 = vmatprep.subr.bf16.mxu1 %v7596_v24 }
 0x309   :  { %7535 = vmatpush1.bf16.msra.mxu0 %v7534_v31  ;;  %7599 = vmatpush1.bf16.msra.mxu1 %v7598_v32  ;;  %v3547_v32 = vld [vmem:[#allocation11] sm:$0x3] }
 0x30a   :  { %7537 = vmatprep.subr.bf16.mxu0 %v7536_v34  ;;  %7601 = vmatprep.subr.bf16.mxu1 %v7600_v35  ;;  %v7786_v34 = vld [vmem:[#allocation12 + $0x204] ss:$16 sps:$4 sm:$0xff]   ;;  %v7789_v35 = vld [vmem:[#allocation12 + $0x20c] ss:$16 sps:$4 sm:$0xff]  }
 0x30d   :  { %7539 = vmatpush1.bf16.msra.mxu0 %v7538_v48  ;;  %7603 = vmatpush1.bf16.msra.mxu1 %v7602_v49  ;;  %v7792_v48 = vld [vmem:[#allocation12 + $0x224] ss:$16 sps:$4 sm:$0xff]   ;;  %v7795_v49 = vld [vmem:[#allocation12 + $0x22c] ss:$16 sps:$4 sm:$0xff]  }
 0x310   :  { %3408 = vmatmul.mubr.f32.vlgmr.msra.gmra.mrb[12].mxu0 %v3200_v58  ;;  %3485 = vmatmul.mubr.f32.vlgmr.msra.gmra.mrb[12].mxu1 %v3200_v58  ;;  %v7805_v58 = vld [vmem:[#allocation12 + $0x268] ss:$16 sps:$4 sm:$0xff]  }
 0x311   :  { %3413 = vmatprep.mubr.f32.mxu0 %v3209_v60  ;;  %3490 = vmatprep.mubr.f32.mxu1 %v3209_v60  ;;  %v7813_v60 = vld [vmem:[#allocation12 + $0x28c] ss:$16 sps:$4 sm:$0xff]  }
 0x314   :  { %3414 = vmatmul.mubr.f32.gmra.mrb[14].mxu0 %v3206_v44  ;;  %3491 = vmatmul.mubr.f32.gmra.mrb[14].mxu1 %v3206_v44  ;;  %v7811_v44 = vld [vmem:[#allocation12 + $0x288] ss:$16 sps:$4 sm:$0xff]  }
 0x315   :  { %3616 = vmatprep.mubr.f32.mxu0 %v8448_v0  ;;  %3692 = vmatprep.mubr.f32.mxu1 %v8448_v0 }
 0x3e3   :  { %v3409_v3 = vpop.f32.mrb[12].mxu0  ;;  %v3486_v4 = vpop.f32.mrb[12].mxu1 }
 0x3e4   :  { %v3527_v5 = vadd.f32 %v3510_v62, %v3409_v3  ;;  %v3529_v6 = vadd.f32 %v3518_v63, %v3486_v4  ;;  %v3411_v7 = vpop.f32.mrb[13].mxu0  ;;  %v3488_v8 = vpop.f32.mrb[13].mxu1  ;;  %v7825_v3 = vld [vmem:[#allocation12 + $0x2cc] ss:$16 sps:$4 sm:$0xff]   ;;  %v7820_v4 = vld [vmem:[#allocation12 + $0x2c0] ss:$16 sps:$4 sm:$0xff]  }
 0x3e5   :  { %v3528_v9 = vadd.f32 %v3514_v2, %v3411_v7  ;;  %v3530_v10 = vadd.f32 %v3522_v45, %v3488_v8  ;;  %v7831_v7 = vld [vmem:[#allocation12 + $0x2ec] ss:$16 sps:$4 sm:$0xff]   ;;  %v7826_v8 = vld [vmem:[#allocation12 + $0x2e0] ss:$16 sps:$4 sm:$0xff]  }
 0x3e6   :  { %v3535_v46 = vmax.f32 %v3527_v5, 0.0  ;;  %v3537_v11 = vmax.f32 %v3529_v6, 0.0  ;;  %v7823_v5 = vld [vmem:[#allocation12 + $0x2c8] ss:$16 sps:$4 sm:$0xff]   ;;  %v7828_v6 = vld [vmem:[#allocation12 + $0x2e4] ss:$16 sps:$4 sm:$0xff]  }
 0x3e7   :  { %v3536_v12 = vmax.f32 %v3528_v9, 0.0  ;;  %v3538_v13 = vmax.f32 %v3530_v10, 0.0  ;;  %v3415_v14 = vpop.f32.mrb[14].mxu0  ;;  %v3492_v15 = vpop.f32.mrb[14].mxu1  ;;  %v7829_v9 = vld [vmem:[#allocation12 + $0x2e8] ss:$16 sps:$4 sm:$0xff]  }
 0x3e8   :  { %v3543_v17 = vmax.f32 %v3535_v46, %v3537_v11  ;;  %v3531_v18 = vadd.f32 %v3510_v62, %v3415_v14  ;;  %v3533_v19 = vadd.f32 %v3518_v63, %v3492_v15  ;;  %v3417_v16 = vpop.f32.mrb[15].mxu0  ;;  %v3494_v20 = vpop.f32.mrb[15].mxu1  ;;  %v7819_v62 = vld [vmem:[#allocation12 + $0x2ac] ss:$16 sps:$4 sm:$0xff]   ;;  %v7814_v63 = vld [vmem:[#allocation12 + $0x2a0] ss:$16 sps:$4 sm:$0xff]  }
 0x3e9   :  { %v3544_v21 = vmax.f32 %v3536_v12, %v3538_v13  ;;  %v3532_v22 = vadd.f32 %v3514_v2, %v3417_v16  ;;  %v3534_v23 = vadd.f32 %v3522_v45, %v3494_v20  ;;  %v7817_v2 = vld [vmem:[#allocation12 + $0x2a8] ss:$16 sps:$4 sm:$0xff]   ;;  %v7822_v45 = vld [vmem:[#allocation12 + $0x2c4] ss:$16 sps:$4 sm:$0xff]   ;;  %v7837_v46 = vld [vmem:[#allocation12 + $0x30c] ss:$16 sps:$4 sm:$0xff]  }
 0x3ea   :  { %v3539_v24 = vmax.f32 %v3531_v18, 0.0  ;;  %v3541_v25 = vmax.f32 %v3533_v19, 0.0  ;;  %v7834_v10 = vld [vmem:[#allocation12 + $0x304] ss:$16 sps:$4 sm:$0xff]   ;;  %v7832_v11 = vld [vmem:[#allocation12 + $0x300] ss:$16 sps:$4 sm:$0xff]  }
 0x3eb   :  { %v3540_v26 = vmax.f32 %v3532_v22, 0.0  ;;  %v3542_v1 = vmax.f32 %v3534_v23, 0.0  ;;  %v7835_v12 = vld [vmem:[#allocation12 + $0x308] ss:$16 sps:$4 sm:$0xff]   ;;  %v7840_v13 = vld [vmem:[#allocation12 + $0x324] ss:$16 sps:$4 sm:$0xff]  }
 0x3ec   :  { %v3545_v27 = vmax.f32 %v3539_v24, %v3541_v25  ;;  %v7843_v14 = vld [vmem:[#allocation12 + $0x32c] ss:$16 sps:$4 sm:$0xff]   ;;  %v7838_v15 = vld [vmem:[#allocation12 + $0x320] ss:$16 sps:$4 sm:$0xff]   ;;  %v7846_v18 = vld [vmem:[#allocation12 + $0x344] ss:$16 sps:$4 sm:$0xff]  }
 0x3ed   :  { %v3546_v28 = vmax.f32 %v3540_v26, %v3542_v1  ;;  %v7849_v19 = vld [vmem:[#allocation12 + $0x34c] ss:$16 sps:$4 sm:$0xff]   ;;  %v7844_v16 = vld [vmem:[#allocation12 + $0x340] ss:$16 sps:$4 sm:$0xff]   ;;  %v7847_v20 = vld [vmem:[#allocation12 + $0x348] ss:$16 sps:$4 sm:$0xff]  }
 0x3ee   :  { %v9027_v30 = vpack.c.bf16 %v3545_v27, %v3543_v17  ;;  %v7841_v17 = vld [vmem:[#allocation12 + $0x328] ss:$16 sps:$4 sm:$0xff]   ;;  %v7855_v22 = vld [vmem:[#allocation12 + $0x36c] ss:$16 sps:$4 sm:$0xff]   ;;  %v7850_v23 = vld [vmem:[#allocation12 + $0x360] ss:$16 sps:$4 sm:$0xff]  }
 0x3ef   :  { %v9029_v31 = vpack.c.bf16 %v3546_v28, %v3544_v21  ;;  %v7852_v21 = vld [vmem:[#allocation12 + $0x364] ss:$16 sps:$4 sm:$0xff]   ;;  %v7853_v24 = vld [vmem:[#allocation12 + $0x368] ss:$16 sps:$4 sm:$0xff]   ;;  %v7861_v26 = vld [vmem:[#allocation12 + $0x38c] ss:$16 sps:$4 sm:$0xff]  }
 0x3f0   :  { %v7858_v25 = vld [vmem:[#allocation12 + $0x384] ss:$16 sps:$4 sm:$0xff]   ;;  %v7856_v1 = vld [vmem:[#allocation12 + $0x380] ss:$16 sps:$4 sm:$0xff]   ;;  %v7859_v27 = vld [vmem:[#allocation12 + $0x388] ss:$16 sps:$4 sm:$0xff]  }
 0x3f1   :  { %7605 = vmatprep.subr.bf16.mxu0 %v9029_v31  ;;  %7609 = vmatprep.subr.bf16.mxu1 %v9029_v31  ;;  %v7864_v28 = vld [vmem:[#allocation12 + $0x3a4] ss:$16 sps:$4 sm:$0xff]  }
 0x3f2   :  { %7607 = vmatpush1.bf16.msra.mxu0 %v9027_v30  ;;  %7611 = vmatpush1.bf16.msra.mxu1 %v9027_v30 }
 0x3f3   :  { %7613 = vmatprep.subr.bf16.mxu0 %v9029_v31  ;;  %7617 = vmatprep.subr.bf16.mxu1 %v9029_v31 }
 0x3f5   :  { %6523 = vmatmul.mubr.msk.f32.vlgmr.msra.gmra.mrb[16].mxu0 %vm3548_vm8, %v3547_v32  ;;  %6524 = vmatmul.mubr.msk.f32.vlgmr.msra.gmra.mrb[16].mxu1 %vm3548_vm8, %v3624_v33  ;;  %v7867_v32 = vld [vmem:[#allocation12 + $0x3ac] ss:$16 sps:$4 sm:$0xff]   ;;  %v7862_v33 = vld [vmem:[#allocation12 + $0x3a0] ss:$16 sps:$4 sm:$0xff]  }
 0x3f6   :  { %7615 = vmatpush1.bf16.msra.mxu0 %v9027_v30  ;;  %7619 = vmatpush1.bf16.msra.mxu1 %v9027_v30 }
 0x3f7   :  { %3836 = vmatprep.mubr.f32.mxu0 %v8448_v0  ;;  %3912 = vmatprep.mubr.f32.mxu1 %v8448_v0 }
 0x3f8   :  { %4308 = vmatprep.subr.bf16.mxu0 %v7786_v34  ;;  %4349 = vmatprep.subr.bf16.mxu1 %v7789_v35  ;;  %v7865_v34 = vld [vmem:[#allocation12 + $0x3a8] ss:$16 sps:$4 sm:$0xff]   ;;  %v7868_v35 = vld [vmem:[#allocation12 + $0x3c0] ss:$16 sps:$4 sm:$0xff]  }
 0x3f9   :  { %6525 = vmatmul.mubr.msk.f32.vlgmr.msra.gmra.mrb[18].mxu0 %vm3548_vm8, %v3768_v37  ;;  %6526 = vmatmul.mubr.msk.f32.vlgmr.msra.gmra.mrb[18].mxu1 %vm3548_vm8, %v3844_v29  ;;  %v7870_v37 = vld [vmem:[#allocation12 + $0x3c4] ss:$16 sps:$4 sm:$0xff]   ;;  %v7871_v29 = vld [vmem:[#allocation12 + $0x3c8] ss:$16 sps:$4 sm:$0xff]  }
 0x3fa   :  { %4309 = vmatpush1.bf16.msra.mxu0 %v7784_v39  ;;  %4350 = vmatpush1.bf16.msra.mxu1 %v7787_v47  ;;  %v7873_v39 = vld [vmem:[#allocation12 + $0x3cc] ss:$16 sps:$4 sm:$0xff]   ;;  %v7874_v47 = vld [vmem:[#allocation12 + $0x3e0] ss:$16 sps:$4 sm:$0xff]  }
 0x3fb   :  { %4310 = vmatprep.subr.bf16.mxu0 %v7792_v48  ;;  %4351 = vmatprep.subr.bf16.mxu1 %v7795_v49  ;;  %v7876_v48 = vld [vmem:[#allocation12 + $0x3e4] ss:$16 sps:$4 sm:$0xff]   ;;  %v7877_v49 = vld [vmem:[#allocation12 + $0x3e8] ss:$16 sps:$4 sm:$0xff]  }
 0x3fe   :  { %4311 = vmatpush1.bf16.msra.mxu0 %v7790_v50  ;;  %4352 = vmatpush1.bf16.msra.mxu1 %v7793_v51  ;;  %v7879_v50 = vld [vmem:[#allocation12 + $0x3ec] ss:$16 sps:$4 sm:$0xff]   ;;  %v7882_v51 = vld [vmem:[#allocation12 + $0x4] ss:$16 sps:$4 sm:$0xff]  }
 0x3ff   :  { %4312 = vmatprep.subr.bf16.mxu0 %v7798_v52  ;;  %4353 = vmatprep.subr.bf16.mxu1 %v7801_v36  ;;  %v7885_v52 = vld [vmem:[#allocation12 + $0xc] ss:$16 sps:$4 sm:$0xff]  }
 0x402   :  { %4313 = vmatpush1.bf16.msra.mxu0 %v7796_v53  ;;  %4354 = vmatpush1.bf16.msra.mxu1 %v7799_v54 }
 0x403   :  { %4314 = vmatprep.subr.bf16.mxu0 %v7804_v55  ;;  %4355 = vmatprep.subr.bf16.mxu1 %v7807_v56 }
 0x406   :  { %4315 = vmatpush1.bf16.msra.mxu0 %v7802_v57  ;;  %4356 = vmatpush1.bf16.msra.mxu1 %v7805_v58 }
 0x407   :  { %4316 = vmatprep.subr.bf16.mxu0 %v7810_v59  ;;  %4357 = vmatprep.subr.bf16.mxu1 %v7813_v60 }
 0x40a   :  { %4317 = vmatpush1.bf16.msra.mxu0 %v7808_v43  ;;  %4358 = vmatpush1.bf16.msra.mxu1 %v7811_v44 }
 0x40b   :  { %4318 = vmatprep.subr.bf16.mxu0 %v7816_v61  ;;  %4359 = vmatprep.subr.bf16.mxu1 %v7819_v62 }
 0x40e   :  { %4319 = vmatpush1.bf16.msra.mxu0 %v7814_v63  ;;  %4360 = vmatpush1.bf16.msra.mxu1 %v7817_v2  ;;  %v7880_v63 = vld [vmem:[#allocation12] ss:$16 sps:$4 sm:$0xff]   ;;  %v7883_v2 = vld [vmem:[#allocation12 + $0x8] ss:$16 sps:$4 sm:$0xff]  }
 0x40f   :  { %4320 = vmatprep.subr.bf16.mxu0 %v7822_v45  ;;  %4361 = vmatprep.subr.bf16.mxu1 %v7825_v3  ;;  %v7888_v3 = vld [vmem:[#allocation12 + $0x24] ss:$16 sps:$4 sm:$0xff]  }
 0x412   :  { %4321 = vmatpush1.bf16.msra.mxu0 %v7820_v4  ;;  %4362 = vmatpush1.bf16.msra.mxu1 %v7823_v5  ;;  %v7891_v4 = vld [vmem:[#allocation12 + $0x2c] ss:$16 sps:$4 sm:$0xff]  }
 0x413   :  { %4322 = vmatprep.subr.bf16.mxu0 %v7828_v6  ;;  %4363 = vmatprep.subr.bf16.mxu1 %v7831_v7  ;;  %v7886_v6 = vld [vmem:[#allocation12 + $0x20] ss:$16 sps:$4 sm:$0xff]   ;;  %v7889_v7 = vld [vmem:[#allocation12 + $0x28] ss:$16 sps:$4 sm:$0xff]  }
 0x416   :  { %4323 = vmatpush1.bf16.msra.mxu0 %v7826_v8  ;;  %4364 = vmatpush1.bf16.msra.mxu1 %v7829_v9  ;;  %v7894_v8 = vld [vmem:[#allocation12 + $0x44] ss:$16 sps:$4 sm:$0xff]   ;;  %v7897_v9 = vld [vmem:[#allocation12 + $0x4c] ss:$16 sps:$4 sm:$0xff]  }
 0x417   :  { %4324 = vmatprep.subr.bf16.mxu0 %v7834_v10  ;;  %4365 = vmatprep.subr.bf16.mxu1 %v7837_v46  ;;  %v7892_v10 = vld [vmem:[#allocation12 + $0x40] ss:$16 sps:$4 sm:$0xff]   ;;  %v7895_v46 = vld [vmem:[#allocation12 + $0x48] ss:$16 sps:$4 sm:$0xff]  }
 0x41a   :  { %4325 = vmatpush1.bf16.msra.mxu0 %v7832_v11  ;;  %4366 = vmatpush1.bf16.msra.mxu1 %v7835_v12  ;;  %v7900_v11 = vld [vmem:[#allocation12 + $0x64] ss:$16 sps:$4 sm:$0xff]   ;;  %v7903_v12 = vld [vmem:[#allocation12 + $0x6c] ss:$16 sps:$4 sm:$0xff]  }
 0x41b   :  { %4326 = vmatprep.subr.bf16.mxu0 %v7840_v13  ;;  %4367 = vmatprep.subr.bf16.mxu1 %v7843_v14  ;;  %v7898_v13 = vld [vmem:[#allocation12 + $0x60] ss:$16 sps:$4 sm:$0xff]   ;;  %v7901_v14 = vld [vmem:[#allocation12 + $0x68] ss:$16 sps:$4 sm:$0xff]  }
 0x41e   :  { %4327 = vmatpush1.bf16.msra.mxu0 %v7838_v15  ;;  %4368 = vmatpush1.bf16.msra.mxu1 %v7841_v17  ;;  %v7906_v15 = vld [vmem:[#allocation12 + $0x84] ss:$16 sps:$4 sm:$0xff]   ;;  %v7909_v17 = vld [vmem:[#allocation12 + $0x8c] ss:$16 sps:$4 sm:$0xff]  }
 0x41f   :  { %4328 = vmatprep.subr.bf16.mxu0 %v7846_v18  ;;  %4369 = vmatprep.subr.bf16.mxu1 %v7849_v19  ;;  %v7904_v18 = vld [vmem:[#allocation12 + $0x80] ss:$16 sps:$4 sm:$0xff]   ;;  %v7907_v19 = vld [vmem:[#allocation12 + $0x88] ss:$16 sps:$4 sm:$0xff]  }
 0x422   :  { %4329 = vmatpush1.bf16.msra.mxu0 %v7844_v16  ;;  %4370 = vmatpush1.bf16.msra.mxu1 %v7847_v20  ;;  %v7912_v16 = vld [vmem:[#allocation12 + $0xa4] ss:$16 sps:$4 sm:$0xff]   ;;  %v7915_v20 = vld [vmem:[#allocation12 + $0xac] ss:$16 sps:$4 sm:$0xff]  }
 0x423   :  { %4330 = vmatprep.subr.bf16.mxu0 %v7852_v21  ;;  %4371 = vmatprep.subr.bf16.mxu1 %v7855_v22  ;;  %v7910_v21 = vld [vmem:[#allocation12 + $0xa0] ss:$16 sps:$4 sm:$0xff]   ;;  %v7913_v22 = vld [vmem:[#allocation12 + $0xa8] ss:$16 sps:$4 sm:$0xff]  }
 0x426   :  { %4331 = vmatpush1.bf16.msra.mxu0 %v7850_v23  ;;  %4372 = vmatpush1.bf16.msra.mxu1 %v7853_v24  ;;  %v7918_v23 = vld [vmem:[#allocation12 + $0xc4] ss:$16 sps:$4 sm:$0xff]   ;;  %v7921_v24 = vld [vmem:[#allocation12 + $0xcc] ss:$16 sps:$4 sm:$0xff]  }
 0x427   :  { %4332 = vmatprep.subr.bf16.mxu0 %v7858_v25  ;;  %4373 = vmatprep.subr.bf16.mxu1 %v7861_v26  ;;  %v7916_v25 = vld [vmem:[#allocation12 + $0xc0] ss:$16 sps:$4 sm:$0xff]   ;;  %v7919_v26 = vld [vmem:[#allocation12 + $0xc8] ss:$16 sps:$4 sm:$0xff]  }
 0x42a   :  { %4333 = vmatpush1.bf16.msra.mxu0 %v7856_v1  ;;  %4374 = vmatpush1.bf16.msra.mxu1 %v7859_v27  ;;  %v7924_v1 = vld [vmem:[#allocation12 + $0xe4] ss:$16 sps:$4 sm:$0xff]   ;;  %v7927_v27 = vld [vmem:[#allocation12 + $0xec] ss:$16 sps:$4 sm:$0xff]  }
 0x42b   :  { %4334 = vmatprep.subr.bf16.mxu0 %v7864_v28  ;;  %4375 = vmatprep.subr.bf16.mxu1 %v7867_v32  ;;  %v7922_v28 = vld [vmem:[#allocation12 + $0xe0] ss:$16 sps:$4 sm:$0xff]   ;;  %v7925_v32 = vld [vmem:[#allocation12 + $0xe8] ss:$16 sps:$4 sm:$0xff]  }
 0x42e   :  { %4335 = vmatpush1.bf16.msra.mxu0 %v7862_v33  ;;  %4376 = vmatpush1.bf16.msra.mxu1 %v7865_v34  ;;  %v7930_v33 = vld [vmem:[#allocation12 + $0x104] ss:$16 sps:$4 sm:$0xff]   ;;  %v7933_v34 = vld [vmem:[#allocation12 + $0x10c] ss:$16 sps:$4 sm:$0xff]  }
 0x42f   :  { %4336 = vmatprep.subr.bf16.mxu0 %v7870_v37  ;;  %4377 = vmatprep.subr.bf16.mxu1 %v7873_v39  ;;  %v7931_v37 = vld [vmem:[#allocation12 + $0x108] ss:$16 sps:$4 sm:$0xff]   ;;  %v7939_v39 = vld [vmem:[#allocation12 + $0x12c] ss:$16 sps:$4 sm:$0xff]  }
 0x432   :  { %4337 = vmatpush1.bf16.msra.mxu0 %v7868_v35  ;;  %4378 = vmatpush1.bf16.msra.mxu1 %v7871_v29  ;;  %v7928_v35 = vld [vmem:[#allocation12 + $0x100] ss:$16 sps:$4 sm:$0xff]   ;;  %v7936_v29 = vld [vmem:[#allocation12 + $0x124] ss:$16 sps:$4 sm:$0xff]  }
 0x433   :  { %4338 = vmatprep.subr.bf16.mxu0 %v7876_v48  ;;  %4379 = vmatprep.subr.bf16.mxu1 %v7879_v50  ;;  %v7937_v48 = vld [vmem:[#allocation12 + $0x128] ss:$16 sps:$4 sm:$0xff]   ;;  %v7945_v50 = vld [vmem:[#allocation12 + $0x14c] ss:$16 sps:$4 sm:$0xff]  }
 0x436   :  { %4339 = vmatpush1.bf16.msra.mxu0 %v7874_v47  ;;  %4380 = vmatpush1.bf16.msra.mxu1 %v7877_v49  ;;  %v7934_v47 = vld [vmem:[#allocation12 + $0x120] ss:$16 sps:$4 sm:$0xff]   ;;  %v7942_v49 = vld [vmem:[#allocation12 + $0x144] ss:$16 sps:$4 sm:$0xff]  }
 0x437   :  { %4710 = vmatprep.subr.bf16.mxu0 %v7882_v51  ;;  %4751 = vmatprep.subr.bf16.mxu1 %v7885_v52  ;;  %v7940_v51 = vld [vmem:[#allocation12 + $0x140] ss:$16 sps:$4 sm:$0xff]   ;;  %v7943_v52 = vld [vmem:[#allocation12 + $0x148] ss:$16 sps:$4 sm:$0xff]  }
 0x4c8   :  { %v3618_v36 = vpop.f32.mrb[16].mxu0  ;;  %v3694_v53 = vpop.f32.mrb[16].mxu1 }
 0x4c9   :  { %v9045_v54 = vmax.f32 %v3618_v36, %v3694_v53  ;;  %v3620_v55 = vpop.f32.mrb[17].mxu0  ;;  %v3696_v56 = vpop.f32.mrb[17].mxu1  ;;  %v7948_v36 = vld [vmem:[#allocation12 + $0x164] ss:$16 sps:$4 sm:$0xff]   ;;  %v7951_v53 = vld [vmem:[#allocation12 + $0x16c] ss:$16 sps:$4 sm:$0xff]  }
 0x4ca   :  { %v3700_v57 = vmax.f32 %v3620_v55, %v3696_v56  ;;  %v7946_v55 = vld [vmem:[#allocation12 + $0x160] ss:$16 sps:$4 sm:$0xff]   ;;  %v7949_v56 = vld [vmem:[#allocation12 + $0x168] ss:$16 sps:$4 sm:$0xff]  }
 0x4cc   :  { %v3838_v58 = vpop.f32.mrb[18].mxu0  ;;  %v3914_v59 = vpop.f32.mrb[18].mxu1  ;;  %v3702_v5 = vpack.c.bf16 %v3700_v57, %v3700_v57  ;;  %v7954_v57 = vld [vmem:[#allocation12 + $0x184] ss:$16 sps:$4 sm:$0xff]  }
 0x4cd   :  { %v3919_v60 = vmax.f32 %v3838_v58, %v3914_v59  ;;  %v3840_v43 = vpop.f32.mrb[19].mxu0  ;;  %v3916_v44 = vpop.f32.mrb[19].mxu1  ;;  %v7957_v58 = vld [vmem:[#allocation12 + $0x18c] ss:$16 sps:$4 sm:$0xff]   ;;  %v7952_v59 = vld [vmem:[#allocation12 + $0x180] ss:$16 sps:$4 sm:$0xff]  }
 0x4ce   :  { %v3920_v61 = vmax.f32 %v3840_v43, %v3916_v44  ;;  %v7960_v43 = vld [vmem:[#allocation12 + $0x1a4] ss:$16 sps:$4 sm:$0xff]   ;;  %v7963_v44 = vld [vmem:[#allocation12 + $0x1ac] ss:$16 sps:$4 sm:$0xff]  }
 0x4cf   :  { %v3921_v45 = vpack.c.bf16 %v3919_v60, %v3919_v60  ;;  %v7955_v60 = vld [vmem:[#allocation12 + $0x188] ss:$16 sps:$4 sm:$0xff]  }
 0x4d0   :  { %v3922_v62 = vpack.c.bf16 %v3920_v61, %v3920_v61  ;;  %v7958_v61 = vld [vmem:[#allocation12 + $0x1a0] ss:$16 sps:$4 sm:$0xff]  }
 0x4d2   :  { %4340 = vmatprep.mubr.bf16.mxu0 %v3922_v62  ;;  %4381 = vmatprep.mubr.bf16.mxu1 %v3922_v62  ;;  %v7961_v62 = vld [vmem:[#allocation12 + $0x1a8] ss:$16 sps:$4 sm:$0xff]  }
 0x4d3   :  { %4341 = vmatmul.mubr.bf16.vlgmr.msra.gmra.mrb[20].mxu0 %v3921_v45  ;;  %4382 = vmatmul.mubr.bf16.vlgmr.msra.gmra.mrb[20].mxu1 %v3921_v45  ;;  %v7964_v45 = vld [vmem:[#allocation12 + $0x1c0] ss:$16 sps:$4 sm:$0xff]  }
 0x4d4   :  { %4711 = vmatpush1.bf16.msra.mxu0 %v7880_v63  ;;  %4752 = vmatpush1.bf16.msra.mxu1 %v7883_v2  ;;  %v7966_v63 = vld [vmem:[#allocation12 + $0x1c4] ss:$16 sps:$4 sm:$0xff]   ;;  %v7969_v2 = vld [vmem:[#allocation12 + $0x1cc] ss:$16 sps:$4 sm:$0xff]  }
 0x4d5   :  { %4742 = vmatprep.mubr.bf16.mxu0 %v3702_v5  ;;  %4783 = vmatprep.mubr.bf16.mxu1 %v3702_v5  ;;  %v7975_v5 = vld [vmem:[#allocation12 + $0x1ec] ss:$16 sps:$4 sm:$0xff]  }
 0x4d6   :  { %4712 = vmatprep.subr.bf16.mxu0 %v7888_v3  ;;  %4753 = vmatprep.subr.bf16.mxu1 %v7891_v4  ;;  %v7967_v3 = vld [vmem:[#allocation12 + $0x1c8] ss:$16 sps:$4 sm:$0xff]   ;;  %v7972_v4 = vld [vmem:[#allocation12 + $0x1e4] ss:$16 sps:$4 sm:$0xff]  }
 0x4d8   :  { %4713 = vmatpush1.bf16.msra.mxu0 %v7886_v6  ;;  %4754 = vmatpush1.bf16.msra.mxu1 %v7889_v7  ;;  %v7970_v6 = vld [vmem:[#allocation12 + $0x1e0] ss:$16 sps:$4 sm:$0xff]   ;;  %v7973_v7 = vld [vmem:[#allocation12 + $0x1e8] ss:$16 sps:$4 sm:$0xff]  }
 0x4d9   :  { %4714 = vmatprep.subr.bf16.mxu0 %v7894_v8  ;;  %4755 = vmatprep.subr.bf16.mxu1 %v7897_v9  ;;  %v3701_v8 = vpack.c.bf16 %v9045_v54, %v9045_v54  ;;  %v7978_v9 = vld [vmem:[#allocation12 + $0x404] ss:$16 sps:$4 sm:$0xff]   ;;  %v7979_v54 = vld [vmem:[#allocation12 + $0x408] ss:$16 sps:$4 sm:$0xff]  }
 0x4dc   :  { %4715 = vmatpush1.bf16.msra.mxu0 %v7892_v10  ;;  %4756 = vmatpush1.bf16.msra.mxu1 %v7895_v46  ;;  %v7981_v10 = vld [vmem:[#allocation12 + $0x40c] ss:$16 sps:$4 sm:$0xff]   ;;  %v7976_v46 = vld [vmem:[#allocation12 + $0x400] ss:$16 sps:$4 sm:$0xff]  }
 0x4dd   :  { %4716 = vmatprep.subr.bf16.mxu0 %v7900_v11  ;;  %4757 = vmatprep.subr.bf16.mxu1 %v7903_v12  ;;  %v4793_v11 = vld [vmem:[#allocation11 + $0x8] sm:$0x3]  ;;  %v4869_v12 = vld [vmem:[#allocation11 + $0xa] sm:$0x3] }
 0x4e0   :  { %4717 = vmatpush1.bf16.msra.mxu0 %v7898_v13  ;;  %4758 = vmatpush1.bf16.msra.mxu1 %v7901_v14  ;;  %v7984_v13 = vld [vmem:[#allocation12 + $0x424] ss:$16 sps:$4 sm:$0xff]   ;;  %v7987_v14 = vld [vmem:[#allocation12 + $0x42c] ss:$16 sps:$4 sm:$0xff]  }
 0x4e1   :  { %4718 = vmatprep.subr.bf16.mxu0 %v7906_v15  ;;  %4759 = vmatprep.subr.bf16.mxu1 %v7909_v17  ;;  %v7982_v15 = vld [vmem:[#allocation12 + $0x420] ss:$16 sps:$4 sm:$0xff]   ;;  %v7985_v17 = vld [vmem:[#allocation12 + $0x428] ss:$16 sps:$4 sm:$0xff]  }
 0x4e4   :  { %4719 = vmatpush1.bf16.msra.mxu0 %v7904_v18  ;;  %4760 = vmatpush1.bf16.msra.mxu1 %v7907_v19  ;;  %v7990_v18 = vld [vmem:[#allocation12 + $0x444] ss:$16 sps:$4 sm:$0xff]   ;;  %v7993_v19 = vld [vmem:[#allocation12 + $0x44c] ss:$16 sps:$4 sm:$0xff]  }
 0x4e5   :  { %4720 = vmatprep.subr.bf16.mxu0 %v7912_v16  ;;  %4761 = vmatprep.subr.bf16.mxu1 %v7915_v20  ;;  %v7988_v16 = vld [vmem:[#allocation12 + $0x440] ss:$16 sps:$4 sm:$0xff]   ;;  %v7991_v20 = vld [vmem:[#allocation12 + $0x448] ss:$16 sps:$4 sm:$0xff]  }
 0x4e8   :  { %4721 = vmatpush1.bf16.msra.mxu0 %v7910_v21  ;;  %4762 = vmatpush1.bf16.msra.mxu1 %v7913_v22  ;;  %v7996_v21 = vld [vmem:[#allocation12 + $0x464] ss:$16 sps:$4 sm:$0xff]   ;;  %v7999_v22 = vld [vmem:[#allocation12 + $0x46c] ss:$16 sps:$4 sm:$0xff]  }
 0x4e9   :  { %4722 = vmatprep.subr.bf16.mxu0 %v7918_v23  ;;  %4763 = vmatprep.subr.bf16.mxu1 %v7921_v24  ;;  %v7994_v23 = vld [vmem:[#allocation12 + $0x460] ss:$16 sps:$4 sm:$0xff]   ;;  %v7997_v24 = vld [vmem:[#allocation12 + $0x468] ss:$16 sps:$4 sm:$0xff]  }
 0x4ec   :  { %4723 = vmatpush1.bf16.msra.mxu0 %v7916_v25  ;;  %4764 = vmatpush1.bf16.msra.mxu1 %v7919_v26  ;;  %v8002_v25 = vld [vmem:[#allocation12 + $0x484] ss:$16 sps:$4 sm:$0xff]   ;;  %v8005_v26 = vld [vmem:[#allocation12 + $0x48c] ss:$16 sps:$4 sm:$0xff]  }
 0x4ed   :  { %4724 = vmatprep.subr.bf16.mxu0 %v7924_v1  ;;  %4765 = vmatprep.subr.bf16.mxu1 %v7927_v27  ;;  %v8000_v1 = vld [vmem:[#allocation12 + $0x480] ss:$16 sps:$4 sm:$0xff]   ;;  %v8003_v27 = vld [vmem:[#allocation12 + $0x488] ss:$16 sps:$4 sm:$0xff]  }
 0x4f0   :  { %4725 = vmatpush1.bf16.msra.mxu0 %v7922_v28  ;;  %4766 = vmatpush1.bf16.msra.mxu1 %v7925_v32  ;;  %v8008_v28 = vld [vmem:[#allocation12 + $0x4a4] ss:$16 sps:$4 sm:$0xff]   ;;  %v8011_v32 = vld [vmem:[#allocation12 + $0x4ac] ss:$16 sps:$4 sm:$0xff]  }
 0x4f1   :  { %4726 = vmatprep.subr.bf16.mxu0 %v7930_v33  ;;  %4767 = vmatprep.subr.bf16.mxu1 %v7933_v34  ;;  %v8006_v33 = vld [vmem:[#allocation12 + $0x4a0] ss:$16 sps:$4 sm:$0xff]   ;;  %v8009_v34 = vld [vmem:[#allocation12 + $0x4a8] ss:$16 sps:$4 sm:$0xff]  }
 0x4f4   :  { %4727 = vmatpush1.bf16.msra.mxu0 %v7928_v35  ;;  %4768 = vmatpush1.bf16.msra.mxu1 %v7931_v37  ;;  %v8014_v35 = vld [vmem:[#allocation12 + $0x4c4] ss:$16 sps:$4 sm:$0xff]   ;;  %v8017_v37 = vld [vmem:[#allocation12 + $0x4cc] ss:$16 sps:$4 sm:$0xff]  }
 0x4f5   :  { %4728 = vmatprep.subr.bf16.mxu0 %v7936_v29  ;;  %4769 = vmatprep.subr.bf16.mxu1 %v7939_v39  ;;  %v8012_v29 = vld [vmem:[#allocation12 + $0x4c0] ss:$16 sps:$4 sm:$0xff]   ;;  %v8015_v39 = vld [vmem:[#allocation12 + $0x4c8] ss:$16 sps:$4 sm:$0xff]  }
 0x4f8   :  { %4729 = vmatpush1.bf16.msra.mxu0 %v7934_v47  ;;  %4770 = vmatpush1.bf16.msra.mxu1 %v7937_v48  ;;  %v8020_v47 = vld [vmem:[#allocation12 + $0x4e4] ss:$16 sps:$4 sm:$0xff]   ;;  %v8023_v48 = vld [vmem:[#allocation12 + $0x4ec] ss:$16 sps:$4 sm:$0xff]  }
 0x4f9   :  { %4730 = vmatprep.subr.bf16.mxu0 %v7942_v49  ;;  %4771 = vmatprep.subr.bf16.mxu1 %v7945_v50  ;;  %v8018_v49 = vld [vmem:[#allocation12 + $0x4e0] ss:$16 sps:$4 sm:$0xff]   ;;  %v8021_v50 = vld [vmem:[#allocation12 + $0x4e8] ss:$16 sps:$4 sm:$0xff]  }
 0x4fc   :  { %4731 = vmatpush1.bf16.msra.mxu0 %v7940_v51  ;;  %4772 = vmatpush1.bf16.msra.mxu1 %v7943_v52  ;;  %v8026_v51 = vld [vmem:[#allocation12 + $0x504] ss:$16 sps:$4 sm:$0xff]   ;;  %v8029_v52 = vld [vmem:[#allocation12 + $0x50c] ss:$16 sps:$4 sm:$0xff]  }
 0x4fd   :  { %4732 = vmatprep.subr.bf16.mxu0 %v7948_v36  ;;  %4773 = vmatprep.subr.bf16.mxu1 %v7951_v53  ;;  %v8024_v36 = vld [vmem:[#allocation12 + $0x500] ss:$16 sps:$4 sm:$0xff]   ;;  %v8027_v53 = vld [vmem:[#allocation12 + $0x508] ss:$16 sps:$4 sm:$0xff]  }
 0x500   :  { %4733 = vmatpush1.bf16.msra.mxu0 %v7946_v55  ;;  %4774 = vmatpush1.bf16.msra.mxu1 %v7949_v56  ;;  %v8032_v55 = vld [vmem:[#allocation12 + $0x524] ss:$16 sps:$4 sm:$0xff]   ;;  %v8035_v56 = vld [vmem:[#allocation12 + $0x52c] ss:$16 sps:$4 sm:$0xff]  }
 0x501   :  { %4734 = vmatprep.subr.bf16.mxu0 %v7954_v57  ;;  %4775 = vmatprep.subr.bf16.mxu1 %v7957_v58  ;;  %v8030_v57 = vld [vmem:[#allocation12 + $0x520] ss:$16 sps:$4 sm:$0xff]   ;;  %v8033_v58 = vld [vmem:[#allocation12 + $0x528] ss:$16 sps:$4 sm:$0xff]  }
 0x504   :  { %4735 = vmatpush1.bf16.msra.mxu0 %v7952_v59  ;;  %4776 = vmatpush1.bf16.msra.mxu1 %v7955_v60  ;;  %v8038_v59 = vld [vmem:[#allocation12 + $0x544] ss:$16 sps:$4 sm:$0xff]   ;;  %v8041_v60 = vld [vmem:[#allocation12 + $0x54c] ss:$16 sps:$4 sm:$0xff]  }
 0x505   :  { %4736 = vmatprep.subr.bf16.mxu0 %v7960_v43  ;;  %4777 = vmatprep.subr.bf16.mxu1 %v7963_v44  ;;  %v8036_v43 = vld [vmem:[#allocation12 + $0x540] ss:$16 sps:$4 sm:$0xff]   ;;  %v8039_v44 = vld [vmem:[#allocation12 + $0x548] ss:$16 sps:$4 sm:$0xff]  }
 0x508   :  { %4737 = vmatpush1.bf16.msra.mxu0 %v7958_v61  ;;  %4778 = vmatpush1.bf16.msra.mxu1 %v7961_v62  ;;  %v8044_v61 = vld [vmem:[#allocation12 + $0x564] ss:$16 sps:$4 sm:$0xff]   ;;  %v8047_v62 = vld [vmem:[#allocation12 + $0x56c] ss:$16 sps:$4 sm:$0xff]  }
 0x509   :  { %4738 = vmatprep.subr.bf16.mxu0 %v7966_v63  ;;  %4779 = vmatprep.subr.bf16.mxu1 %v7969_v2  ;;  %v8042_v63 = vld [vmem:[#allocation12 + $0x560] ss:$16 sps:$4 sm:$0xff]   ;;  %v8045_v2 = vld [vmem:[#allocation12 + $0x568] ss:$16 sps:$4 sm:$0xff]  }
 0x50c   :  { %4739 = vmatpush1.bf16.msra.mxu0 %v7964_v45  ;;  %4780 = vmatpush1.bf16.msra.mxu1 %v7967_v3  ;;  %v8050_v45 = vld [vmem:[#allocation12 + $0x584] ss:$16 sps:$4 sm:$0xff]   ;;  %v8053_v3 = vld [vmem:[#allocation12 + $0x58c] ss:$16 sps:$4 sm:$0xff]  }
 0x50d   :  { %4740 = vmatprep.subr.bf16.mxu0 %v7972_v4  ;;  %4781 = vmatprep.subr.bf16.mxu1 %v7975_v5  ;;  %v8048_v4 = vld [vmem:[#allocation12 + $0x580] ss:$16 sps:$4 sm:$0xff]   ;;  %v8051_v5 = vld [vmem:[#allocation12 + $0x588] ss:$16 sps:$4 sm:$0xff]  }
 0x510   :  { %4741 = vmatpush1.bf16.msra.mxu0 %v7970_v6  ;;  %4782 = vmatpush1.bf16.msra.mxu1 %v7973_v7  ;;  %v8056_v6 = vld [vmem:[#allocation12 + $0x5a4] ss:$16 sps:$4 sm:$0xff]   ;;  %v8059_v7 = vld [vmem:[#allocation12 + $0x5ac] ss:$16 sps:$4 sm:$0xff]  }
 0x511   :  { %7621 = vmatprep.subr.bf16.mxu0 %v9029_v31  ;;  %7625 = vmatprep.subr.bf16.mxu1 %v9029_v31 }
 0x513   :  { %4743 = vmatmul.mubr.bf16.vlgmr.msra.gmra.mrb[24].mxu0 %v3701_v8  ;;  %4784 = vmatmul.mubr.bf16.vlgmr.msra.gmra.mrb[24].mxu1 %v3701_v8  ;;  %v8054_v8 = vld [vmem:[#allocation12 + $0x5a0] ss:$16 sps:$4 sm:$0xff]  }
 0x514   :  { %7623 = vmatpush1.bf16.msra.mxu0 %v9027_v30  ;;  %7627 = vmatpush1.bf16.msra.mxu1 %v9027_v30 }
 0x515   :  { %4861 = vmatprep.mubr.f32.mxu0 %v8448_v0  ;;  %4937 = vmatprep.mubr.f32.mxu1 %v8448_v0 }
 0x516   :  { %5333 = vmatprep.subr.bf16.mxu0 %v7978_v9  ;;  %5374 = vmatprep.subr.bf16.mxu1 %v7981_v10  ;;  %v8057_v9 = vld [vmem:[#allocation12 + $0x5a8] ss:$16 sps:$4 sm:$0xff]   ;;  %v8062_v10 = vld [vmem:[#allocation12 + $0x5c4] ss:$16 sps:$4 sm:$0xff]  }
 0x51b   :  { %6655 = vmatmul.mubr.msk.f32.vlgmr.msra.gmra.mrb[28].mxu0 %vm3548_vm8, %v4793_v11  ;;  %6656 = vmatmul.mubr.msk.f32.vlgmr.msra.gmra.mrb[28].mxu1 %vm3548_vm8, %v4869_v12  ;;  %v8063_v11 = vld [vmem:[#allocation12 + $0x5c8] ss:$16 sps:$4 sm:$0xff]   ;;  %v8068_v12 = vld [vmem:[#allocation12 + $0x5e4] ss:$16 sps:$4 sm:$0xff]  }
 0x51c   :  { %5334 = vmatpush1.bf16.msra.mxu0 %v7976_v46  ;;  %5375 = vmatpush1.bf16.msra.mxu1 %v7979_v54  ;;  %v8065_v46 = vld [vmem:[#allocation12 + $0x5cc] ss:$16 sps:$4 sm:$0xff]   ;;  %v8060_v54 = vld [vmem:[#allocation12 + $0x5c0] ss:$16 sps:$4 sm:$0xff]  }
 0x51d   :  { %5335 = vmatprep.subr.bf16.mxu0 %v7984_v13  ;;  %5376 = vmatprep.subr.bf16.mxu1 %v7987_v14  ;;  %v8071_v13 = vld [vmem:[#allocation12 + $0x5ec] ss:$16 sps:$4 sm:$0xff]   ;;  %v8066_v14 = vld [vmem:[#allocation12 + $0x5e0] ss:$16 sps:$4 sm:$0xff]  }
 0x520   :  { %5336 = vmatpush1.bf16.msra.mxu0 %v7982_v15  ;;  %5377 = vmatpush1.bf16.msra.mxu1 %v7985_v17  ;;  %v8069_v15 = vld [vmem:[#allocation12 + $0x5e8] ss:$16 sps:$4 sm:$0xff]  }
 0x521   :  { %5337 = vmatprep.subr.bf16.mxu0 %v7990_v18  ;;  %5378 = vmatprep.subr.bf16.mxu1 %v7993_v19 }
 0x524   :  { %5338 = vmatpush1.bf16.msra.mxu0 %v7988_v16  ;;  %5379 = vmatpush1.bf16.msra.mxu1 %v7991_v20 }
 0x525   :  { %5339 = vmatprep.subr.bf16.mxu0 %v7996_v21  ;;  %5380 = vmatprep.subr.bf16.mxu1 %v7999_v22 }
 0x528   :  { %5340 = vmatpush1.bf16.msra.mxu0 %v7994_v23  ;;  %5381 = vmatpush1.bf16.msra.mxu1 %v7997_v24 }
 0x529   :  { %5341 = vmatprep.subr.bf16.mxu0 %v8002_v25  ;;  %5382 = vmatprep.subr.bf16.mxu1 %v8005_v26 }
 0x52c   :  { %5342 = vmatpush1.bf16.msra.mxu0 %v8000_v1  ;;  %5383 = vmatpush1.bf16.msra.mxu1 %v8003_v27 }
 0x52d   :  { %5343 = vmatprep.subr.bf16.mxu0 %v8008_v28  ;;  %5384 = vmatprep.subr.bf16.mxu1 %v8011_v32 }
 0x530   :  { %5344 = vmatpush1.bf16.msra.mxu0 %v8006_v33  ;;  %5385 = vmatpush1.bf16.msra.mxu1 %v8009_v34 }
 0x531   :  { %5345 = vmatprep.subr.bf16.mxu0 %v8014_v35  ;;  %5386 = vmatprep.subr.bf16.mxu1 %v8017_v37 }
 0x534   :  { %5346 = vmatpush1.bf16.msra.mxu0 %v8012_v29  ;;  %5387 = vmatpush1.bf16.msra.mxu1 %v8015_v39 }
 0x535   :  { %5347 = vmatprep.subr.bf16.mxu0 %v8020_v47  ;;  %5388 = vmatprep.subr.bf16.mxu1 %v8023_v48 }
 0x538   :  { %5348 = vmatpush1.bf16.msra.mxu0 %v8018_v49  ;;  %5389 = vmatpush1.bf16.msra.mxu1 %v8021_v50 }
 0x539   :  { %5349 = vmatprep.subr.bf16.mxu0 %v8026_v51  ;;  %5390 = vmatprep.subr.bf16.mxu1 %v8029_v52 }
 0x53c   :  { %5350 = vmatpush1.bf16.msra.mxu0 %v8024_v36  ;;  %5391 = vmatpush1.bf16.msra.mxu1 %v8027_v53  ;;  %v8074_v36 = vld [vmem:[#allocation12 + $0x604] ss:$16 sps:$4 sm:$0xff]   ;;  %v8077_v53 = vld [vmem:[#allocation12 + $0x60c] ss:$16 sps:$4 sm:$0xff]  }
 0x53d   :  { %5351 = vmatprep.subr.bf16.mxu0 %v8032_v55  ;;  %5392 = vmatprep.subr.bf16.mxu1 %v8035_v56  ;;  %v5420_v55 = vld [vmem:[#allocation11 + $0xc] sm:$0x3]  ;;  %v5496_v56 = vld [vmem:[#allocation11 + $0xe] sm:$0x3] }
 0x540   :  { %5352 = vmatpush1.bf16.msra.mxu0 %v8030_v57  ;;  %5393 = vmatpush1.bf16.msra.mxu1 %v8033_v58  ;;  %v8072_v57 = vld [vmem:[#allocation12 + $0x600] ss:$16 sps:$4 sm:$0xff]   ;;  %v8075_v58 = vld [vmem:[#allocation12 + $0x608] ss:$16 sps:$4 sm:$0xff]  }
 0x541   :  { %5353 = vmatprep.subr.bf16.mxu0 %v8038_v59  ;;  %5394 = vmatprep.subr.bf16.mxu1 %v8041_v60  ;;  %v8080_v59 = vld [vmem:[#allocation12 + $0x624] ss:$16 sps:$4 sm:$0xff]   ;;  %v8083_v60 = vld [vmem:[#allocation12 + $0x62c] ss:$16 sps:$4 sm:$0xff]  }
 0x544   :  { %5354 = vmatpush1.bf16.msra.mxu0 %v8036_v43  ;;  %5395 = vmatpush1.bf16.msra.mxu1 %v8039_v44  ;;  %v8078_v43 = vld [vmem:[#allocation12 + $0x620] ss:$16 sps:$4 sm:$0xff]   ;;  %v8086_v44 = vld [vmem:[#allocation12 + $0x644] ss:$16 sps:$4 sm:$0xff]  }
 0x545   :  { %5355 = vmatprep.subr.bf16.mxu0 %v8044_v61  ;;  %5396 = vmatprep.subr.bf16.mxu1 %v8047_v62  ;;  %v8084_v61 = vld [vmem:[#allocation12 + $0x640] ss:$16 sps:$4 sm:$0xff]   ;;  %v8087_v62 = vld [vmem:[#allocation12 + $0x648] ss:$16 sps:$4 sm:$0xff]  }
 0x548   :  { %5356 = vmatpush1.bf16.msra.mxu0 %v8042_v63  ;;  %5397 = vmatpush1.bf16.msra.mxu1 %v8045_v2  ;;  %v8092_v63 = vld [vmem:[#allocation12 + $0x664] ss:$16 sps:$4 sm:$0xff]   ;;  %v8095_v2 = vld [vmem:[#allocation12 + $0x66c] ss:$16 sps:$4 sm:$0xff]  }
 0x549   :  { %5357 = vmatprep.subr.bf16.mxu0 %v8050_v45  ;;  %5398 = vmatprep.subr.bf16.mxu1 %v8053_v3  ;;  %v8090_v45 = vld [vmem:[#allocation12 + $0x660] ss:$16 sps:$4 sm:$0xff]   ;;  %v8093_v3 = vld [vmem:[#allocation12 + $0x668] ss:$16 sps:$4 sm:$0xff]  }
 0x54c   :  { %5358 = vmatpush1.bf16.msra.mxu0 %v8048_v4  ;;  %5399 = vmatpush1.bf16.msra.mxu1 %v8051_v5  ;;  %v8098_v4 = vld [vmem:[#allocation12 + $0x684] ss:$16 sps:$4 sm:$0xff]   ;;  %v8101_v5 = vld [vmem:[#allocation12 + $0x68c] ss:$16 sps:$4 sm:$0xff]  }
 0x54d   :  { %5359 = vmatprep.subr.bf16.mxu0 %v8056_v6  ;;  %5400 = vmatprep.subr.bf16.mxu1 %v8059_v7  ;;  %v8096_v6 = vld [vmem:[#allocation12 + $0x680] ss:$16 sps:$4 sm:$0xff]   ;;  %v8099_v7 = vld [vmem:[#allocation12 + $0x688] ss:$16 sps:$4 sm:$0xff]  }
 0x550   :  { %5360 = vmatpush1.bf16.msra.mxu0 %v8054_v8  ;;  %5401 = vmatpush1.bf16.msra.mxu1 %v8057_v9  ;;  %v8104_v8 = vld [vmem:[#allocation12 + $0x6a4] ss:$16 sps:$4 sm:$0xff]   ;;  %v8107_v9 = vld [vmem:[#allocation12 + $0x6ac] ss:$16 sps:$4 sm:$0xff]  }
 0x551   :  { %5361 = vmatprep.subr.bf16.mxu0 %v8062_v10  ;;  %5402 = vmatprep.subr.bf16.mxu1 %v8065_v46  ;;  %v8102_v10 = vld [vmem:[#allocation12 + $0x6a0] ss:$16 sps:$4 sm:$0xff]   ;;  %v8105_v46 = vld [vmem:[#allocation12 + $0x6a8] ss:$16 sps:$4 sm:$0xff]  }
 0x554   :  { %5362 = vmatpush1.bf16.msra.mxu0 %v8060_v54  ;;  %5403 = vmatpush1.bf16.msra.mxu1 %v8063_v11  ;;  %v8110_v54 = vld [vmem:[#allocation12 + $0x6c4] ss:$16 sps:$4 sm:$0xff]   ;;  %v8113_v11 = vld [vmem:[#allocation12 + $0x6cc] ss:$16 sps:$4 sm:$0xff]  }
 0x555   :  { %5363 = vmatprep.subr.bf16.mxu0 %v8068_v12  ;;  %5404 = vmatprep.subr.bf16.mxu1 %v8071_v13  ;;  %v8108_v12 = vld [vmem:[#allocation12 + $0x6c0] ss:$16 sps:$4 sm:$0xff]   ;;  %v8111_v13 = vld [vmem:[#allocation12 + $0x6c8] ss:$16 sps:$4 sm:$0xff]  }
 0x558   :  { %5364 = vmatpush1.bf16.msra.mxu0 %v8066_v14  ;;  %5405 = vmatpush1.bf16.msra.mxu1 %v8069_v15  ;;  %v8116_v14 = vld [vmem:[#allocation12 + $0x6e4] ss:$16 sps:$4 sm:$0xff]   ;;  %v8119_v15 = vld [vmem:[#allocation12 + $0x6ec] ss:$16 sps:$4 sm:$0xff]  }
 0x559   :  { %7629 = vmatprep.subr.bf16.mxu0 %v9029_v31  ;;  %7633 = vmatprep.subr.bf16.mxu1 %v9029_v31 }
 0x5a6   :  { %v4342_v17 = vpop.f32.mrb[20].mxu0  ;;  %v4383_v18 = vpop.f32.mrb[20].mxu1 }
 0x5a7   :  { %v4344_v19 = vpop.f32.mrb[21].mxu0  ;;  %v4385_v16 = vpop.f32.mrb[21].mxu1 }
 0x5a8   :  { %v4346_v20 = vpop.f32.mrb[22].mxu0  ;;  %v4387_v21 = vpop.f32.mrb[22].mxu1 }
 0x5a9   :  { %v4347_v22 = vpop.f32.mrb[23].mxu0  ;;  %v4388_v23 = vpop.f32.mrb[23].mxu1  ;;  %v8120_v20 = vld [vmem:[#allocation12 + $0x700] ss:$16 sps:$4 sm:$0xff]   ;;  %v8123_v21 = vld [vmem:[#allocation12 + $0x708] ss:$16 sps:$4 sm:$0xff]  }
 0x5aa   :  { %v8128_v22 = vld [vmem:[#allocation12 + $0x724] ss:$16 sps:$4 sm:$0xff]   ;;  %v8131_v23 = vld [vmem:[#allocation12 + $0x72c] ss:$16 sps:$4 sm:$0xff]  }
 0x5e6   :  { %v4744_v24 = vpop.f32.mrb[24].mxu0  ;;  %v4785_v25 = vpop.f32.mrb[24].mxu1 }
 0x5e7   :  { %v9059_v26 = vadd.f32 %v4744_v24, %v4342_v17  ;;  %v9061_v1 = vadd.f32 %v4785_v25, %v4383_v18  ;;  %v4746_v27 = vpop.f32.mrb[25].mxu0  ;;  %v4787_v28 = vpop.f32.mrb[25].mxu1  ;;  %v8114_v17 = vld [vmem:[#allocation12 + $0x6e0] ss:$16 sps:$4 sm:$0xff]   ;;  %v8117_v18 = vld [vmem:[#allocation12 + $0x6e8] ss:$16 sps:$4 sm:$0xff]  }
 0x5e8   :  { %v9063_v32 = vadd.f32 %v4746_v27, %v4344_v19  ;;  %v9065_v33 = vadd.f32 %v4787_v28, %v4385_v16  ;;  %v4748_v31 = vpop.f32.mrb[26].mxu0  ;;  %v4789_v34 = vpop.f32.mrb[26].mxu1  ;;  %v8122_v19 = vld [vmem:[#allocation12 + $0x704] ss:$16 sps:$4 sm:$0xff]   ;;  %v8125_v16 = vld [vmem:[#allocation12 + $0x70c] ss:$16 sps:$4 sm:$0xff]  }
 0x5e9   :  { %v4749_v35 = vpop.f32.mrb[27].mxu0  ;;  %v4790_v37 = vpop.f32.mrb[27].mxu1  ;;  %v8126_v24 = vld [vmem:[#allocation12 + $0x720] ss:$16 sps:$4 sm:$0xff]   ;;  %v8129_v25 = vld [vmem:[#allocation12 + $0x728] ss:$16 sps:$4 sm:$0xff]  }
 0x5ea   :  { %v8134_v27 = vld [vmem:[#allocation12 + $0x744] ss:$16 sps:$4 sm:$0xff]   ;;  %v8137_v28 = vld [vmem:[#allocation12 + $0x74c] ss:$16 sps:$4 sm:$0xff]   ;;  %v8132_v31 = vld [vmem:[#allocation12 + $0x740] ss:$16 sps:$4 sm:$0xff]  }
 0x5eb   :  { %v8135_v34 = vld [vmem:[#allocation12 + $0x748] ss:$16 sps:$4 sm:$0xff]   ;;  %v8140_v35 = vld [vmem:[#allocation12 + $0x764] ss:$16 sps:$4 sm:$0xff]   ;;  %v8143_v37 = vld [vmem:[#allocation12 + $0x76c] ss:$16 sps:$4 sm:$0xff]  }
 0x5ee   :  { %v4863_v29 = vpop.f32.mrb[28].mxu0  ;;  %v4939_v39 = vpop.f32.mrb[28].mxu1 }
 0x5ef   :  { %v4944_v47 = vmax.f32 %v4863_v29, %v4939_v39  ;;  %v4865_v48 = vpop.f32.mrb[29].mxu0  ;;  %v4941_v49 = vpop.f32.mrb[29].mxu1  ;;  %v8138_v29 = vld [vmem:[#allocation12 + $0x760] ss:$16 sps:$4 sm:$0xff]   ;;  %v8141_v39 = vld [vmem:[#allocation12 + $0x768] ss:$16 sps:$4 sm:$0xff]  }
 0x5f0   :  { %v4945_v50 = vmax.f32 %v4865_v48, %v4941_v49  ;;  %v8149_v48 = vld [vmem:[#allocation12 + $0x78c] ss:$16 sps:$4 sm:$0xff]   ;;  %v8144_v49 = vld [vmem:[#allocation12 + $0x780] ss:$16 sps:$4 sm:$0xff]  }
 0x5f1   :  { %v4946_v52 = vpack.c.bf16 %v4944_v47, %v4944_v47  ;;  %v8146_v47 = vld [vmem:[#allocation12 + $0x784] ss:$16 sps:$4 sm:$0xff]  }
 0x5f2   :  { %v4947_v51 = vpack.c.bf16 %v4945_v50, %v4945_v50  ;;  %v8147_v50 = vld [vmem:[#allocation12 + $0x788] ss:$16 sps:$4 sm:$0xff]  }
 0x5f4   :  { %5365 = vmatprep.mubr.bf16.mxu0 %v4947_v51  ;;  %5406 = vmatprep.mubr.bf16.mxu1 %v4947_v51  ;;  %v8150_v51 = vld [vmem:[#allocation12 + $0x7a0] ss:$16 sps:$4 sm:$0xff]  }
 0x5f5   :  { %5366 = vmatmul.mubr.bf16.vlgmr.msra.gmra.mrb[32].mxu0 %v4946_v52  ;;  %5407 = vmatmul.mubr.bf16.vlgmr.msra.gmra.mrb[32].mxu1 %v4946_v52  ;;  %v8152_v52 = vld [vmem:[#allocation12 + $0x7a4] ss:$16 sps:$4 sm:$0xff]  }
 0x5f6   :  { %7631 = vmatpush1.bf16.msra.mxu0 %v9027_v30  ;;  %7635 = vmatpush1.bf16.msra.mxu1 %v9027_v30  ;;  %v8081_v30 = vld [vmem:[#allocation12 + $0x628] ss:$16 sps:$4 sm:$0xff]  }
 0x5f7   :  { %5488 = vmatprep.mubr.f32.mxu0 %v8448_v0  ;;  %5564 = vmatprep.mubr.f32.mxu1 %v8448_v0  ;;  %v8089_v0 = vld [vmem:[#allocation12 + $0x64c] ss:$16 sps:$4 sm:$0xff]  }
 0x5f8   :  { %5960 = vmatprep.subr.bf16.mxu0 %v8074_v36  ;;  %6001 = vmatprep.subr.bf16.mxu1 %v8077_v53  ;;  %v8153_v36 = vld [vmem:[#allocation12 + $0x7a8] ss:$16 sps:$4 sm:$0xff]   ;;  %v8155_v53 = vld [vmem:[#allocation12 + $0x7ac] ss:$16 sps:$4 sm:$0xff]  }
 0x5fd   :  { %6721 = vmatmul.mubr.msk.f32.vlgmr.msra.gmra.mrb[30].mxu0 %vm3548_vm8, %v5420_v55  ;;  %6722 = vmatmul.mubr.msk.f32.vlgmr.msra.gmra.mrb[30].mxu1 %vm3548_vm8, %v5496_v56  ;;  %v8158_v55 = vld [vmem:[#allocation12 + $0x7c4] ss:$16 sps:$4 sm:$0xff]   ;;  %v8161_v56 = vld [vmem:[#allocation12 + $0x7cc] ss:$16 sps:$4 sm:$0xff]  }
 0x5fe   :  { %5961 = vmatpush1.bf16.msra.mxu0 %v8072_v57  ;;  %6002 = vmatpush1.bf16.msra.mxu1 %v8075_v58  ;;  %v8156_v57 = vld [vmem:[#allocation12 + $0x7c0] ss:$16 sps:$4 sm:$0xff]   ;;  %v8159_v58 = vld [vmem:[#allocation12 + $0x7c8] ss:$16 sps:$4 sm:$0xff]  }
 0x5ff   :  { %5962 = vmatprep.subr.bf16.mxu0 %v8080_v59  ;;  %6003 = vmatprep.subr.bf16.mxu1 %v8083_v60  ;;  %v8162_v59 = vld [vmem:[#allocation12 + $0x7e0] ss:$16 sps:$4 sm:$0xff]   ;;  %v8164_v60 = vld [vmem:[#allocation12 + $0x7e4] ss:$16 sps:$4 sm:$0xff]  }
 0x602   :  { %5963 = vmatpush1.bf16.msra.mxu0 %v8078_v43  ;;  %6004 = vmatpush1.bf16.msra.mxu1 %v8081_v30  ;;  %v8165_v43 = vld [vmem:[#allocation12 + $0x7e8] ss:$16 sps:$4 sm:$0xff]   ;;  %v8167_v30 = vld [vmem:[#allocation12 + $0x7ec] ss:$16 sps:$4 sm:$0xff]  }
 0x603   :  { %5964 = vmatprep.subr.bf16.mxu0 %v8086_v44  ;;  %6005 = vmatprep.subr.bf16.mxu1 %v8089_v0  ;;  %v8168_v44 = vld [vmem:[#allocation15 + $0x40] sm:$0xff]  }
 0x604   :  { %v8169_v0 = vld [vmem:[#allocation15 + $0xc0] sm:$0xff]  }
 0x606   :  { %5965 = vmatpush1.bf16.msra.mxu0 %v8084_v61  ;;  %6006 = vmatpush1.bf16.msra.mxu1 %v8087_v62 }
 0x607   :  { %5966 = vmatprep.subr.bf16.mxu0 %v8092_v63  ;;  %6007 = vmatprep.subr.bf16.mxu1 %v8095_v2 }
 0x60a   :  { %5967 = vmatpush1.bf16.msra.mxu0 %v8090_v45  ;;  %6008 = vmatpush1.bf16.msra.mxu1 %v8093_v3 }
 0x60b   :  { %5968 = vmatprep.subr.bf16.mxu0 %v8098_v4  ;;  %6009 = vmatprep.subr.bf16.mxu1 %v8101_v5 }
 0x60e   :  { %5969 = vmatpush1.bf16.msra.mxu0 %v8096_v6  ;;  %6010 = vmatpush1.bf16.msra.mxu1 %v8099_v7 }
 0x60f   :  { %5970 = vmatprep.subr.bf16.mxu0 %v8104_v8  ;;  %6011 = vmatprep.subr.bf16.mxu1 %v8107_v9 }
 0x612   :  { %5971 = vmatpush1.bf16.msra.mxu0 %v8102_v10  ;;  %6012 = vmatpush1.bf16.msra.mxu1 %v8105_v46 }
 0x613   :  { %5972 = vmatprep.subr.bf16.mxu0 %v8110_v54  ;;  %6013 = vmatprep.subr.bf16.mxu1 %v8113_v11 }
 0x616   :  { %5973 = vmatpush1.bf16.msra.mxu0 %v8108_v12  ;;  %6014 = vmatpush1.bf16.msra.mxu1 %v8111_v13  ;;  %v8170_v13 = vld [vmem:[#allocation15] sm:$0xff]  }
 0x617   :  { %5974 = vmatprep.subr.bf16.mxu0 %v8116_v14  ;;  %6015 = vmatprep.subr.bf16.mxu1 %v8119_v15  ;;  %v8171_v14 = vld [vmem:[#allocation15 + $0x80] sm:$0xff]  }
 0x61a   :  { %5975 = vmatpush1.bf16.msra.mxu0 %v8114_v17  ;;  %6016 = vmatpush1.bf16.msra.mxu1 %v8117_v18  ;;  %v8172_v17 = vld [vmem:[#allocation15 + $0x48] sm:$0xff]  }
 0x61b   :  { %5976 = vmatprep.subr.bf16.mxu0 %v8122_v19  ;;  %6017 = vmatprep.subr.bf16.mxu1 %v8125_v16  ;;  %v8175_v18 = vld [vmem:[#allocation15 + $0x88] sm:$0xff]   ;;  %v8176_v19 = vld [vmem:[#allocation15 + $0x50] sm:$0xff]  }
 0x61c   :  { %v8177_v16 = vld [vmem:[#allocation15 + $0xd0] sm:$0xff]  }
 0x61e   :  { %5977 = vmatpush1.bf16.msra.mxu0 %v8120_v20  ;;  %6018 = vmatpush1.bf16.msra.mxu1 %v8123_v21  ;;  %v8178_v20 = vld [vmem:[#allocation15 + $0x10] sm:$0xff]  }
 0x61f   :  { %5978 = vmatprep.subr.bf16.mxu0 %v8128_v22  ;;  %6019 = vmatprep.subr.bf16.mxu1 %v8131_v23  ;;  %v8179_v21 = vld [vmem:[#allocation15 + $0x90] sm:$0xff]   ;;  %v8180_v22 = vld [vmem:[#allocation15 + $0x58] sm:$0xff]  }
 0x620   :  { %v8181_v23 = vld [vmem:[#allocation15 + $0xd8] sm:$0xff]  }
 0x622   :  { %5979 = vmatpush1.bf16.msra.mxu0 %v8126_v24  ;;  %6020 = vmatpush1.bf16.msra.mxu1 %v8129_v25  ;;  %v8182_v24 = vld [vmem:[#allocation15 + $0x18] sm:$0xff]  }
 0x623   :  { %5980 = vmatprep.subr.bf16.mxu0 %v8134_v27  ;;  %6021 = vmatprep.subr.bf16.mxu1 %v8137_v28  ;;  %v8183_v25 = vld [vmem:[#allocation15 + $0x98] sm:$0xff]   ;;  %v8184_v27 = vld [vmem:[#allocation15 + $0x60] sm:$0xff]  }
 0x624   :  { %v8185_v28 = vld [vmem:[#allocation15 + $0xe0] sm:$0xff]  }
 0x626   :  { %5981 = vmatpush1.bf16.msra.mxu0 %v8132_v31  ;;  %6022 = vmatpush1.bf16.msra.mxu1 %v8135_v34  ;;  %v8186_v31 = vld [vmem:[#allocation15 + $0x20] sm:$0xff]  }
 0x627   :  { %5982 = vmatprep.subr.bf16.mxu0 %v8140_v35  ;;  %6023 = vmatprep.subr.bf16.mxu1 %v8143_v37  ;;  %v8187_v34 = vld [vmem:[#allocation15 + $0xa0] sm:$0xff]   ;;  %v8188_v35 = vld [vmem:[#allocation15 + $0x68] sm:$0xff]  }
 0x628   :  { %v8189_v37 = vld [vmem:[#allocation15 + $0xe8] sm:$0xff]  }
 0x62a   :  { %5983 = vmatpush1.bf16.msra.mxu0 %v8138_v29  ;;  %6024 = vmatpush1.bf16.msra.mxu1 %v8141_v39  ;;  %v8190_v29 = vld [vmem:[#allocation15 + $0x28] sm:$0xff]  }
 0x62b   :  { %5984 = vmatprep.subr.bf16.mxu0 %v8146_v47  ;;  %6025 = vmatprep.subr.bf16.mxu1 %v8149_v48  ;;  %v8191_v39 = vld [vmem:[#allocation15 + $0xa8] sm:$0xff]   ;;  %v8192_v47 = vld [vmem:[#allocation15 + $0x70] sm:$0xff]  }
 0x62c   :  { %v8193_v48 = vld [vmem:[#allocation15 + $0xf0] sm:$0xff]  }
 0x62e   :  { %5985 = vmatpush1.bf16.msra.mxu0 %v8144_v49  ;;  %6026 = vmatpush1.bf16.msra.mxu1 %v8147_v50  ;;  %v8194_v49 = vld [vmem:[#allocation15 + $0x30] sm:$0xff]  }
 0x62f   :  { %5986 = vmatprep.subr.bf16.mxu0 %v8152_v52  ;;  %6027 = vmatprep.subr.bf16.mxu1 %v8155_v53  ;;  %v8195_v50 = vld [vmem:[#allocation15 + $0xb0] sm:$0xff]   ;;  %v8197_v52 = vld [vmem:[#allocation15 + $0xf8] sm:$0xff]  }
 0x630   :  { %v8199_v53 = vld [vmem:[#allocation15 + $0xb8] sm:$0xff]  }
 0x632   :  { %5987 = vmatpush1.bf16.msra.mxu0 %v8150_v51  ;;  %6028 = vmatpush1.bf16.msra.mxu1 %v8153_v36  ;;  %v8196_v51 = vld [vmem:[#allocation15 + $0x78] sm:$0xff]  }
 0x633   :  { %5988 = vmatprep.subr.bf16.mxu0 %v8158_v55  ;;  %6029 = vmatprep.subr.bf16.mxu1 %v8161_v56  ;;  %v8198_v36 = vld [vmem:[#allocation15 + $0x38] sm:$0xff]  }
 0x634   :  { %v6046_v55 = vld [vmem:[#allocation14] sm:$0xf] }
 0x635   :  { %v6051_v56 = vrot.slane %v6046_v55, %v8874_v38 }
 0x636   :  { %5989 = vmatpush1.bf16.msra.mxu0 %v8156_v57  ;;  %6030 = vmatpush1.bf16.msra.mxu1 %v8159_v58  ;;  %v6059_v57 = vrot.slane %v6046_v55, %v8876_v40 }
 0x637   :  { %5990 = vmatprep.subr.bf16.mxu0 %v8164_v60  ;;  %6031 = vmatprep.subr.bf16.mxu1 %v8167_v30  ;;  %v6055_v60 = vrot.slane %v6046_v55, %v8878_v41 }
 0x63a   :  { %5991 = vmatpush1.bf16.msra.mxu0 %v8162_v59  ;;  %6032 = vmatpush1.bf16.msra.mxu1 %v8165_v43  ;;  %v6063_v43 = vrot.slane %v6046_v55, %v8880_v42 }
 0x63b   :  { %6820 = vmatprep.subr.bf16.mxu0 %v8168_v44  ;;  %6842 = vmatprep.subr.bf16.mxu1 %v8169_v0 }
 0x6c8   :  { %v5367_v61 = vpop.f32.mrb[32].mxu0  ;;  %v5408_v62 = vpop.f32.mrb[32].mxu1 }
 0x6c9   :  { %v9074_v63 = vadd.f32 %v5367_v61, %v9059_v26  ;;  %v9077_v2 = vadd.f32 %v5408_v62, %v9061_v1  ;;  %v5369_v45 = vpop.f32.mrb[33].mxu0  ;;  %v5410_v3 = vpop.f32.mrb[33].mxu1 }
 0x6ca   :  { %v9080_v4 = vadd.f32 %v5369_v45, %v9063_v32  ;;  %v9083_v5 = vadd.f32 %v5410_v3, %v9065_v33  ;;  %v5371_v6 = vpop.f32.mrb[34].mxu0  ;;  %v5412_v7 = vpop.f32.mrb[34].mxu1  ;;  %v8173_v32 = vld [vmem:[#allocation15 + $0xc8] sm:$0xff]  }
 0x6cb   :  { %v5372_v8 = vpop.f32.mrb[35].mxu0  ;;  %v5413_v9 = vpop.f32.mrb[35].mxu1  ;;  %v8174_v33 = vld [vmem:[#allocation15 + $0x8] sm:$0xff]  }
 0x6d0   :  { %v5490_v10 = vpop.f32.mrb[30].mxu0  ;;  %v5566_v46 = vpop.f32.mrb[30].mxu1 }
 0x6d1   :  { %v5571_v54 = vmax.f32 %v5490_v10, %v5566_v46  ;;  %v5492_v26 = vpop.f32.mrb[31].mxu0  ;;  %v5568_v11 = vpop.f32.mrb[31].mxu1 }
 0x6d2   :  { %v5572_v12 = vmax.f32 %v5492_v26, %v5568_v11 }
 0x6d3   :  { %v5573_v15 = vpack.c.bf16 %v5571_v54, %v5571_v54 }
 0x6d4   :  { %v5574_v1 = vpack.c.bf16 %v5572_v12, %v5572_v12  ;;  %v6787_v12 = vld [vmem:[#allocation17] ss:$0 sm:$0xff] }
 0x6d6   :  { %5992 = vmatprep.mubr.bf16.mxu0 %v5574_v1  ;;  %6033 = vmatprep.mubr.bf16.mxu1 %v5574_v1 }
 0x6d7   :  { %5993 = vmatmul.mubr.bf16.vlgmr.msra.gmra.mrb[36].mxu0 %v5573_v15  ;;  %6034 = vmatmul.mubr.bf16.vlgmr.msra.gmra.mrb[36].mxu1 %v5573_v15 }
 0x6d8   :  { %6821 = vmatpush3.bf16.msra.mxu0 %v8170_v13  ;;  %6843 = vmatpush3.bf16.msra.mxu1 %v8171_v14 }
 0x6d9   :  { %6822 = vmatprep.subr.bf16.mxu0 %v8172_v17  ;;  %6844 = vmatprep.subr.bf16.mxu1 %v8173_v32 }
 0x6dc   :  { %6823 = vmatpush3.bf16.msra.mxu0 %v8174_v33  ;;  %6845 = vmatpush3.bf16.msra.mxu1 %v8175_v18 }
 0x6dd   :  { %6824 = vmatprep.subr.bf16.mxu0 %v8176_v19  ;;  %6846 = vmatprep.subr.bf16.mxu1 %v8177_v16 }
 0x6e0   :  { %6825 = vmatpush3.bf16.msra.mxu0 %v8178_v20  ;;  %6847 = vmatpush3.bf16.msra.mxu1 %v8179_v21 }
 0x6e1   :  { %6826 = vmatprep.subr.bf16.mxu0 %v8180_v22  ;;  %6848 = vmatprep.subr.bf16.mxu1 %v8181_v23 }
 0x6e4   :  { %6827 = vmatpush3.bf16.msra.mxu0 %v8182_v24  ;;  %6849 = vmatpush3.bf16.msra.mxu1 %v8183_v25 }
 0x6e5   :  { %6828 = vmatprep.subr.bf16.mxu0 %v8184_v27  ;;  %6850 = vmatprep.subr.bf16.mxu1 %v8185_v28 }
 0x6e8   :  { %6829 = vmatpush3.bf16.msra.mxu0 %v8186_v31  ;;  %6851 = vmatpush3.bf16.msra.mxu1 %v8187_v34 }
 0x6e9   :  { %6830 = vmatprep.subr.bf16.mxu0 %v8188_v35  ;;  %6852 = vmatprep.subr.bf16.mxu1 %v8189_v37 }
 0x6ec   :  { %6831 = vmatpush3.bf16.msra.mxu0 %v8190_v29  ;;  %6853 = vmatpush3.bf16.msra.mxu1 %v8191_v39 }
 0x6ed   :  { %6832 = vmatprep.subr.bf16.mxu0 %v8192_v47  ;;  %6854 = vmatprep.subr.bf16.mxu1 %v8193_v48 }
 0x6f0   :  { %6833 = vmatpush3.bf16.msra.mxu0 %v8194_v49  ;;  %6855 = vmatpush3.bf16.msra.mxu1 %v8195_v50 }
 0x6f1   :  { %6834 = vmatprep.subr.bf16.mxu0 %v8196_v51  ;;  %6856 = vmatprep.subr.bf16.mxu1 %v8197_v52 }
 0x6f4   :  { %6835 = vmatpush3.bf16.msra.mxu0 %v8198_v36  ;;  %6857 = vmatpush3.bf16.msra.mxu1 %v8199_v53 }
 0x7aa   :  { %v5994_v58 = vpop.f32.mrb[36].mxu0  ;;  %v6035_v59 = vpop.f32.mrb[36].mxu1 }
 0x7ab   :  { %v6042_v30 = vadd.f32 %v5994_v58, %v9074_v63  ;;  %v6044_v44 = vadd.f32 %v6035_v59, %v9077_v2  ;;  %v5996_v0 = vpop.f32.mrb[37].mxu0  ;;  %v6037_v61 = vpop.f32.mrb[37].mxu1 }
 0x7ac   :  { %v6043_v62 = vadd.f32 %v5996_v0, %v9080_v4  ;;  %v6045_v45 = vadd.f32 %v6037_v61, %v9083_v5  ;;  %v5998_v3 = vpop.f32.mrb[38].mxu0  ;;  %v6039_v38 = vpop.f32.mrb[38].mxu1 }
 0x7ad   :  { %v6068_v6 = vadd.f32 %v6051_v56, %v6042_v30  ;;  %v6070_v40 = vadd.f32 %v6059_v57, %v6044_v44  ;;  %v5999_v7 = vpop.f32.mrb[39].mxu0  ;;  %v6040_v8 = vpop.f32.mrb[39].mxu1 }
 0x7ae   :  { %v6069_v9 = vadd.f32 %v6055_v60, %v6043_v62  ;;  %v6071_v41 = vadd.f32 %v6063_v43, %v6045_v45 }
 0x7af   :  { %v6072_v10 = vmax.f32 %v6068_v6, 0.0  ;;  %v6074_v42 = vmax.f32 %v6070_v40, 0.0 }
 0x7b0   :  { %v6073_v46 = vmax.f32 %v6069_v9, 0.0  ;;  %v6075_v63 = vmax.f32 %v6071_v41, 0.0 }
 0x7b1   :  { %v6076_v26 = vpack.c.bf16 %v6072_v10, %v6072_v10  ;;  %v6078_v11 = vpack.c.bf16 %v6074_v42, %v6074_v42 }
 0x7b2   :  { %v6077_v54 = vpack.c.bf16 %v6073_v46, %v6073_v46  ;;  %v6079_v2 = vpack.c.bf16 %v6075_v63, %v6075_v63 }
 0x7b4   :  { %6375 = vmatprep.mubr.bf16.mxu0 %v6077_v54  ;;  %6415 = vmatprep.mubr.bf16.mxu1 %v6079_v2 }
 0x7b5   :  { %6376 = vmatmul.mubr.bf16.vlgmr.msra.gmra.mrb[40].mxu0 %v6076_v26  ;;  %6416 = vmatmul.mubr.bf16.vlgmr.msra.gmra.mrb[40].mxu1 %v6078_v11 }
 0x888   :  { %v6836_v4 = vpop.f32.mrb[40].mxu0  ;;  %v6858_v5 = vpop.f32.mrb[40].mxu1 }
 0x889   :  { %v6837_v1 = vpop.f32.mrb[41].mxu0  ;;  %v6859_v13 = vpop.f32.mrb[41].mxu1 }
 0x88a   :  { %v6838_v14 = vadd.f32 %v6837_v1, %v6836_v4  ;;  %v6860_v15 = vadd.f32 %v6859_v13, %v6858_v5  ;;  %v6839_v17 = vpop.f32.mrb[42].mxu0  ;;  %v6861_v32 = vpop.f32.mrb[42].mxu1 }
 0x88b   :  { %v6840_v33 = vpop.f32.mrb[43].mxu0  ;;  %v6862_v18 = vpop.f32.mrb[43].mxu1 }
 0x88c   :  { %v6378_v19 = vadd.f32 %v6838_v14, %v6787_v12 }
 0x88e   :  { %v6418_v16 = vadd.f32 %v6860_v15, %v6378_v19 }
 0x890   :  { %6423 = vst [vmem:[#allocation18] sm:$0x3] %v6418_v16 }
 0x891   :  { %8409 = shalt.err (!%p8406_p6)
}
 0x892   :  { %s8410_s2 = scalar_lea.hbm %s9115_s10, 32 }
 0x893   :  { %p8411_p7 = scmp.ne.s32.totalorder %s9115_s10, %s8410_s2  ;;  %p8414_p8 = scmp.lt.u32.totalorder %s8410_s2, %s9115_s10 }
 0x895   :  { %p8416_p9 = pnand %p8414_p8, %p8411_p7 }
 0x897   :  { %8419 = shalt.err (!%p8416_p9)
}
 0x898   :  { %6433 = dma.vmem_to_hbm [thread:$0]  %s6431_s8, 32, %s9115_s10, [#allocation5]  }
 0x899   :  { %8430 = dma.done.wait [#allocation5], 32  }
 0x89a   :  { %8431 = vsyncadd [#allocation5], 4294967264 }
 0x89b   :  { %6437 = vsyncpa [#allocation4], 1 }
 0x89c   :  { %6438 = vsyncpa [#allocation7], 1 }
 0x89d   :  { %6439 = vsyncpa [#allocation10], 1 }
 0x89e   :  { %6440 = vsyncpa [#allocation13], 1 }
 0x89f   :  { %6441 = vsyncpa [#allocation16], 1 }
 0x8a0   :  { %6442 = vsyncpa [#allocation5], 1 }

</bundles_post_ra>
